<compile_context>
chip_gen: v7x
topology: tpu7x:2x2x1
jax: 0.10.0
libtpu: 0.0.40
codegen_flags: <defaults>
</compile_context>

<pallas_src>
import jax
import jax.numpy as jnp
from jax import lax
from jax.experimental import pallas as pl
from jax.experimental.pallas import tpu as pltpu

_SUB = 8      # sublanes
_LANE = 128   # lanes


def _round_up(x, m):
    return (x + m - 1) // m * m


# ----------------------------- Pallas kernel --------------------------------
def appro_sound_kernel(sents_ref, lens_ref, wih_ref, bih_ref, whh_ref, bhh_n_ref,
                       ws_w_ref, ws_b_ref, v_w_ref, fc_w_ref, fc_b_ref, feats_ref,
                       out_ref, gx_scr, out_scr):
    T, TB, Wp = sents_ref.shape
    hhp = whh_ref.shape[0] // 2          # padded half-hidden size (multiple of 128)
    f32 = jnp.float32
    bf16 = jnp.bfloat16

    # -- (a) hoisted input->hidden matmul: all timesteps, both directions, bf16 MXU.
    sents_flat = sents_ref[...].reshape(T * TB, Wp).astype(bf16)
    gx_all = (jnp.dot(sents_flat, wih_ref[...], preferred_element_type=f32)
              + bih_ref[...])                                    # [T*TB, 6*hhp] f32
    gx_scr[...] = gx_all.reshape(T, TB, 6 * hhp).astype(bf16)    # bf16 scratch: half the traffic

    # -- (b) packed-sequence validity mask, kept boolean (no f32 mask slab).
    t_ids = lax.broadcasted_iota(jnp.int32, (T, TB, 1), 0)
    mask = t_ids < lens_ref[...][None, :, :]                     # [T, TB, 1] bool

    bhh_nf = bhh_n_ref[:, :hhp]          # n-gate recurrent biases (scaled by r in-loop)
    bhh_nb = bhh_n_ref[:, hhp:]

    # -- (c) fused fwd/bwd recurrence: ONE block-diagonal matmul per step, unrolled.
    h = jnp.zeros((TB, 2 * hhp), f32)    # [ h_fwd | h_bwd ]
    for s in range(T):
        tb = T - 1 - s
        gh = jnp.dot(h.astype(bf16), whh_ref[...],
                     preferred_element_type=f32)                 # [TB, 6*hhp]
        gx_f = gx_scr[s, :, :3 * hhp].astype(f32)
        gx_b = gx_scr[tb, :, 3 * hhp:].astype(f32)
        gh_f = gh[:, :3 * hhp]
        gh_b = gh[:, 3 * hhp:]

        # forward direction (timestep s)
        rz_f = jax.nn.sigmoid(gx_f[:, :2 * hhp] + gh_f[:, :2 * hhp])
        n_f = jnp.tanh(gx_f[:, 2 * hhp:] + rz_f[:, :hhp] * (gh_f[:, 2 * hhp:] + bhh_nf))
        z_f = rz_f[:, hhp:]
        hf_new = (1.0 - z_f) * n_f + z_f * h[:, :hhp]

        # backward direction (timestep T-1-s)
        rz_b = jax.nn.sigmoid(gx_b[:, :2 * hhp] + gh_b[:, :2 * hhp])
        n_b = jnp.tanh(gx_b[:, 2 * hhp:] + rz_b[:, :hhp] * (gh_b[:, 2 * hhp:] + bhh_nb))
        z_b = rz_b[:, hhp:]
        hb_new = (1.0 - z_b) * n_b + z_b * h[:, hhp:]

        m_f = mask[s]
        m_b = mask[tb]
        out_scr[s, :, :hhp] = jnp.where(m_f, hf_new, 0.0)        # fwd half of bi-GRU output
        out_scr[tb, :, hhp:] = jnp.where(m_b, hb_new, 0.0)       # bwd half
        h = jnp.concatenate([jnp.where(m_f, hf_new, h[:, :hhp]),     # padded steps: h frozen
                             jnp.where(m_b, hb_new, h[:, hhp:])], axis=-1)

    # -- (d) attention over time + fused classifier.
    gru_out = out_scr[...]                                       # [T, TB, 2*hhp]
    dec_proj = (jnp.dot(h.astype(bf16), ws_w_ref[...], preferred_element_type=f32)
                + ws_b_ref[...])                                 # [TB, 2*hhp]
    tmp = jnp.tanh(gru_out + dec_proj[None, :, :])               # [T, TB, 2*hhp]
    # v_b omitted: a per-row constant cancels exactly in the softmax over time.
    scores = jnp.sum(tmp * v_w_ref[...][None, :, :], axis=-1, keepdims=True)  # [T, TB, 1]

    m = jnp.max(scores, axis=0, keepdims=True)
    e = jnp.exp(scores - m)
    denom = jnp.sum(e, axis=0, keepdims=True)                    # [1, TB, 1]
    inv = pl.reciprocal(denom, approx=True)                      # EUP slot
    inv = inv * (2.0 - denom * inv)                              # 1 Newton step -> f32 accurate
    attn = e * inv
    context = jnp.sum(attn * gru_out, axis=0)                    # [TB, 2*hhp]

    cls_in = jnp.concatenate([context, feats_ref[...]], axis=-1).astype(bf16)
    out_ref[...] = (jnp.dot(cls_in, fc_w_ref[...], preferred_element_type=f32)
                    + fc_b_ref[...])


# ----------------------------- wrapper ---------------------------------------
@jax.jit
def appro_sound_forward(sents_tm, lens, params, feats):
    """sents_tm: [T, B, w_dim] f32 (time-major, already embedded);
       lens: [B] int32 (valid lengths); feats: [B, 2*f_dim] f32 (f1 ++ f2 embeddings);
       params: original (unpadded) layout, weights stored [in, out], gates [r|z|n]."""
    T, B, w_dim = sents_tm.shape
    hh = params["whh_f"].shape[0]
    C = params["fc_b"].shape[-1]
    Fdim = feats.shape[1]

    TB = 64 if B > 64 else _round_up(B, _SUB)    # batch tile (one grid step per tile)
    Bp = _round_up(B, TB)
    Wp = _round_up(w_dim, _LANE)
    hhp = _round_up(hh, _LANE)
    Hp = 2 * hhp
    Fp = _round_up(Fdim, _LANE)
    Cp = _round_up(C, _LANE)
    f32 = jnp.float32
    bf16 = jnp.bfloat16

    def pad_gates(a, rows_p):
        """[rows, 3*hh] -> [rows_p, 3*hhp] with each gate block lane-aligned."""
        rows = a.shape[0]
        out = jnp.zeros((rows_p, 3 * hhp), f32)
        for g in range(3):
            out = out.at[:rows, g * hhp:g * hhp + hh].set(a[:, g * hh:(g + 1) * hh])
        return out

    def place_halves_rows(a):          # [2*hh, c] -> [Hp, c]
        out = jnp.zeros((Hp, a.shape[1]), f32)
        out = out.at[:hh].set(a[:hh])
        out = out.at[hhp:hhp + hh].set(a[hh:])
        return out

    def place_halves_cols(a):          # [r, 2*hh] -> [r, Hp]
        out = jnp.zeros((a.shape[0], Hp), f32)
        out = out.at[:, :hh].set(a[:, :hh])
        out = out.at[:, hhp:hhp + hh].set(a[:, hh:])
        return out

    def fold_in_bias(bih, bhh):
        # r/z recurrent biases fold into the precomputed gate bias; keep n-gate apart.
        return jnp.concatenate([bih[:, :2 * hh] + bhh[:, :2 * hh], bih[:, 2 * hh:]], axis=1)

    # input->hidden weights/bias for both directions, column layout [rf zf nf | rb zb nb]
    wih_both = jnp.concatenate([pad_gates(params["wih_f"], Wp),
                                pad_gates(params["wih_b"], Wp)], axis=1).astype(bf16)  # [Wp, 6*hhp]
    bih_both = jnp.concatenate(
        [pad_gates(fold_in_bias(params["bih_f"], params["bhh_f"]), 1),
         pad_gates(fold_in_bias(params["bih_b"], params["bhh_b"]), 1)], axis=1)        # [1, 6*hhp] f32

    # block-diagonal recurrent weight: rows [h_f | h_b] -> cols [fwd gates | bwd gates]
    whh_bd = jnp.zeros((Hp, 6 * hhp), f32)
    whh_bd = whh_bd.at[:hhp, :3 * hhp].set(pad_gates(params["whh_f"], hhp))
    whh_bd = whh_bd.at[hhp:, 3 * hhp:].set(pad_gates(params["whh_b"], hhp))
    whh_bd = whh_bd.astype(bf16)                                                       # [2*hhp, 6*hhp]

    bhh_n = jnp.zeros((1, Hp), f32)
    bhh_n = bhh_n.at[:, :hh].set(params["bhh_f"][:, 2 * hh:])
    bhh_n = bhh_n.at[:, hhp:hhp + hh].set(params["bhh_b"][:, 2 * hh:])                 # [1, 2*hhp]

    ws_w = place_halves_cols(place_halves_rows(params["ws_w"])).astype(bf16)           # [Hp, Hp]
    ws_b = place_halves_cols(params["ws_b"])                                           # [1, Hp] f32
    v_w = place_halves_cols(params["v_w"])                                             # [1, Hp] f32

    # fused classifier weight: rows = [context(Hp) | feats(Fp)], cols padded to Cp
    fc_w = jnp.zeros((Hp + Fp, Cp), f32)
    fc_w = fc_w.at[:Hp, :C].set(place_halves_rows(params["fcw_ctx"]))
    fc_w = fc_w.at[Hp:Hp + Fdim, :C].set(params["fcw_feat"])
    fc_w = fc_w.astype(bf16)
    fc_b = jnp.zeros((1, Cp), f32).at[:, :C].set(params["fc_b"])

    sents_p = jnp.zeros((T, Bp, Wp), f32).at[:, :B, :w_dim].set(sents_tm)
    lens_p = jnp.zeros((Bp, 1), jnp.int32).at[:B, 0].set(lens.astype(jnp.int32))
    feats_p = jnp.zeros((Bp, Fp), f32).at[:B, :Fdim].set(feats)

    args = (sents_p, lens_p, wih_both, bih_both, whh_bd, bhh_n,
            ws_w, ws_b, v_w, fc_w, fc_b, feats_p)

    def const_spec(a):                  # full-array weight spec (same block every grid step)
        nd = a.ndim
        return pl.BlockSpec(a.shape, lambda b, nd=nd: (0,) * nd)

    in_specs = [
        pl.BlockSpec((T, TB, Wp), lambda b: (0, b, 0)),     # sents: blocked over batch
        pl.BlockSpec((TB, 1), lambda b: (b, 0)),            # lens
        const_spec(wih_both), const_spec(bih_both),
        const_spec(whh_bd), const_spec(bhh_n),
        const_spec(ws_w), const_spec(ws_b), const_spec(v_w),
        const_spec(fc_w), const_spec(fc_b),
        pl.BlockSpec((TB, Fp), lambda b: (b, 0)),           # feats
    ]

    grid_spec = pltpu.PrefetchScalarGridSpec(
        num_scalar_prefetch=0,
        grid=(Bp // TB,),                                   # batch-parallel grid axis
        in_specs=in_specs,
        out_specs=pl.BlockSpec((TB, Cp), lambda b: (b, 0)),
        scratch_shapes=[pltpu.VMEM((T, TB, 6 * hhp), bf16),   # gate pre-acts (bf16)
                        pltpu.VMEM((T, TB, 2 * hhp), f32)],   # bi-GRU outputs [fwd | bwd]
    )

    out_padded = pl.pallas_call(
        appro_sound_kernel,
        out_shape=jax.ShapeDtypeStruct((Bp, Cp), f32),
        grid_spec=grid_spec,
        compiler_params=pltpu.CompilerParams(
            dimension_semantics=("parallel",),
            vmem_limit_bytes=32 * 1024 * 1024),
    )(*args)
    return out_padded[:B, :C]


# ------------------------- pure-JAX reference --------------------------------
def ref_forward(sents_tm, lens, params, feats):
    HI = lax.Precision.HIGHEST
    T, B, _ = sents_tm.shape
    hh = params["whh_f"].shape[0]
    lens_col = lens[:, None]

    def cell(x, h, wih, whh, bih, bhh):
        gx = jnp.dot(x, wih, precision=HI) + bih
        gh = jnp.dot(h, whh, precision=HI) + bhh
        r = jax.nn.sigmoid(gx[:, :hh] + gh[:, :hh])
        z = jax.nn.sigmoid(gx[:, hh:2 * hh] + gh[:, hh:2 * hh])
        n = jnp.tanh(gx[:, 2 * hh:] + r * gh[:, 2 * hh:])
        return (1 - z) * n + z * h

    h = jnp.zeros((B, hh), jnp.float32)
    outs_f = []
    for t in range(T):
        hn = cell(sents_tm[t], h, params["wih_f"], params["whh_f"],
                  params["bih_f"], params["bhh_f"])
        mask = t < lens_col
        h = jnp.where(mask, hn, h)
        outs_f.append(jnp.where(mask, hn, 0.0))
    h_f = h
    out_f = jnp.stack(outs_f)

    h = jnp.zeros((B, hh), jnp.float32)
    outs_b = [None] * T
    for t in range(T - 1, -1, -1):
        hn = cell(sents_tm[t], h, params["wih_b"], params["whh_b"],
                  params["bih_b"], params["bhh_b"])
        mask = t < lens_col
        h = jnp.where(mask, hn, h)
        outs_b[t] = jnp.where(mask, hn, 0.0)
    h_b = h
    out_b = jnp.stack(outs_b)

    gru_out = jnp.concatenate([out_f, out_b], -1)                 # [T, B, H]
    hidden = jnp.concatenate([h_f, h_b], -1)                      # [B, H]
    dec = jnp.dot(hidden, params["ws_w"], precision=HI) + params["ws_b"]
    tmp = jnp.tanh(gru_out + dec[None])
    scores = jnp.sum(tmp * params["v_w"][None, :, :], axis=-1) + params["v_b"][0, 0]
    attn = jax.nn.softmax(scores, axis=0)                         # softmax over time
    ctx = jnp.sum(attn[:, :, None] * gru_out, axis=0)
    return (jnp.dot(ctx, params["fcw_ctx"], precision=HI)
            + jnp.dot(feats, params["fcw_feat"], precision=HI) + params["fc_b"])


def init_params(key, w_dim, h_dim, f_dim, num_class):
    hh = h_dim // 2
    keys = jax.random.split(key, 15)
    u = lambda k, shape: jax.random.uniform(k, shape, jnp.float32, -0.1, 0.1)
    return dict(
        wih_f=u(keys[0], (w_dim, 3 * hh)), whh_f=u(keys[1], (hh, 3 * hh)),
        bih_f=u(keys[2], (1, 3 * hh)),     bhh_f=u(keys[3], (1, 3 * hh)),
        wih_b=u(keys[4], (w_dim, 3 * hh)), whh_b=u(keys[5], (hh, 3 * hh)),
        bih_b=u(keys[6], (1, 3 * hh)),     bhh_b=u(keys[7], (1, 3 * hh)),
        ws_w=u(keys[8], (h_dim, h_dim)),   ws_b=u(keys[9], (1, h_dim)),
        v_w=u(keys[10], (1, h_dim)),       v_b=u(keys[11], (1, 1)),
        fcw_ctx=u(keys[12], (h_dim, num_class)),
        fcw_feat=u(keys[13], (2 * f_dim, num_class)),
        fc_b=u(keys[14], (1, num_class)),
    )


if __name__ == "__main__":
    B, T, W_DIM, H_DIM, F_DIM, NUM_CLASS = 2, 8, 16, 32, 8, 5
    VOCAB_W, VOCAB_F = 50, 10

    key = jax.random.PRNGKey(0)
    k_emb, k_par, k_txt, k_feat = jax.random.split(key, 4)

    # embedding tables (deterministic synthetic init; no checkpoint loading)
    ek = jax.random.split(k_emb, 3)
    word_emb = jax.random.normal(ek[0], (VOCAB_W, W_DIM), jnp.float32) * 0.1
    f1_emb = jax.random.normal(ek[1], (VOCAB_F, F_DIM), jnp.float32) * 0.1
    f2_emb = jax.random.normal(ek[2], (VOCAB_F, F_DIM), jnp.float32) * 0.1

    params = init_params(k_par, W_DIM, H_DIM, F_DIM, NUM_CLASS)

    batch_txts = jax.random.randint(k_txt, (B, T), 0, VOCAB_W)
    batch_lens = jnp.array([8, 5], dtype=jnp.int32)   # descending (pack_padded_sequence)
    fk = jax.random.split(k_feat, 2)
    f1_ids = jax.random.randint(fk[0], (B,), 0, VOCAB_F)
    f2_ids = jax.random.randint(fk[1], (B,), 0, VOCAB_F)

    # glue: embedding lookups + time-major transpose in plain JAX (dropout = eval identity)
    sents = word_emb[batch_txts]                       # [B, T, w_dim]
    sents_tm = jnp.transpose(sents, (1, 0, 2))         # [T, B, w_dim]
    feats = jnp.concatenate([f1_emb[f1_ids], f2_emb[f2_ids]], axis=1)   # [B, 2*f_dim]

    out = appro_sound_forward(sents_tm, batch_lens, params, feats)
    out = jax.block_until_ready(out)

    ref = ref_forward(sents_tm, batch_lens, params, feats)
    assert out.shape == (B, NUM_CLASS)
    # Tolerance relaxed vs the f32-HIGHEST reference because the kernel uses bf16 MXU
    # operands (f32 accumulation); measured error is O(1e-3) at these scales.
    assert jnp.allclose(out, ref, atol=5e-3, rtol=5e-3), (out, ref)
    print("KERNEL_OK")
</pallas_src>

<mosaic_0001>
module attributes {stable_mosaic.version = 11 : i64} {
  func.func @appro_sound_kernel(%arg0: i32, %arg1: memref<8x8x128xf32, #tpu.memory_space<vmem>>, %arg2: memref<8x1xi32, #tpu.memory_space<vmem>>, %arg3: memref<128x768xbf16, #tpu.memory_space<vmem>>, %arg4: memref<1x768xf32, #tpu.memory_space<vmem>>, %arg5: memref<256x768xbf16, #tpu.memory_space<vmem>>, %arg6: memref<1x256xf32, #tpu.memory_space<vmem>>, %arg7: memref<256x256xbf16, #tpu.memory_space<vmem>>, %arg8: memref<1x256xf32, #tpu.memory_space<vmem>>, %arg9: memref<1x256xf32, #tpu.memory_space<vmem>>, %arg10: memref<384x128xbf16, #tpu.memory_space<vmem>>, %arg11: memref<1x128xf32, #tpu.memory_space<vmem>>, %arg12: memref<8x128xf32, #tpu.memory_space<vmem>>, %arg13: memref<8x128xf32, #tpu.memory_space<vmem>>, %arg14: memref<8x8x768xbf16, #tpu.memory_space<vmem>>, %arg15: memref<8x8x256xf32, #tpu.memory_space<vmem>>) attributes {dimension_semantics = [#tpu.dimension_semantics<parallel>], iteration_bounds = array<i64: 1>, scalar_prefetch = 0 : i64, scratch_operands = 2 : i64, tpu.core_type = #tpu.core_type<tc>, window_params = [{transform_indices = @transform_0, window_bounds = array<i64: 8, 8, 128>}, {transform_indices = @transform_1, window_bounds = array<i64: 8, 1>}, {pipeline_mode = #tpu.pipeline_mode<synchronous>, transform_indices = @transform_2, window_bounds = array<i64: 128, 768>}, {pipeline_mode = #tpu.pipeline_mode<synchronous>, transform_indices = @transform_3, window_bounds = array<i64: 1, 768>}, {pipeline_mode = #tpu.pipeline_mode<synchronous>, transform_indices = @transform_4, window_bounds = array<i64: 256, 768>}, {pipeline_mode = #tpu.pipeline_mode<synchronous>, transform_indices = @transform_5, window_bounds = array<i64: 1, 256>}, {pipeline_mode = #tpu.pipeline_mode<synchronous>, transform_indices = @transform_6, window_bounds = array<i64: 256, 256>}, {pipeline_mode = #tpu.pipeline_mode<synchronous>, transform_indices = @transform_7, window_bounds = array<i64: 1, 256>}, {pipeline_mode = #tpu.pipeline_mode<synchronous>, transform_indices = @transform_8, window_bounds = array<i64: 1, 256>}, {pipeline_mode = #tpu.pipeline_mode<synchronous>, transform_indices = @transform_9, window_bounds = array<i64: 384, 128>}, {pipeline_mode = #tpu.pipeline_mode<synchronous>, transform_indices = @transform_10, window_bounds = array<i64: 1, 128>}, {transform_indices = @transform_11, window_bounds = array<i64: 8, 128>}, {transform_indices = @transform_12, window_bounds = array<i64: 8, 128>}]} {
    %c0 = arith.constant 0 : index
    %c0_0 = arith.constant 0 : index
    %c0_1 = arith.constant 0 : index
    %0 = vector.load %arg1[%c0, %c0_0, %c0_1] : memref<8x8x128xf32, #tpu.memory_space<vmem>>, vector<8x8x128xf32>
    %1 = vector.shape_cast %0 : vector<8x8x128xf32> to vector<64x128xf32>
    %2 = arith.truncf %1 : vector<64x128xf32> to vector<64x128xbf16>
    %c0_2 = arith.constant 0 : index
    %c0_3 = arith.constant 0 : index
    %3 = vector.load %arg3[%c0_2, %c0_3] : memref<128x768xbf16, #tpu.memory_space<vmem>>, vector<128x768xbf16>
    %cst = arith.constant dense<0.000000e+00> : vector<64x768xf32>
    %4 = tpu.matmul %2, %3, %cst {dimension_numbers = #tpu.dot_dimension_numbers<[1], [0], [0], [1], [0, 0, 1, 1], [], []>} : vector<64x128xbf16>, vector<128x768xbf16>, vector<64x768xf32> -> vector<64x768xf32>
    %c0_4 = arith.constant 0 : index
    %c0_5 = arith.constant 0 : index
    %5 = vector.load %arg4[%c0_4, %c0_5] : memref<1x768xf32, #tpu.memory_space<vmem>>, vector<1x768xf32>
    %6 = vector.broadcast %5 : vector<1x768xf32> to vector<64x768xf32>
    %7 = arith.addf %4, %6 : vector<64x768xf32>
    %8 = vector.shape_cast %7 : vector<64x768xf32> to vector<8x8x768xf32>
    %9 = arith.truncf %8 : vector<8x8x768xf32> to vector<8x8x768xbf16>
    %c0_6 = arith.constant 0 : index
    %c0_7 = arith.constant 0 : index
    %c0_8 = arith.constant 0 : index
    %10 = vector.load %arg14[%c0_6, %c0_7, %c0_8] : memref<8x8x768xbf16, #tpu.memory_space<vmem>>, vector<8x8x768xbf16>
    tpu.vector_store %arg14[%c0_6, %c0_7, %c0_8], %9 {strides = array<i32>} : memref<8x8x768xbf16, #tpu.memory_space<vmem>>, vector<8x8x768xbf16>,
    %11 = tpu.iota {dimensions = array<i32: 0>} : vector<8x8x1xi32>
    %c0_9 = arith.constant 0 : index
    %c0_10 = arith.constant 0 : index
    %12 = vector.load %arg2[%c0_9, %c0_10] : memref<8x1xi32, #tpu.memory_space<vmem>>, vector<8x1xi32>
    %13 = vector.shape_cast %12 : vector<8x1xi32> to vector<1x8x1xi32>
    %14 = vector.broadcast %13 : vector<1x8x1xi32> to vector<8x8x1xi32>
    %15 = arith.cmpi slt, %11, %14 : vector<8x8x1xi32>
    %c0_11 = arith.constant 0 : index
    %c0_12 = arith.constant 0 : index
    %16 = vector.load %arg6[%c0_11, %c0_12] : memref<1x256xf32, #tpu.memory_space<vmem>>, vector<1x128xf32>
    %c0_13 = arith.constant 0 : index
    %c128 = arith.constant 128 : index
    %17 = vector.load %arg6[%c0_13, %c128] : memref<1x256xf32, #tpu.memory_space<vmem>>, vector<1x128xf32>
    %cst_14 = arith.constant 0.000000e+00 : f32
    %18 = vector.broadcast %cst_14 : f32 to vector<8x256xf32>
    %19 = arith.truncf %18 : vector<8x256xf32> to vector<8x256xbf16>
    %c0_15 = arith.constant 0 : index
    %c0_16 = arith.constant 0 : index
    %20 = vector.load %arg5[%c0_15, %c0_16] : memref<256x768xbf16, #tpu.memory_space<vmem>>, vector<256x768xbf16>
    %cst_17 = arith.constant dense<0.000000e+00> : vector<8x768xf32>
    %21 = tpu.matmul %19, %20, %cst_17 {dimension_numbers = #tpu.dot_dimension_numbers<[1], [0], [0], [1], [0, 0, 1, 1], [], []>} : vector<8x256xbf16>, vector<256x768xbf16>, vector<8x768xf32> -> vector<8x768xf32>
    %c0_18 = arith.constant 0 : index
    %c0_19 = arith.constant 0 : index
    %c0_20 = arith.constant 0 : index
    %22 = vector.load %arg14[%c0_18, %c0_19, %c0_20] : memref<8x8x768xbf16, #tpu.memory_space<vmem>>, vector<1x8x384xbf16>
    %23 = vector.shape_cast %22 : vector<1x8x384xbf16> to vector<8x384xbf16>
    %24 = arith.extf %23 : vector<8x384xbf16> to vector<8x384xf32>
    %c7 = arith.constant 7 : index
    %c0_21 = arith.constant 0 : index
    %c384 = arith.constant 384 : index
    %25 = vector.load %arg14[%c7, %c0_21, %c384] : memref<8x8x768xbf16, #tpu.memory_space<vmem>>, vector<1x8x384xbf16>
    %26 = vector.shape_cast %25 : vector<1x8x384xbf16> to vector<8x384xbf16>
    %27 = arith.extf %26 : vector<8x384xbf16> to vector<8x384xf32>
    %28 = vector.extract_strided_slice %21 {offsets = [0, 0], sizes = [8, 384], strides = [1, 1]} : vector<8x768xf32> to vector<8x384xf32>
    %29 = vector.extract_strided_slice %21 {offsets = [0, 384], sizes = [8, 384], strides = [1, 1]} : vector<8x768xf32> to vector<8x384xf32>
    %30 = vector.extract_strided_slice %24 {offsets = [0, 0], sizes = [8, 256], strides = [1, 1]} : vector<8x384xf32> to vector<8x256xf32>
    %31 = vector.extract_strided_slice %28 {offsets = [0, 0], sizes = [8, 256], strides = [1, 1]} : vector<8x384xf32> to vector<8x256xf32>
    %32 = arith.addf %30, %31 : vector<8x256xf32>
    %33 = arith.negf %32 : vector<8x256xf32>
    %34 = math.exp %33 : vector<8x256xf32>
    %cst_22 = arith.constant 1.000000e+00 : f32
    %35 = vector.broadcast %cst_22 : f32 to vector<8x256xf32>
    %36 = arith.addf %35, %34 : vector<8x256xf32>
    %37 = arith.divf %35, %36 : vector<8x256xf32>
    %38 = vector.extract_strided_slice %24 {offsets = [0, 256], sizes = [8, 128], strides = [1, 1]} : vector<8x384xf32> to vector<8x128xf32>
    %39 = vector.extract_strided_slice %37 {offsets = [0, 0], sizes = [8, 128], strides = [1, 1]} : vector<8x256xf32> to vector<8x128xf32>
    %40 = vector.extract_strided_slice %28 {offsets = [0, 256], sizes = [8, 128], strides = [1, 1]} : vector<8x384xf32> to vector<8x128xf32>
    %41 = vector.broadcast %16 : vector<1x128xf32> to vector<8x128xf32>
    %42 = arith.addf %40, %41 : vector<8x128xf32>
    %43 = arith.mulf %39, %42 : vector<8x128xf32>
    %44 = arith.addf %38, %43 : vector<8x128xf32>
    %45 = math.tanh %44 : vector<8x128xf32>
    %46 = vector.extract_strided_slice %37 {offsets = [0, 128], sizes = [8, 128], strides = [1, 1]} : vector<8x256xf32> to vector<8x128xf32>
    %cst_23 = arith.constant 1.000000e+00 : f32
    %47 = vector.broadcast %cst_23 : f32 to vector<8x128xf32>
    %48 = arith.subf %47, %46 : vector<8x128xf32>
    %49 = arith.mulf %48, %45 : vector<8x128xf32>
    %50 = vector.extract_strided_slice %18 {offsets = [0, 0], sizes = [8, 128], strides = [1, 1]} : vector<8x256xf32> to vector<8x128xf32>
    %51 = arith.mulf %46, %50 : vector<8x128xf32>
    %52 = arith.addf %49, %51 : vector<8x128xf32>
    %53 = vector.extract_strided_slice %27 {offsets = [0, 0], sizes = [8, 256], strides = [1, 1]} : vector<8x384xf32> to vector<8x256xf32>
    %54 = vector.extract_strided_slice %29 {offsets = [0, 0], sizes = [8, 256], strides = [1, 1]} : vector<8x384xf32> to vector<8x256xf32>
    %55 = arith.addf %53, %54 : vector<8x256xf32>
    %56 = arith.negf %55 : vector<8x256xf32>
    %57 = math.exp %56 : vector<8x256xf32>
    %cst_24 = arith.constant 1.000000e+00 : f32
    %58 = vector.broadcast %cst_24 : f32 to vector<8x256xf32>
    %59 = arith.addf %58, %57 : vector<8x256xf32>
    %60 = arith.divf %58, %59 : vector<8x256xf32>
    %61 = vector.extract_strided_slice %27 {offsets = [0, 256], sizes = [8, 128], strides = [1, 1]} : vector<8x384xf32> to vector<8x128xf32>
    %62 = vector.extract_strided_slice %60 {offsets = [0, 0], sizes = [8, 128], strides = [1, 1]} : vector<8x256xf32> to vector<8x128xf32>
    %63 = vector.extract_strided_slice %29 {offsets = [0, 256], sizes = [8, 128], strides = [1, 1]} : vector<8x384xf32> to vector<8x128xf32>
    %64 = vector.broadcast %17 : vector<1x128xf32> to vector<8x128xf32>
    %65 = arith.addf %63, %64 : vector<8x128xf32>
    %66 = arith.mulf %62, %65 : vector<8x128xf32>
    %67 = arith.addf %61, %66 : vector<8x128xf32>
    %68 = math.tanh %67 : vector<8x128xf32>
    %69 = vector.extract_strided_slice %60 {offsets = [0, 128], sizes = [8, 128], strides = [1, 1]} : vector<8x256xf32> to vector<8x128xf32>
    %cst_25 = arith.constant 1.000000e+00 : f32
    %70 = vector.broadcast %cst_25 : f32 to vector<8x128xf32>
    %71 = arith.subf %70, %69 : vector<8x128xf32>
    %72 = arith.mulf %71, %68 : vector<8x128xf32>
    %73 = vector.extract_strided_slice %18 {offsets = [0, 128], sizes = [8, 128], strides = [1, 1]} : vector<8x256xf32> to vector<8x128xf32>
    %74 = arith.mulf %69, %73 : vector<8x128xf32>
    %75 = arith.addf %72, %74 : vector<8x128xf32>
    %76 = vector.extract_strided_slice %15 {offsets = [0, 0, 0], sizes = [1, 8, 1], strides = [1, 1, 1]} : vector<8x8x1xi1> to vector<1x8x1xi1>
    %77 = vector.shape_cast %76 : vector<1x8x1xi1> to vector<8x1xi1>
    %78 = vector.extract_strided_slice %15 {offsets = [7, 0, 0], sizes = [1, 8, 1], strides = [1, 1, 1]} : vector<8x8x1xi1> to vector<1x8x1xi1>
    %79 = vector.shape_cast %78 : vector<1x8x1xi1> to vector<8x1xi1>
    %cst_26 = arith.constant 0.000000e+00 : f32
    %80 = vector.shape_cast %77 : vector<8x1xi1> to vector<8x1xi1>
    %81 = vector.broadcast %80 : vector<8x1xi1> to vector<8x128xi1>
    %82 = vector.broadcast %cst_26 : f32 to vector<8x128xf32>
    %83 = arith.select %81, %52, %82 : vector<8x128xi1>, vector<8x128xf32>
    %c0_27 = arith.constant 0 : index
    %c0_28 = arith.constant 0 : index
    %c0_29 = arith.constant 0 : index
    %84 = vector.load %arg15[%c0_27, %c0_28, %c0_29] : memref<8x8x256xf32, #tpu.memory_space<vmem>>, vector<1x8x128xf32>
    %85 = vector.shape_cast %84 : vector<1x8x128xf32> to vector<8x128xf32>
    %86 = vector.shape_cast %83 : vector<8x128xf32> to vector<1x8x128xf32>
    tpu.vector_store %arg15[%c0_27, %c0_28, %c0_29], %86 {strides = array<i32>} : memref<8x8x256xf32, #tpu.memory_space<vmem>>, vector<1x8x128xf32>,
    %cst_30 = arith.constant 0.000000e+00 : f32
    %87 = vector.shape_cast %79 : vector<8x1xi1> to vector<8x1xi1>
    %88 = vector.broadcast %87 : vector<8x1xi1> to vector<8x128xi1>
    %89 = vector.broadcast %cst_30 : f32 to vector<8x128xf32>
    %90 = arith.select %88, %75, %89 : vector<8x128xi1>, vector<8x128xf32>
    %c7_31 = arith.constant 7 : index
    %c0_32 = arith.constant 0 : index
    %c128_33 = arith.constant 128 : index
    %91 = vector.load %arg15[%c7_31, %c0_32, %c128_33] : memref<8x8x256xf32, #tpu.memory_space<vmem>>, vector<1x8x128xf32>
    %92 = vector.shape_cast %91 : vector<1x8x128xf32> to vector<8x128xf32>
    %93 = vector.shape_cast %90 : vector<8x128xf32> to vector<1x8x128xf32>
    tpu.vector_store %arg15[%c7_31, %c0_32, %c128_33], %93 {strides = array<i32>} : memref<8x8x256xf32, #tpu.memory_space<vmem>>, vector<1x8x128xf32>,
    %94 = vector.extract_strided_slice %18 {offsets = [0, 0], sizes = [8, 128], strides = [1, 1]} : vector<8x256xf32> to vector<8x128xf32>
    %95 = vector.shape_cast %77 : vector<8x1xi1> to vector<8x1xi1>
    %96 = vector.broadcast %95 : vector<8x1xi1> to vector<8x128xi1>
    %97 = arith.select %96, %52, %94 : vector<8x128xi1>, vector<8x128xf32>
    %98 = vector.extract_strided_slice %18 {offsets = [0, 128], sizes = [8, 128], strides = [1, 1]} : vector<8x256xf32> to vector<8x128xf32>
    %99 = vector.shape_cast %79 : vector<8x1xi1> to vector<8x1xi1>
    %100 = vector.broadcast %99 : vector<8x1xi1> to vector<8x128xi1>
    %101 = arith.select %100, %75, %98 : vector<8x128xi1>, vector<8x128xf32>
    %102 = tpu.concatenate %97, %101 in 1 : vector<8x128xf32>, vector<8x128xf32> -> vector<8x256xf32>
    %103 = arith.truncf %102 : vector<8x256xf32> to vector<8x256xbf16>
    %c0_34 = arith.constant 0 : index
    %c0_35 = arith.constant 0 : index
    %104 = vector.load %arg5[%c0_34, %c0_35] : memref<256x768xbf16, #tpu.memory_space<vmem>>, vector<256x768xbf16>
    %cst_36 = arith.constant dense<0.000000e+00> : vector<8x768xf32>
    %105 = tpu.matmul %103, %104, %cst_36 {dimension_numbers = #tpu.dot_dimension_numbers<[1], [0], [0], [1], [0, 0, 1, 1], [], []>} : vector<8x256xbf16>, vector<256x768xbf16>, vector<8x768xf32> -> vector<8x768xf32>
    %c1 = arith.constant 1 : index
    %c0_37 = arith.constant 0 : index
    %c0_38 = arith.constant 0 : index
    %106 = vector.load %arg14[%c1, %c0_37, %c0_38] : memref<8x8x768xbf16, #tpu.memory_space<vmem>>, vector<1x8x384xbf16>
    %107 = vector.shape_cast %106 : vector<1x8x384xbf16> to vector<8x384xbf16>
    %108 = arith.extf %107 : vector<8x384xbf16> to vector<8x384xf32>
    %c6 = arith.constant 6 : index
    %c0_39 = arith.constant 0 : index
    %c384_40 = arith.constant 384 : index
    %109 = vector.load %arg14[%c6, %c0_39, %c384_40] : memref<8x8x768xbf16, #tpu.memory_space<vmem>>, vector<1x8x384xbf16>
    %110 = vector.shape_cast %109 : vector<1x8x384xbf16> to vector<8x384xbf16>
    %111 = arith.extf %110 : vector<8x384xbf16> to vector<8x384xf32>
    %112 = vector.extract_strided_slice %105 {offsets = [0, 0], sizes = [8, 384], strides = [1, 1]} : vector<8x768xf32> to vector<8x384xf32>
    %113 = vector.extract_strided_slice %105 {offsets = [0, 384], sizes = [8, 384], strides = [1, 1]} : vector<8x768xf32> to vector<8x384xf32>
    %114 = vector.extract_strided_slice %108 {offsets = [0, 0], sizes = [8, 256], strides = [1, 1]} : vector<8x384xf32> to vector<8x256xf32>
    %115 = vector.extract_strided_slice %112 {offsets = [0, 0], sizes = [8, 256], strides = [1, 1]} : vector<8x384xf32> to vector<8x256xf32>
    %116 = arith.addf %114, %115 : vector<8x256xf32>
    %117 = arith.negf %116 : vector<8x256xf32>
    %118 = math.exp %117 : vector<8x256xf32>
    %cst_41 = arith.constant 1.000000e+00 : f32
    %119 = vector.broadcast %cst_41 : f32 to vector<8x256xf32>
    %120 = arith.addf %119, %118 : vector<8x256xf32>
    %121 = arith.divf %119, %120 : vector<8x256xf32>
    %122 = vector.extract_strided_slice %108 {offsets = [0, 256], sizes = [8, 128], strides = [1, 1]} : vector<8x384xf32> to vector<8x128xf32>
    %123 = vector.extract_strided_slice %121 {offsets = [0, 0], sizes = [8, 128], strides = [1, 1]} : vector<8x256xf32> to vector<8x128xf32>
    %124 = vector.extract_strided_slice %112 {offsets = [0, 256], sizes = [8, 128], strides = [1, 1]} : vector<8x384xf32> to vector<8x128xf32>
    %125 = vector.broadcast %16 : vector<1x128xf32> to vector<8x128xf32>
    %126 = arith.addf %124, %125 : vector<8x128xf32>
    %127 = arith.mulf %123, %126 : vector<8x128xf32>
    %128 = arith.addf %122, %127 : vector<8x128xf32>
    %129 = math.tanh %128 : vector<8x128xf32>
    %130 = vector.extract_strided_slice %121 {offsets = [0, 128], sizes = [8, 128], strides = [1, 1]} : vector<8x256xf32> to vector<8x128xf32>
    %cst_42 = arith.constant 1.000000e+00 : f32
    %131 = vector.broadcast %cst_42 : f32 to vector<8x128xf32>
    %132 = arith.subf %131, %130 : vector<8x128xf32>
    %133 = arith.mulf %132, %129 : vector<8x128xf32>
    %134 = vector.extract_strided_slice %102 {offsets = [0, 0], sizes = [8, 128], strides = [1, 1]} : vector<8x256xf32> to vector<8x128xf32>
    %135 = arith.mulf %130, %134 : vector<8x128xf32>
    %136 = arith.addf %133, %135 : vector<8x128xf32>
    %137 = vector.extract_strided_slice %111 {offsets = [0, 0], sizes = [8, 256], strides = [1, 1]} : vector<8x384xf32> to vector<8x256xf32>
    %138 = vector.extract_strided_slice %113 {offsets = [0, 0], sizes = [8, 256], strides = [1, 1]} : vector<8x384xf32> to vector<8x256xf32>
    %139 = arith.addf %137, %138 : vector<8x256xf32>
    %140 = arith.negf %139 : vector<8x256xf32>
    %141 = math.exp %140 : vector<8x256xf32>
    %cst_43 = arith.constant 1.000000e+00 : f32
    %142 = vector.broadcast %cst_43 : f32 to vector<8x256xf32>
    %143 = arith.addf %142, %141 : vector<8x256xf32>
    %144 = arith.divf %142, %143 : vector<8x256xf32>
    %145 = vector.extract_strided_slice %111 {offsets = [0, 256], sizes = [8, 128], strides = [1, 1]} : vector<8x384xf32> to vector<8x128xf32>
    %146 = vector.extract_strided_slice %144 {offsets = [0, 0], sizes = [8, 128], strides = [1, 1]} : vector<8x256xf32> to vector<8x128xf32>
    %147 = vector.extract_strided_slice %113 {offsets = [0, 256], sizes = [8, 128], strides = [1, 1]} : vector<8x384xf32> to vector<8x128xf32>
    %148 = vector.broadcast %17 : vector<1x128xf32> to vector<8x128xf32>
    %149 = arith.addf %147, %148 : vector<8x128xf32>
    %150 = arith.mulf %146, %149 : vector<8x128xf32>
    %151 = arith.addf %145, %150 : vector<8x128xf32>
    %152 = math.tanh %151 : vector<8x128xf32>
    %153 = vector.extract_strided_slice %144 {offsets = [0, 128], sizes = [8, 128], strides = [1, 1]} : vector<8x256xf32> to vector<8x128xf32>
    %cst_44 = arith.constant 1.000000e+00 : f32
    %154 = vector.broadcast %cst_44 : f32 to vector<8x128xf32>
    %155 = arith.subf %154, %153 : vector<8x128xf32>
    %156 = arith.mulf %155, %152 : vector<8x128xf32>
    %157 = vector.extract_strided_slice %102 {offsets = [0, 128], sizes = [8, 128], strides = [1, 1]} : vector<8x256xf32> to vector<8x128xf32>
    %158 = arith.mulf %153, %157 : vector<8x128xf32>
    %159 = arith.addf %156, %158 : vector<8x128xf32>
    %160 = vector.extract_strided_slice %15 {offsets = [1, 0, 0], sizes = [1, 8, 1], strides = [1, 1, 1]} : vector<8x8x1xi1> to vector<1x8x1xi1>
    %161 = vector.shape_cast %160 : vector<1x8x1xi1> to vector<8x1xi1>
    %162 = vector.extract_strided_slice %15 {offsets = [6, 0, 0], sizes = [1, 8, 1], strides = [1, 1, 1]} : vector<8x8x1xi1> to vector<1x8x1xi1>
    %163 = vector.shape_cast %162 : vector<1x8x1xi1> to vector<8x1xi1>
    %cst_45 = arith.constant 0.000000e+00 : f32
    %164 = vector.shape_cast %161 : vector<8x1xi1> to vector<8x1xi1>
    %165 = vector.broadcast %164 : vector<8x1xi1> to vector<8x128xi1>
    %166 = vector.broadcast %cst_45 : f32 to vector<8x128xf32>
    %167 = arith.select %165, %136, %166 : vector<8x128xi1>, vector<8x128xf32>
    %c1_46 = arith.constant 1 : index
    %c0_47 = arith.constant 0 : index
    %c0_48 = arith.constant 0 : index
    %168 = vector.load %arg15[%c1_46, %c0_47, %c0_48] : memref<8x8x256xf32, #tpu.memory_space<vmem>>, vector<1x8x128xf32>
    %169 = vector.shape_cast %168 : vector<1x8x128xf32> to vector<8x128xf32>
    %170 = vector.shape_cast %167 : vector<8x128xf32> to vector<1x8x128xf32>
    tpu.vector_store %arg15[%c1_46, %c0_47, %c0_48], %170 {strides = array<i32>} : memref<8x8x256xf32, #tpu.memory_space<vmem>>, vector<1x8x128xf32>,
    %cst_49 = arith.constant 0.000000e+00 : f32
    %171 = vector.shape_cast %163 : vector<8x1xi1> to vector<8x1xi1>
    %172 = vector.broadcast %171 : vector<8x1xi1> to vector<8x128xi1>
    %173 = vector.broadcast %cst_49 : f32 to vector<8x128xf32>
    %174 = arith.select %172, %159, %173 : vector<8x128xi1>, vector<8x128xf32>
    %c6_50 = arith.constant 6 : index
    %c0_51 = arith.constant 0 : index
    %c128_52 = arith.constant 128 : index
    %175 = vector.load %arg15[%c6_50, %c0_51, %c128_52] : memref<8x8x256xf32, #tpu.memory_space<vmem>>, vector<1x8x128xf32>
    %176 = vector.shape_cast %175 : vector<1x8x128xf32> to vector<8x128xf32>
    %177 = vector.shape_cast %174 : vector<8x128xf32> to vector<1x8x128xf32>
    tpu.vector_store %arg15[%c6_50, %c0_51, %c128_52], %177 {strides = array<i32>} : memref<8x8x256xf32, #tpu.memory_space<vmem>>, vector<1x8x128xf32>,
    %178 = vector.extract_strided_slice %102 {offsets = [0, 0], sizes = [8, 128], strides = [1, 1]} : vector<8x256xf32> to vector<8x128xf32>
    %179 = vector.shape_cast %161 : vector<8x1xi1> to vector<8x1xi1>
    %180 = vector.broadcast %179 : vector<8x1xi1> to vector<8x128xi1>
    %181 = arith.select %180, %136, %178 : vector<8x128xi1>, vector<8x128xf32>
    %182 = vector.extract_strided_slice %102 {offsets = [0, 128], sizes = [8, 128], strides = [1, 1]} : vector<8x256xf32> to vector<8x128xf32>
    %183 = vector.shape_cast %163 : vector<8x1xi1> to vector<8x1xi1>
    %184 = vector.broadcast %183 : vector<8x1xi1> to vector<8x128xi1>
    %185 = arith.select %184, %159, %182 : vector<8x128xi1>, vector<8x128xf32>
    %186 = tpu.concatenate %181, %185 in 1 : vector<8x128xf32>, vector<8x128xf32> -> vector<8x256xf32>
    %187 = arith.truncf %186 : vector<8x256xf32> to vector<8x256xbf16>
    %c0_53 = arith.constant 0 : index
    %c0_54 = arith.constant 0 : index
    %188 = vector.load %arg5[%c0_53, %c0_54] : memref<256x768xbf16, #tpu.memory_space<vmem>>, vector<256x768xbf16>
    %cst_55 = arith.constant dense<0.000000e+00> : vector<8x768xf32>
    %189 = tpu.matmul %187, %188, %cst_55 {dimension_numbers = #tpu.dot_dimension_numbers<[1], [0], [0], [1], [0, 0, 1, 1], [], []>} : vector<8x256xbf16>, vector<256x768xbf16>, vector<8x768xf32> -> vector<8x768xf32>
    %c2 = arith.constant 2 : index
    %c0_56 = arith.constant 0 : index
    %c0_57 = arith.constant 0 : index
    %190 = vector.load %arg14[%c2, %c0_56, %c0_57] : memref<8x8x768xbf16, #tpu.memory_space<vmem>>, vector<1x8x384xbf16>
    %191 = vector.shape_cast %190 : vector<1x8x384xbf16> to vector<8x384xbf16>
    %192 = arith.extf %191 : vector<8x384xbf16> to vector<8x384xf32>
    %c5 = arith.constant 5 : index
    %c0_58 = arith.constant 0 : index
    %c384_59 = arith.constant 384 : index
    %193 = vector.load %arg14[%c5, %c0_58, %c384_59] : memref<8x8x768xbf16, #tpu.memory_space<vmem>>, vector<1x8x384xbf16>
    %194 = vector.shape_cast %193 : vector<1x8x384xbf16> to vector<8x384xbf16>
    %195 = arith.extf %194 : vector<8x384xbf16> to vector<8x384xf32>
    %196 = vector.extract_strided_slice %189 {offsets = [0, 0], sizes = [8, 384], strides = [1, 1]} : vector<8x768xf32> to vector<8x384xf32>
    %197 = vector.extract_strided_slice %189 {offsets = [0, 384], sizes = [8, 384], strides = [1, 1]} : vector<8x768xf32> to vector<8x384xf32>
    %198 = vector.extract_strided_slice %192 {offsets = [0, 0], sizes = [8, 256], strides = [1, 1]} : vector<8x384xf32> to vector<8x256xf32>
    %199 = vector.extract_strided_slice %196 {offsets = [0, 0], sizes = [8, 256], strides = [1, 1]} : vector<8x384xf32> to vector<8x256xf32>
    %200 = arith.addf %198, %199 : vector<8x256xf32>
    %201 = arith.negf %200 : vector<8x256xf32>
    %202 = math.exp %201 : vector<8x256xf32>
    %cst_60 = arith.constant 1.000000e+00 : f32
    %203 = vector.broadcast %cst_60 : f32 to vector<8x256xf32>
    %204 = arith.addf %203, %202 : vector<8x256xf32>
    %205 = arith.divf %203, %204 : vector<8x256xf32>
    %206 = vector.extract_strided_slice %192 {offsets = [0, 256], sizes = [8, 128], strides = [1, 1]} : vector<8x384xf32> to vector<8x128xf32>
    %207 = vector.extract_strided_slice %205 {offsets = [0, 0], sizes = [8, 128], strides = [1, 1]} : vector<8x256xf32> to vector<8x128xf32>
    %208 = vector.extract_strided_slice %196 {offsets = [0, 256], sizes = [8, 128], strides = [1, 1]} : vector<8x384xf32> to vector<8x128xf32>
    %209 = vector.broadcast %16 : vector<1x128xf32> to vector<8x128xf32>
    %210 = arith.addf %208, %209 : vector<8x128xf32>
    %211 = arith.mulf %207, %210 : vector<8x128xf32>
    %212 = arith.addf %206, %211 : vector<8x128xf32>
    %213 = math.tanh %212 : vector<8x128xf32>
    %214 = vector.extract_strided_slice %205 {offsets = [0, 128], sizes = [8, 128], strides = [1, 1]} : vector<8x256xf32> to vector<8x128xf32>
    %cst_61 = arith.constant 1.000000e+00 : f32
    %215 = vector.broadcast %cst_61 : f32 to vector<8x128xf32>
    %216 = arith.subf %215, %214 : vector<8x128xf32>
    %217 = arith.mulf %216, %213 : vector<8x128xf32>
    %218 = vector.extract_strided_slice %186 {offsets = [0, 0], sizes = [8, 128], strides = [1, 1]} : vector<8x256xf32> to vector<8x128xf32>
    %219 = arith.mulf %214, %218 : vector<8x128xf32>
    %220 = arith.addf %217, %219 : vector<8x128xf32>
    %221 = vector.extract_strided_slice %195 {offsets = [0, 0], sizes = [8, 256], strides = [1, 1]} : vector<8x384xf32> to vector<8x256xf32>
    %222 = vector.extract_strided_slice %197 {offsets = [0, 0], sizes = [8, 256], strides = [1, 1]} : vector<8x384xf32> to vector<8x256xf32>
    %223 = arith.addf %221, %222 : vector<8x256xf32>
    %224 = arith.negf %223 : vector<8x256xf32>
    %225 = math.exp %224 : vector<8x256xf32>
    %cst_62 = arith.constant 1.000000e+00 : f32
    %226 = vector.broadcast %cst_62 : f32 to vector<8x256xf32>
    %227 = arith.addf %226, %225 : vector<8x256xf32>
    %228 = arith.divf %226, %227 : vector<8x256xf32>
    %229 = vector.extract_strided_slice %195 {offsets = [0, 256], sizes = [8, 128], strides = [1, 1]} : vector<8x384xf32> to vector<8x128xf32>
    %230 = vector.extract_strided_slice %228 {offsets = [0, 0], sizes = [8, 128], strides = [1, 1]} : vector<8x256xf32> to vector<8x128xf32>
    %231 = vector.extract_strided_slice %197 {offsets = [0, 256], sizes = [8, 128], strides = [1, 1]} : vector<8x384xf32> to vector<8x128xf32>
    %232 = vector.broadcast %17 : vector<1x128xf32> to vector<8x128xf32>
    %233 = arith.addf %231, %232 : vector<8x128xf32>
    %234 = arith.mulf %230, %233 : vector<8x128xf32>
    %235 = arith.addf %229, %234 : vector<8x128xf32>
    %236 = math.tanh %235 : vector<8x128xf32>
    %237 = vector.extract_strided_slice %228 {offsets = [0, 128], sizes = [8, 128], strides = [1, 1]} : vector<8x256xf32> to vector<8x128xf32>
    %cst_63 = arith.constant 1.000000e+00 : f32
    %238 = vector.broadcast %cst_63 : f32 to vector<8x128xf32>
    %239 = arith.subf %238, %237 : vector<8x128xf32>
    %240 = arith.mulf %239, %236 : vector<8x128xf32>
    %241 = vector.extract_strided_slice %186 {offsets = [0, 128], sizes = [8, 128], strides = [1, 1]} : vector<8x256xf32> to vector<8x128xf32>
    %242 = arith.mulf %237, %241 : vector<8x128xf32>
    %243 = arith.addf %240, %242 : vector<8x128xf32>
    %244 = vector.extract_strided_slice %15 {offsets = [2, 0, 0], sizes = [1, 8, 1], strides = [1, 1, 1]} : vector<8x8x1xi1> to vector<1x8x1xi1>
    %245 = vector.shape_cast %244 : vector<1x8x1xi1> to vector<8x1xi1>
    %246 = vector.extract_strided_slice %15 {offsets = [5, 0, 0], sizes = [1, 8, 1], strides = [1, 1, 1]} : vector<8x8x1xi1> to vector<1x8x1xi1>
    %247 = vector.shape_cast %246 : vector<1x8x1xi1> to vector<8x1xi1>
    %cst_64 = arith.constant 0.000000e+00 : f32
    %248 = vector.shape_cast %245 : vector<8x1xi1> to vector<8x1xi1>
    %249 = vector.broadcast %248 : vector<8x1xi1> to vector<8x128xi1>
    %250 = vector.broadcast %cst_64 : f32 to vector<8x128xf32>
    %251 = arith.select %249, %220, %250 : vector<8x128xi1>, vector<8x128xf32>
    %c2_65 = arith.constant 2 : index
    %c0_66 = arith.constant 0 : index
    %c0_67 = arith.constant 0 : index
    %252 = vector.load %arg15[%c2_65, %c0_66, %c0_67] : memref<8x8x256xf32, #tpu.memory_space<vmem>>, vector<1x8x128xf32>
    %253 = vector.shape_cast %252 : vector<1x8x128xf32> to vector<8x128xf32>
    %254 = vector.shape_cast %251 : vector<8x128xf32> to vector<1x8x128xf32>
    tpu.vector_store %arg15[%c2_65, %c0_66, %c0_67], %254 {strides = array<i32>} : memref<8x8x256xf32, #tpu.memory_space<vmem>>, vector<1x8x128xf32>,
    %cst_68 = arith.constant 0.000000e+00 : f32
    %255 = vector.shape_cast %247 : vector<8x1xi1> to vector<8x1xi1>
    %256 = vector.broadcast %255 : vector<8x1xi1> to vector<8x128xi1>
    %257 = vector.broadcast %cst_68 : f32 to vector<8x128xf32>
    %258 = arith.select %256, %243, %257 : vector<8x128xi1>, vector<8x128xf32>
    %c5_69 = arith.constant 5 : index
    %c0_70 = arith.constant 0 : index
    %c128_71 = arith.constant 128 : index
    %259 = vector.load %arg15[%c5_69, %c0_70, %c128_71] : memref<8x8x256xf32, #tpu.memory_space<vmem>>, vector<1x8x128xf32>
    %260 = vector.shape_cast %259 : vector<1x8x128xf32> to vector<8x128xf32>
    %261 = vector.shape_cast %258 : vector<8x128xf32> to vector<1x8x128xf32>
    tpu.vector_store %arg15[%c5_69, %c0_70, %c128_71], %261 {strides = array<i32>} : memref<8x8x256xf32, #tpu.memory_space<vmem>>, vector<1x8x128xf32>,
    %262 = vector.extract_strided_slice %186 {offsets = [0, 0], sizes = [8, 128], strides = [1, 1]} : vector<8x256xf32> to vector<8x128xf32>
    %263 = vector.shape_cast %245 : vector<8x1xi1> to vector<8x1xi1>
    %264 = vector.broadcast %263 : vector<8x1xi1> to vector<8x128xi1>
    %265 = arith.select %264, %220, %262 : vector<8x128xi1>, vector<8x128xf32>
    %266 = vector.extract_strided_slice %186 {offsets = [0, 128], sizes = [8, 128], strides = [1, 1]} : vector<8x256xf32> to vector<8x128xf32>
    %267 = vector.shape_cast %247 : vector<8x1xi1> to vector<8x1xi1>
    %268 = vector.broadcast %267 : vector<8x1xi1> to vector<8x128xi1>
    %269 = arith.select %268, %243, %266 : vector<8x128xi1>, vector<8x128xf32>
    %270 = tpu.concatenate %265, %269 in 1 : vector<8x128xf32>, vector<8x128xf32> -> vector<8x256xf32>
    %271 = arith.truncf %270 : vector<8x256xf32> to vector<8x256xbf16>
    %c0_72 = arith.constant 0 : index
    %c0_73 = arith.constant 0 : index
    %272 = vector.load %arg5[%c0_72, %c0_73] : memref<256x768xbf16, #tpu.memory_space<vmem>>, vector<256x768xbf16>
    %cst_74 = arith.constant dense<0.000000e+00> : vector<8x768xf32>
    %273 = tpu.matmul %271, %272, %cst_74 {dimension_numbers = #tpu.dot_dimension_numbers<[1], [0], [0], [1], [0, 0, 1, 1], [], []>} : vector<8x256xbf16>, vector<256x768xbf16>, vector<8x768xf32> -> vector<8x768xf32>
    %c3 = arith.constant 3 : index
    %c0_75 = arith.constant 0 : index
    %c0_76 = arith.constant 0 : index
    %274 = vector.load %arg14[%c3, %c0_75, %c0_76] : memref<8x8x768xbf16, #tpu.memory_space<vmem>>, vector<1x8x384xbf16>
    %275 = vector.shape_cast %274 : vector<1x8x384xbf16> to vector<8x384xbf16>
    %276 = arith.extf %275 : vector<8x384xbf16> to vector<8x384xf32>
    %c4 = arith.constant 4 : index
    %c0_77 = arith.constant 0 : index
    %c384_78 = arith.constant 384 : index
    %277 = vector.load %arg14[%c4, %c0_77, %c384_78] : memref<8x8x768xbf16, #tpu.memory_space<vmem>>, vector<1x8x384xbf16>
    %278 = vector.shape_cast %277 : vector<1x8x384xbf16> to vector<8x384xbf16>
    %279 = arith.extf %278 : vector<8x384xbf16> to vector<8x384xf32>
    %280 = vector.extract_strided_slice %273 {offsets = [0, 0], sizes = [8, 384], strides = [1, 1]} : vector<8x768xf32> to vector<8x384xf32>
    %281 = vector.extract_strided_slice %273 {offsets = [0, 384], sizes = [8, 384], strides = [1, 1]} : vector<8x768xf32> to vector<8x384xf32>
    %282 = vector.extract_strided_slice %276 {offsets = [0, 0], sizes = [8, 256], strides = [1, 1]} : vector<8x384xf32> to vector<8x256xf32>
    %283 = vector.extract_strided_slice %280 {offsets = [0, 0], sizes = [8, 256], strides = [1, 1]} : vector<8x384xf32> to vector<8x256xf32>
    %284 = arith.addf %282, %283 : vector<8x256xf32>
    %285 = arith.negf %284 : vector<8x256xf32>
    %286 = math.exp %285 : vector<8x256xf32>
    %cst_79 = arith.constant 1.000000e+00 : f32
    %287 = vector.broadcast %cst_79 : f32 to vector<8x256xf32>
    %288 = arith.addf %287, %286 : vector<8x256xf32>
    %289 = arith.divf %287, %288 : vector<8x256xf32>
    %290 = vector.extract_strided_slice %276 {offsets = [0, 256], sizes = [8, 128], strides = [1, 1]} : vector<8x384xf32> to vector<8x128xf32>
    %291 = vector.extract_strided_slice %289 {offsets = [0, 0], sizes = [8, 128], strides = [1, 1]} : vector<8x256xf32> to vector<8x128xf32>
    %292 = vector.extract_strided_slice %280 {offsets = [0, 256], sizes = [8, 128], strides = [1, 1]} : vector<8x384xf32> to vector<8x128xf32>
    %293 = vector.broadcast %16 : vector<1x128xf32> to vector<8x128xf32>
    %294 = arith.addf %292, %293 : vector<8x128xf32>
    %295 = arith.mulf %291, %294 : vector<8x128xf32>
    %296 = arith.addf %290, %295 : vector<8x128xf32>
    %297 = math.tanh %296 : vector<8x128xf32>
    %298 = vector.extract_strided_slice %289 {offsets = [0, 128], sizes = [8, 128], strides = [1, 1]} : vector<8x256xf32> to vector<8x128xf32>
    %cst_80 = arith.constant 1.000000e+00 : f32
    %299 = vector.broadcast %cst_80 : f32 to vector<8x128xf32>
    %300 = arith.subf %299, %298 : vector<8x128xf32>
    %301 = arith.mulf %300, %297 : vector<8x128xf32>
    %302 = vector.extract_strided_slice %270 {offsets = [0, 0], sizes = [8, 128], strides = [1, 1]} : vector<8x256xf32> to vector<8x128xf32>
    %303 = arith.mulf %298, %302 : vector<8x128xf32>
    %304 = arith.addf %301, %303 : vector<8x128xf32>
    %305 = vector.extract_strided_slice %279 {offsets = [0, 0], sizes = [8, 256], strides = [1, 1]} : vector<8x384xf32> to vector<8x256xf32>
    %306 = vector.extract_strided_slice %281 {offsets = [0, 0], sizes = [8, 256], strides = [1, 1]} : vector<8x384xf32> to vector<8x256xf32>
    %307 = arith.addf %305, %306 : vector<8x256xf32>
    %308 = arith.negf %307 : vector<8x256xf32>
    %309 = math.exp %308 : vector<8x256xf32>
    %cst_81 = arith.constant 1.000000e+00 : f32
    %310 = vector.broadcast %cst_81 : f32 to vector<8x256xf32>
    %311 = arith.addf %310, %309 : vector<8x256xf32>
    %312 = arith.divf %310, %311 : vector<8x256xf32>
    %313 = vector.extract_strided_slice %279 {offsets = [0, 256], sizes = [8, 128], strides = [1, 1]} : vector<8x384xf32> to vector<8x128xf32>
    %314 = vector.extract_strided_slice %312 {offsets = [0, 0], sizes = [8, 128], strides = [1, 1]} : vector<8x256xf32> to vector<8x128xf32>
    %315 = vector.extract_strided_slice %281 {offsets = [0, 256], sizes = [8, 128], strides = [1, 1]} : vector<8x384xf32> to vector<8x128xf32>
    %316 = vector.broadcast %17 : vector<1x128xf32> to vector<8x128xf32>
    %317 = arith.addf %315, %316 : vector<8x128xf32>
    %318 = arith.mulf %314, %317 : vector<8x128xf32>
    %319 = arith.addf %313, %318 : vector<8x128xf32>
    %320 = math.tanh %319 : vector<8x128xf32>
    %321 = vector.extract_strided_slice %312 {offsets = [0, 128], sizes = [8, 128], strides = [1, 1]} : vector<8x256xf32> to vector<8x128xf32>
    %cst_82 = arith.constant 1.000000e+00 : f32
    %322 = vector.broadcast %cst_82 : f32 to vector<8x128xf32>
    %323 = arith.subf %322, %321 : vector<8x128xf32>
    %324 = arith.mulf %323, %320 : vector<8x128xf32>
    %325 = vector.extract_strided_slice %270 {offsets = [0, 128], sizes = [8, 128], strides = [1, 1]} : vector<8x256xf32> to vector<8x128xf32>
    %326 = arith.mulf %321, %325 : vector<8x128xf32>
    %327 = arith.addf %324, %326 : vector<8x128xf32>
    %328 = vector.extract_strided_slice %15 {offsets = [3, 0, 0], sizes = [1, 8, 1], strides = [1, 1, 1]} : vector<8x8x1xi1> to vector<1x8x1xi1>
    %329 = vector.shape_cast %328 : vector<1x8x1xi1> to vector<8x1xi1>
    %330 = vector.extract_strided_slice %15 {offsets = [4, 0, 0], sizes = [1, 8, 1], strides = [1, 1, 1]} : vector<8x8x1xi1> to vector<1x8x1xi1>
    %331 = vector.shape_cast %330 : vector<1x8x1xi1> to vector<8x1xi1>
    %cst_83 = arith.constant 0.000000e+00 : f32
    %332 = vector.shape_cast %329 : vector<8x1xi1> to vector<8x1xi1>
    %333 = vector.broadcast %332 : vector<8x1xi1> to vector<8x128xi1>
    %334 = vector.broadcast %cst_83 : f32 to vector<8x128xf32>
    %335 = arith.select %333, %304, %334 : vector<8x128xi1>, vector<8x128xf32>
    %c3_84 = arith.constant 3 : index
    %c0_85 = arith.constant 0 : index
    %c0_86 = arith.constant 0 : index
    %336 = vector.load %arg15[%c3_84, %c0_85, %c0_86] : memref<8x8x256xf32, #tpu.memory_space<vmem>>, vector<1x8x128xf32>
    %337 = vector.shape_cast %336 : vector<1x8x128xf32> to vector<8x128xf32>
    %338 = vector.shape_cast %335 : vector<8x128xf32> to vector<1x8x128xf32>
    tpu.vector_store %arg15[%c3_84, %c0_85, %c0_86], %338 {strides = array<i32>} : memref<8x8x256xf32, #tpu.memory_space<vmem>>, vector<1x8x128xf32>,
    %cst_87 = arith.constant 0.000000e+00 : f32
    %339 = vector.shape_cast %331 : vector<8x1xi1> to vector<8x1xi1>
    %340 = vector.broadcast %339 : vector<8x1xi1> to vector<8x128xi1>
    %341 = vector.broadcast %cst_87 : f32 to vector<8x128xf32>
    %342 = arith.select %340, %327, %341 : vector<8x128xi1>, vector<8x128xf32>
    %c4_88 = arith.constant 4 : index
    %c0_89 = arith.constant 0 : index
    %c128_90 = arith.constant 128 : index
    %343 = vector.load %arg15[%c4_88, %c0_89, %c128_90] : memref<8x8x256xf32, #tpu.memory_space<vmem>>, vector<1x8x128xf32>
    %344 = vector.shape_cast %343 : vector<1x8x128xf32> to vector<8x128xf32>
    %345 = vector.shape_cast %342 : vector<8x128xf32> to vector<1x8x128xf32>
    tpu.vector_store %arg15[%c4_88, %c0_89, %c128_90], %345 {strides = array<i32>} : memref<8x8x256xf32, #tpu.memory_space<vmem>>, vector<1x8x128xf32>,
    %346 = vector.extract_strided_slice %270 {offsets = [0, 0], sizes = [8, 128], strides = [1, 1]} : vector<8x256xf32> to vector<8x128xf32>
    %347 = vector.shape_cast %329 : vector<8x1xi1> to vector<8x1xi1>
    %348 = vector.broadcast %347 : vector<8x1xi1> to vector<8x128xi1>
    %349 = arith.select %348, %304, %346 : vector<8x128xi1>, vector<8x128xf32>
    %350 = vector.extract_strided_slice %270 {offsets = [0, 128], sizes = [8, 128], strides = [1, 1]} : vector<8x256xf32> to vector<8x128xf32>
    %351 = vector.shape_cast %331 : vector<8x1xi1> to vector<8x1xi1>
    %352 = vector.broadcast %351 : vector<8x1xi1> to vector<8x128xi1>
    %353 = arith.select %352, %327, %350 : vector<8x128xi1>, vector<8x128xf32>
    %354 = tpu.concatenate %349, %353 in 1 : vector<8x128xf32>, vector<8x128xf32> -> vector<8x256xf32>
    %355 = arith.truncf %354 : vector<8x256xf32> to vector<8x256xbf16>
    %c0_91 = arith.constant 0 : index
    %c0_92 = arith.constant 0 : index
    %356 = vector.load %arg5[%c0_91, %c0_92] : memref<256x768xbf16, #tpu.memory_space<vmem>>, vector<256x768xbf16>
    %cst_93 = arith.constant dense<0.000000e+00> : vector<8x768xf32>
    %357 = tpu.matmul %355, %356, %cst_93 {dimension_numbers = #tpu.dot_dimension_numbers<[1], [0], [0], [1], [0, 0, 1, 1], [], []>} : vector<8x256xbf16>, vector<256x768xbf16>, vector<8x768xf32> -> vector<8x768xf32>
    %c4_94 = arith.constant 4 : index
    %c0_95 = arith.constant 0 : index
    %c0_96 = arith.constant 0 : index
    %358 = vector.load %arg14[%c4_94, %c0_95, %c0_96] : memref<8x8x768xbf16, #tpu.memory_space<vmem>>, vector<1x8x384xbf16>
    %359 = vector.shape_cast %358 : vector<1x8x384xbf16> to vector<8x384xbf16>
    %360 = arith.extf %359 : vector<8x384xbf16> to vector<8x384xf32>
    %c3_97 = arith.constant 3 : index
    %c0_98 = arith.constant 0 : index
    %c384_99 = arith.constant 384 : index
    %361 = vector.load %arg14[%c3_97, %c0_98, %c384_99] : memref<8x8x768xbf16, #tpu.memory_space<vmem>>, vector<1x8x384xbf16>
    %362 = vector.shape_cast %361 : vector<1x8x384xbf16> to vector<8x384xbf16>
    %363 = arith.extf %362 : vector<8x384xbf16> to vector<8x384xf32>
    %364 = vector.extract_strided_slice %357 {offsets = [0, 0], sizes = [8, 384], strides = [1, 1]} : vector<8x768xf32> to vector<8x384xf32>
    %365 = vector.extract_strided_slice %357 {offsets = [0, 384], sizes = [8, 384], strides = [1, 1]} : vector<8x768xf32> to vector<8x384xf32>
    %366 = vector.extract_strided_slice %360 {offsets = [0, 0], sizes = [8, 256], strides = [1, 1]} : vector<8x384xf32> to vector<8x256xf32>
    %367 = vector.extract_strided_slice %364 {offsets = [0, 0], sizes = [8, 256], strides = [1, 1]} : vector<8x384xf32> to vector<8x256xf32>
    %368 = arith.addf %366, %367 : vector<8x256xf32>
    %369 = arith.negf %368 : vector<8x256xf32>
    %370 = math.exp %369 : vector<8x256xf32>
    %cst_100 = arith.constant 1.000000e+00 : f32
    %371 = vector.broadcast %cst_100 : f32 to vector<8x256xf32>
    %372 = arith.addf %371, %370 : vector<8x256xf32>
    %373 = arith.divf %371, %372 : vector<8x256xf32>
    %374 = vector.extract_strided_slice %360 {offsets = [0, 256], sizes = [8, 128], strides = [1, 1]} : vector<8x384xf32> to vector<8x128xf32>
    %375 = vector.extract_strided_slice %373 {offsets = [0, 0], sizes = [8, 128], strides = [1, 1]} : vector<8x256xf32> to vector<8x128xf32>
    %376 = vector.extract_strided_slice %364 {offsets = [0, 256], sizes = [8, 128], strides = [1, 1]} : vector<8x384xf32> to vector<8x128xf32>
    %377 = vector.broadcast %16 : vector<1x128xf32> to vector<8x128xf32>
    %378 = arith.addf %376, %377 : vector<8x128xf32>
    %379 = arith.mulf %375, %378 : vector<8x128xf32>
    %380 = arith.addf %374, %379 : vector<8x128xf32>
    %381 = math.tanh %380 : vector<8x128xf32>
    %382 = vector.extract_strided_slice %373 {offsets = [0, 128], sizes = [8, 128], strides = [1, 1]} : vector<8x256xf32> to vector<8x128xf32>
    %cst_101 = arith.constant 1.000000e+00 : f32
    %383 = vector.broadcast %cst_101 : f32 to vector<8x128xf32>
    %384 = arith.subf %383, %382 : vector<8x128xf32>
    %385 = arith.mulf %384, %381 : vector<8x128xf32>
    %386 = vector.extract_strided_slice %354 {offsets = [0, 0], sizes = [8, 128], strides = [1, 1]} : vector<8x256xf32> to vector<8x128xf32>
    %387 = arith.mulf %382, %386 : vector<8x128xf32>
    %388 = arith.addf %385, %387 : vector<8x128xf32>
    %389 = vector.extract_strided_slice %363 {offsets = [0, 0], sizes = [8, 256], strides = [1, 1]} : vector<8x384xf32> to vector<8x256xf32>
    %390 = vector.extract_strided_slice %365 {offsets = [0, 0], sizes = [8, 256], strides = [1, 1]} : vector<8x384xf32> to vector<8x256xf32>
    %391 = arith.addf %389, %390 : vector<8x256xf32>
    %392 = arith.negf %391 : vector<8x256xf32>
    %393 = math.exp %392 : vector<8x256xf32>
    %cst_102 = arith.constant 1.000000e+00 : f32
    %394 = vector.broadcast %cst_102 : f32 to vector<8x256xf32>
    %395 = arith.addf %394, %393 : vector<8x256xf32>
    %396 = arith.divf %394, %395 : vector<8x256xf32>
    %397 = vector.extract_strided_slice %363 {offsets = [0, 256], sizes = [8, 128], strides = [1, 1]} : vector<8x384xf32> to vector<8x128xf32>
    %398 = vector.extract_strided_slice %396 {offsets = [0, 0], sizes = [8, 128], strides = [1, 1]} : vector<8x256xf32> to vector<8x128xf32>
    %399 = vector.extract_strided_slice %365 {offsets = [0, 256], sizes = [8, 128], strides = [1, 1]} : vector<8x384xf32> to vector<8x128xf32>
    %400 = vector.broadcast %17 : vector<1x128xf32> to vector<8x128xf32>
    %401 = arith.addf %399, %400 : vector<8x128xf32>
    %402 = arith.mulf %398, %401 : vector<8x128xf32>
    %403 = arith.addf %397, %402 : vector<8x128xf32>
    %404 = math.tanh %403 : vector<8x128xf32>
    %405 = vector.extract_strided_slice %396 {offsets = [0, 128], sizes = [8, 128], strides = [1, 1]} : vector<8x256xf32> to vector<8x128xf32>
    %cst_103 = arith.constant 1.000000e+00 : f32
    %406 = vector.broadcast %cst_103 : f32 to vector<8x128xf32>
    %407 = arith.subf %406, %405 : vector<8x128xf32>
    %408 = arith.mulf %407, %404 : vector<8x128xf32>
    %409 = vector.extract_strided_slice %354 {offsets = [0, 128], sizes = [8, 128], strides = [1, 1]} : vector<8x256xf32> to vector<8x128xf32>
    %410 = arith.mulf %405, %409 : vector<8x128xf32>
    %411 = arith.addf %408, %410 : vector<8x128xf32>
    %412 = vector.extract_strided_slice %15 {offsets = [4, 0, 0], sizes = [1, 8, 1], strides = [1, 1, 1]} : vector<8x8x1xi1> to vector<1x8x1xi1>
    %413 = vector.shape_cast %412 : vector<1x8x1xi1> to vector<8x1xi1>
    %414 = vector.extract_strided_slice %15 {offsets = [3, 0, 0], sizes = [1, 8, 1], strides = [1, 1, 1]} : vector<8x8x1xi1> to vector<1x8x1xi1>
    %415 = vector.shape_cast %414 : vector<1x8x1xi1> to vector<8x1xi1>
    %cst_104 = arith.constant 0.000000e+00 : f32
    %416 = vector.shape_cast %413 : vector<8x1xi1> to vector<8x1xi1>
    %417 = vector.broadcast %416 : vector<8x1xi1> to vector<8x128xi1>
    %418 = vector.broadcast %cst_104 : f32 to vector<8x128xf32>
    %419 = arith.select %417, %388, %418 : vector<8x128xi1>, vector<8x128xf32>
    %c4_105 = arith.constant 4 : index
    %c0_106 = arith.constant 0 : index
    %c0_107 = arith.constant 0 : index
    %420 = vector.load %arg15[%c4_105, %c0_106, %c0_107] : memref<8x8x256xf32, #tpu.memory_space<vmem>>, vector<1x8x128xf32>
    %421 = vector.shape_cast %420 : vector<1x8x128xf32> to vector<8x128xf32>
    %422 = vector.shape_cast %419 : vector<8x128xf32> to vector<1x8x128xf32>
    tpu.vector_store %arg15[%c4_105, %c0_106, %c0_107], %422 {strides = array<i32>} : memref<8x8x256xf32, #tpu.memory_space<vmem>>, vector<1x8x128xf32>,
    %cst_108 = arith.constant 0.000000e+00 : f32
    %423 = vector.shape_cast %415 : vector<8x1xi1> to vector<8x1xi1>
    %424 = vector.broadcast %423 : vector<8x1xi1> to vector<8x128xi1>
    %425 = vector.broadcast %cst_108 : f32 to vector<8x128xf32>
    %426 = arith.select %424, %411, %425 : vector<8x128xi1>, vector<8x128xf32>
    %c3_109 = arith.constant 3 : index
    %c0_110 = arith.constant 0 : index
    %c128_111 = arith.constant 128 : index
    %427 = vector.load %arg15[%c3_109, %c0_110, %c128_111] : memref<8x8x256xf32, #tpu.memory_space<vmem>>, vector<1x8x128xf32>
    %428 = vector.shape_cast %427 : vector<1x8x128xf32> to vector<8x128xf32>
    %429 = vector.shape_cast %426 : vector<8x128xf32> to vector<1x8x128xf32>
    tpu.vector_store %arg15[%c3_109, %c0_110, %c128_111], %429 {strides = array<i32>} : memref<8x8x256xf32, #tpu.memory_space<vmem>>, vector<1x8x128xf32>,
    %430 = vector.extract_strided_slice %354 {offsets = [0, 0], sizes = [8, 128], strides = [1, 1]} : vector<8x256xf32> to vector<8x128xf32>
    %431 = vector.shape_cast %413 : vector<8x1xi1> to vector<8x1xi1>
    %432 = vector.broadcast %431 : vector<8x1xi1> to vector<8x128xi1>
    %433 = arith.select %432, %388, %430 : vector<8x128xi1>, vector<8x128xf32>
    %434 = vector.extract_strided_slice %354 {offsets = [0, 128], sizes = [8, 128], strides = [1, 1]} : vector<8x256xf32> to vector<8x128xf32>
    %435 = vector.shape_cast %415 : vector<8x1xi1> to vector<8x1xi1>
    %436 = vector.broadcast %435 : vector<8x1xi1> to vector<8x128xi1>
    %437 = arith.select %436, %411, %434 : vector<8x128xi1>, vector<8x128xf32>
    %438 = tpu.concatenate %433, %437 in 1 : vector<8x128xf32>, vector<8x128xf32> -> vector<8x256xf32>
    %439 = arith.truncf %438 : vector<8x256xf32> to vector<8x256xbf16>
    %c0_112 = arith.constant 0 : index
    %c0_113 = arith.constant 0 : index
    %440 = vector.load %arg5[%c0_112, %c0_113] : memref<256x768xbf16, #tpu.memory_space<vmem>>, vector<256x768xbf16>
    %cst_114 = arith.constant dense<0.000000e+00> : vector<8x768xf32>
    %441 = tpu.matmul %439, %440, %cst_114 {dimension_numbers = #tpu.dot_dimension_numbers<[1], [0], [0], [1], [0, 0, 1, 1], [], []>} : vector<8x256xbf16>, vector<256x768xbf16>, vector<8x768xf32> -> vector<8x768xf32>
    %c5_115 = arith.constant 5 : index
    %c0_116 = arith.constant 0 : index
    %c0_117 = arith.constant 0 : index
    %442 = vector.load %arg14[%c5_115, %c0_116, %c0_117] : memref<8x8x768xbf16, #tpu.memory_space<vmem>>, vector<1x8x384xbf16>
    %443 = vector.shape_cast %442 : vector<1x8x384xbf16> to vector<8x384xbf16>
    %444 = arith.extf %443 : vector<8x384xbf16> to vector<8x384xf32>
    %c2_118 = arith.constant 2 : index
    %c0_119 = arith.constant 0 : index
    %c384_120 = arith.constant 384 : index
    %445 = vector.load %arg14[%c2_118, %c0_119, %c384_120] : memref<8x8x768xbf16, #tpu.memory_space<vmem>>, vector<1x8x384xbf16>
    %446 = vector.shape_cast %445 : vector<1x8x384xbf16> to vector<8x384xbf16>
    %447 = arith.extf %446 : vector<8x384xbf16> to vector<8x384xf32>
    %448 = vector.extract_strided_slice %441 {offsets = [0, 0], sizes = [8, 384], strides = [1, 1]} : vector<8x768xf32> to vector<8x384xf32>
    %449 = vector.extract_strided_slice %441 {offsets = [0, 384], sizes = [8, 384], strides = [1, 1]} : vector<8x768xf32> to vector<8x384xf32>
    %450 = vector.extract_strided_slice %444 {offsets = [0, 0], sizes = [8, 256], strides = [1, 1]} : vector<8x384xf32> to vector<8x256xf32>
    %451 = vector.extract_strided_slice %448 {offsets = [0, 0], sizes = [8, 256], strides = [1, 1]} : vector<8x384xf32> to vector<8x256xf32>
    %452 = arith.addf %450, %451 : vector<8x256xf32>
    %453 = arith.negf %452 : vector<8x256xf32>
    %454 = math.exp %453 : vector<8x256xf32>
    %cst_121 = arith.constant 1.000000e+00 : f32
    %455 = vector.broadcast %cst_121 : f32 to vector<8x256xf32>
    %456 = arith.addf %455, %454 : vector<8x256xf32>
    %457 = arith.divf %455, %456 : vector<8x256xf32>
    %458 = vector.extract_strided_slice %444 {offsets = [0, 256], sizes = [8, 128], strides = [1, 1]} : vector<8x384xf32> to vector<8x128xf32>
    %459 = vector.extract_strided_slice %457 {offsets = [0, 0], sizes = [8, 128], strides = [1, 1]} : vector<8x256xf32> to vector<8x128xf32>
    %460 = vector.extract_strided_slice %448 {offsets = [0, 256], sizes = [8, 128], strides = [1, 1]} : vector<8x384xf32> to vector<8x128xf32>
    %461 = vector.broadcast %16 : vector<1x128xf32> to vector<8x128xf32>
    %462 = arith.addf %460, %461 : vector<8x128xf32>
    %463 = arith.mulf %459, %462 : vector<8x128xf32>
    %464 = arith.addf %458, %463 : vector<8x128xf32>
    %465 = math.tanh %464 : vector<8x128xf32>
    %466 = vector.extract_strided_slice %457 {offsets = [0, 128], sizes = [8, 128], strides = [1, 1]} : vector<8x256xf32> to vector<8x128xf32>
    %cst_122 = arith.constant 1.000000e+00 : f32
    %467 = vector.broadcast %cst_122 : f32 to vector<8x128xf32>
    %468 = arith.subf %467, %466 : vector<8x128xf32>
    %469 = arith.mulf %468, %465 : vector<8x128xf32>
    %470 = vector.extract_strided_slice %438 {offsets = [0, 0], sizes = [8, 128], strides = [1, 1]} : vector<8x256xf32> to vector<8x128xf32>
    %471 = arith.mulf %466, %470 : vector<8x128xf32>
    %472 = arith.addf %469, %471 : vector<8x128xf32>
    %473 = vector.extract_strided_slice %447 {offsets = [0, 0], sizes = [8, 256], strides = [1, 1]} : vector<8x384xf32> to vector<8x256xf32>
    %474 = vector.extract_strided_slice %449 {offsets = [0, 0], sizes = [8, 256], strides = [1, 1]} : vector<8x384xf32> to vector<8x256xf32>
    %475 = arith.addf %473, %474 : vector<8x256xf32>
    %476 = arith.negf %475 : vector<8x256xf32>
    %477 = math.exp %476 : vector<8x256xf32>
    %cst_123 = arith.constant 1.000000e+00 : f32
    %478 = vector.broadcast %cst_123 : f32 to vector<8x256xf32>
    %479 = arith.addf %478, %477 : vector<8x256xf32>
    %480 = arith.divf %478, %479 : vector<8x256xf32>
    %481 = vector.extract_strided_slice %447 {offsets = [0, 256], sizes = [8, 128], strides = [1, 1]} : vector<8x384xf32> to vector<8x128xf32>
    %482 = vector.extract_strided_slice %480 {offsets = [0, 0], sizes = [8, 128], strides = [1, 1]} : vector<8x256xf32> to vector<8x128xf32>
    %483 = vector.extract_strided_slice %449 {offsets = [0, 256], sizes = [8, 128], strides = [1, 1]} : vector<8x384xf32> to vector<8x128xf32>
    %484 = vector.broadcast %17 : vector<1x128xf32> to vector<8x128xf32>
    %485 = arith.addf %483, %484 : vector<8x128xf32>
    %486 = arith.mulf %482, %485 : vector<8x128xf32>
    %487 = arith.addf %481, %486 : vector<8x128xf32>
    %488 = math.tanh %487 : vector<8x128xf32>
    %489 = vector.extract_strided_slice %480 {offsets = [0, 128], sizes = [8, 128], strides = [1, 1]} : vector<8x256xf32> to vector<8x128xf32>
    %cst_124 = arith.constant 1.000000e+00 : f32
    %490 = vector.broadcast %cst_124 : f32 to vector<8x128xf32>
    %491 = arith.subf %490, %489 : vector<8x128xf32>
    %492 = arith.mulf %491, %488 : vector<8x128xf32>
    %493 = vector.extract_strided_slice %438 {offsets = [0, 128], sizes = [8, 128], strides = [1, 1]} : vector<8x256xf32> to vector<8x128xf32>
    %494 = arith.mulf %489, %493 : vector<8x128xf32>
    %495 = arith.addf %492, %494 : vector<8x128xf32>
    %496 = vector.extract_strided_slice %15 {offsets = [5, 0, 0], sizes = [1, 8, 1], strides = [1, 1, 1]} : vector<8x8x1xi1> to vector<1x8x1xi1>
    %497 = vector.shape_cast %496 : vector<1x8x1xi1> to vector<8x1xi1>
    %498 = vector.extract_strided_slice %15 {offsets = [2, 0, 0], sizes = [1, 8, 1], strides = [1, 1, 1]} : vector<8x8x1xi1> to vector<1x8x1xi1>
    %499 = vector.shape_cast %498 : vector<1x8x1xi1> to vector<8x1xi1>
    %cst_125 = arith.constant 0.000000e+00 : f32
    %500 = vector.shape_cast %497 : vector<8x1xi1> to vector<8x1xi1>
    %501 = vector.broadcast %500 : vector<8x1xi1> to vector<8x128xi1>
    %502 = vector.broadcast %cst_125 : f32 to vector<8x128xf32>
    %503 = arith.select %501, %472, %502 : vector<8x128xi1>, vector<8x128xf32>
    %c5_126 = arith.constant 5 : index
    %c0_127 = arith.constant 0 : index
    %c0_128 = arith.constant 0 : index
    %504 = vector.load %arg15[%c5_126, %c0_127, %c0_128] : memref<8x8x256xf32, #tpu.memory_space<vmem>>, vector<1x8x128xf32>
    %505 = vector.shape_cast %504 : vector<1x8x128xf32> to vector<8x128xf32>
    %506 = vector.shape_cast %503 : vector<8x128xf32> to vector<1x8x128xf32>
    tpu.vector_store %arg15[%c5_126, %c0_127, %c0_128], %506 {strides = array<i32>} : memref<8x8x256xf32, #tpu.memory_space<vmem>>, vector<1x8x128xf32>,
    %cst_129 = arith.constant 0.000000e+00 : f32
    %507 = vector.shape_cast %499 : vector<8x1xi1> to vector<8x1xi1>
    %508 = vector.broadcast %507 : vector<8x1xi1> to vector<8x128xi1>
    %509 = vector.broadcast %cst_129 : f32 to vector<8x128xf32>
    %510 = arith.select %508, %495, %509 : vector<8x128xi1>, vector<8x128xf32>
    %c2_130 = arith.constant 2 : index
    %c0_131 = arith.constant 0 : index
    %c128_132 = arith.constant 128 : index
    %511 = vector.load %arg15[%c2_130, %c0_131, %c128_132] : memref<8x8x256xf32, #tpu.memory_space<vmem>>, vector<1x8x128xf32>
    %512 = vector.shape_cast %511 : vector<1x8x128xf32> to vector<8x128xf32>
    %513 = vector.shape_cast %510 : vector<8x128xf32> to vector<1x8x128xf32>
    tpu.vector_store %arg15[%c2_130, %c0_131, %c128_132], %513 {strides = array<i32>} : memref<8x8x256xf32, #tpu.memory_space<vmem>>, vector<1x8x128xf32>,
    %514 = vector.extract_strided_slice %438 {offsets = [0, 0], sizes = [8, 128], strides = [1, 1]} : vector<8x256xf32> to vector<8x128xf32>
    %515 = vector.shape_cast %497 : vector<8x1xi1> to vector<8x1xi1>
    %516 = vector.broadcast %515 : vector<8x1xi1> to vector<8x128xi1>
    %517 = arith.select %516, %472, %514 : vector<8x128xi1>, vector<8x128xf32>
    %518 = vector.extract_strided_slice %438 {offsets = [0, 128], sizes = [8, 128], strides = [1, 1]} : vector<8x256xf32> to vector<8x128xf32>
    %519 = vector.shape_cast %499 : vector<8x1xi1> to vector<8x1xi1>
    %520 = vector.broadcast %519 : vector<8x1xi1> to vector<8x128xi1>
    %521 = arith.select %520, %495, %518 : vector<8x128xi1>, vector<8x128xf32>
    %522 = tpu.concatenate %517, %521 in 1 : vector<8x128xf32>, vector<8x128xf32> -> vector<8x256xf32>
    %523 = arith.truncf %522 : vector<8x256xf32> to vector<8x256xbf16>
    %c0_133 = arith.constant 0 : index
    %c0_134 = arith.constant 0 : index
    %524 = vector.load %arg5[%c0_133, %c0_134] : memref<256x768xbf16, #tpu.memory_space<vmem>>, vector<256x768xbf16>
    %cst_135 = arith.constant dense<0.000000e+00> : vector<8x768xf32>
    %525 = tpu.matmul %523, %524, %cst_135 {dimension_numbers = #tpu.dot_dimension_numbers<[1], [0], [0], [1], [0, 0, 1, 1], [], []>} : vector<8x256xbf16>, vector<256x768xbf16>, vector<8x768xf32> -> vector<8x768xf32>
    %c6_136 = arith.constant 6 : index
    %c0_137 = arith.constant 0 : index
    %c0_138 = arith.constant 0 : index
    %526 = vector.load %arg14[%c6_136, %c0_137, %c0_138] : memref<8x8x768xbf16, #tpu.memory_space<vmem>>, vector<1x8x384xbf16>
    %527 = vector.shape_cast %526 : vector<1x8x384xbf16> to vector<8x384xbf16>
    %528 = arith.extf %527 : vector<8x384xbf16> to vector<8x384xf32>
    %c1_139 = arith.constant 1 : index
    %c0_140 = arith.constant 0 : index
    %c384_141 = arith.constant 384 : index
    %529 = vector.load %arg14[%c1_139, %c0_140, %c384_141] : memref<8x8x768xbf16, #tpu.memory_space<vmem>>, vector<1x8x384xbf16>
    %530 = vector.shape_cast %529 : vector<1x8x384xbf16> to vector<8x384xbf16>
    %531 = arith.extf %530 : vector<8x384xbf16> to vector<8x384xf32>
    %532 = vector.extract_strided_slice %525 {offsets = [0, 0], sizes = [8, 384], strides = [1, 1]} : vector<8x768xf32> to vector<8x384xf32>
    %533 = vector.extract_strided_slice %525 {offsets = [0, 384], sizes = [8, 384], strides = [1, 1]} : vector<8x768xf32> to vector<8x384xf32>
    %534 = vector.extract_strided_slice %528 {offsets = [0, 0], sizes = [8, 256], strides = [1, 1]} : vector<8x384xf32> to vector<8x256xf32>
    %535 = vector.extract_strided_slice %532 {offsets = [0, 0], sizes = [8, 256], strides = [1, 1]} : vector<8x384xf32> to vector<8x256xf32>
    %536 = arith.addf %534, %535 : vector<8x256xf32>
    %537 = arith.negf %536 : vector<8x256xf32>
    %538 = math.exp %537 : vector<8x256xf32>
    %cst_142 = arith.constant 1.000000e+00 : f32
    %539 = vector.broadcast %cst_142 : f32 to vector<8x256xf32>
    %540 = arith.addf %539, %538 : vector<8x256xf32>
    %541 = arith.divf %539, %540 : vector<8x256xf32>
    %542 = vector.extract_strided_slice %528 {offsets = [0, 256], sizes = [8, 128], strides = [1, 1]} : vector<8x384xf32> to vector<8x128xf32>
    %543 = vector.extract_strided_slice %541 {offsets = [0, 0], sizes = [8, 128], strides = [1, 1]} : vector<8x256xf32> to vector<8x128xf32>
    %544 = vector.extract_strided_slice %532 {offsets = [0, 256], sizes = [8, 128], strides = [1, 1]} : vector<8x384xf32> to vector<8x128xf32>
    %545 = vector.broadcast %16 : vector<1x128xf32> to vector<8x128xf32>
    %546 = arith.addf %544, %545 : vector<8x128xf32>
    %547 = arith.mulf %543, %546 : vector<8x128xf32>
    %548 = arith.addf %542, %547 : vector<8x128xf32>
    %549 = math.tanh %548 : vector<8x128xf32>
    %550 = vector.extract_strided_slice %541 {offsets = [0, 128], sizes = [8, 128], strides = [1, 1]} : vector<8x256xf32> to vector<8x128xf32>
    %cst_143 = arith.constant 1.000000e+00 : f32
    %551 = vector.broadcast %cst_143 : f32 to vector<8x128xf32>
    %552 = arith.subf %551, %550 : vector<8x128xf32>
    %553 = arith.mulf %552, %549 : vector<8x128xf32>
    %554 = vector.extract_strided_slice %522 {offsets = [0, 0], sizes = [8, 128], strides = [1, 1]} : vector<8x256xf32> to vector<8x128xf32>
    %555 = arith.mulf %550, %554 : vector<8x128xf32>
    %556 = arith.addf %553, %555 : vector<8x128xf32>
    %557 = vector.extract_strided_slice %531 {offsets = [0, 0], sizes = [8, 256], strides = [1, 1]} : vector<8x384xf32> to vector<8x256xf32>
    %558 = vector.extract_strided_slice %533 {offsets = [0, 0], sizes = [8, 256], strides = [1, 1]} : vector<8x384xf32> to vector<8x256xf32>
    %559 = arith.addf %557, %558 : vector<8x256xf32>
    %560 = arith.negf %559 : vector<8x256xf32>
    %561 = math.exp %560 : vector<8x256xf32>
    %cst_144 = arith.constant 1.000000e+00 : f32
    %562 = vector.broadcast %cst_144 : f32 to vector<8x256xf32>
    %563 = arith.addf %562, %561 : vector<8x256xf32>
    %564 = arith.divf %562, %563 : vector<8x256xf32>
    %565 = vector.extract_strided_slice %531 {offsets = [0, 256], sizes = [8, 128], strides = [1, 1]} : vector<8x384xf32> to vector<8x128xf32>
    %566 = vector.extract_strided_slice %564 {offsets = [0, 0], sizes = [8, 128], strides = [1, 1]} : vector<8x256xf32> to vector<8x128xf32>
    %567 = vector.extract_strided_slice %533 {offsets = [0, 256], sizes = [8, 128], strides = [1, 1]} : vector<8x384xf32> to vector<8x128xf32>
    %568 = vector.broadcast %17 : vector<1x128xf32> to vector<8x128xf32>
    %569 = arith.addf %567, %568 : vector<8x128xf32>
    %570 = arith.mulf %566, %569 : vector<8x128xf32>
    %571 = arith.addf %565, %570 : vector<8x128xf32>
    %572 = math.tanh %571 : vector<8x128xf32>
    %573 = vector.extract_strided_slice %564 {offsets = [0, 128], sizes = [8, 128], strides = [1, 1]} : vector<8x256xf32> to vector<8x128xf32>
    %cst_145 = arith.constant 1.000000e+00 : f32
    %574 = vector.broadcast %cst_145 : f32 to vector<8x128xf32>
    %575 = arith.subf %574, %573 : vector<8x128xf32>
    %576 = arith.mulf %575, %572 : vector<8x128xf32>
    %577 = vector.extract_strided_slice %522 {offsets = [0, 128], sizes = [8, 128], strides = [1, 1]} : vector<8x256xf32> to vector<8x128xf32>
    %578 = arith.mulf %573, %577 : vector<8x128xf32>
    %579 = arith.addf %576, %578 : vector<8x128xf32>
    %580 = vector.extract_strided_slice %15 {offsets = [6, 0, 0], sizes = [1, 8, 1], strides = [1, 1, 1]} : vector<8x8x1xi1> to vector<1x8x1xi1>
    %581 = vector.shape_cast %580 : vector<1x8x1xi1> to vector<8x1xi1>
    %582 = vector.extract_strided_slice %15 {offsets = [1, 0, 0], sizes = [1, 8, 1], strides = [1, 1, 1]} : vector<8x8x1xi1> to vector<1x8x1xi1>
    %583 = vector.shape_cast %582 : vector<1x8x1xi1> to vector<8x1xi1>
    %cst_146 = arith.constant 0.000000e+00 : f32
    %584 = vector.shape_cast %581 : vector<8x1xi1> to vector<8x1xi1>
    %585 = vector.broadcast %584 : vector<8x1xi1> to vector<8x128xi1>
    %586 = vector.broadcast %cst_146 : f32 to vector<8x128xf32>
    %587 = arith.select %585, %556, %586 : vector<8x128xi1>, vector<8x128xf32>
    %c6_147 = arith.constant 6 : index
    %c0_148 = arith.constant 0 : index
    %c0_149 = arith.constant 0 : index
    %588 = vector.load %arg15[%c6_147, %c0_148, %c0_149] : memref<8x8x256xf32, #tpu.memory_space<vmem>>, vector<1x8x128xf32>
    %589 = vector.shape_cast %588 : vector<1x8x128xf32> to vector<8x128xf32>
    %590 = vector.shape_cast %587 : vector<8x128xf32> to vector<1x8x128xf32>
    tpu.vector_store %arg15[%c6_147, %c0_148, %c0_149], %590 {strides = array<i32>} : memref<8x8x256xf32, #tpu.memory_space<vmem>>, vector<1x8x128xf32>,
    %cst_150 = arith.constant 0.000000e+00 : f32
    %591 = vector.shape_cast %583 : vector<8x1xi1> to vector<8x1xi1>
    %592 = vector.broadcast %591 : vector<8x1xi1> to vector<8x128xi1>
    %593 = vector.broadcast %cst_150 : f32 to vector<8x128xf32>
    %594 = arith.select %592, %579, %593 : vector<8x128xi1>, vector<8x128xf32>
    %c1_151 = arith.constant 1 : index
    %c0_152 = arith.constant 0 : index
    %c128_153 = arith.constant 128 : index
    %595 = vector.load %arg15[%c1_151, %c0_152, %c128_153] : memref<8x8x256xf32, #tpu.memory_space<vmem>>, vector<1x8x128xf32>
    %596 = vector.shape_cast %595 : vector<1x8x128xf32> to vector<8x128xf32>
    %597 = vector.shape_cast %594 : vector<8x128xf32> to vector<1x8x128xf32>
    tpu.vector_store %arg15[%c1_151, %c0_152, %c128_153], %597 {strides = array<i32>} : memref<8x8x256xf32, #tpu.memory_space<vmem>>, vector<1x8x128xf32>,
    %598 = vector.extract_strided_slice %522 {offsets = [0, 0], sizes = [8, 128], strides = [1, 1]} : vector<8x256xf32> to vector<8x128xf32>
    %599 = vector.shape_cast %581 : vector<8x1xi1> to vector<8x1xi1>
    %600 = vector.broadcast %599 : vector<8x1xi1> to vector<8x128xi1>
    %601 = arith.select %600, %556, %598 : vector<8x128xi1>, vector<8x128xf32>
    %602 = vector.extract_strided_slice %522 {offsets = [0, 128], sizes = [8, 128], strides = [1, 1]} : vector<8x256xf32> to vector<8x128xf32>
    %603 = vector.shape_cast %583 : vector<8x1xi1> to vector<8x1xi1>
    %604 = vector.broadcast %603 : vector<8x1xi1> to vector<8x128xi1>
    %605 = arith.select %604, %579, %602 : vector<8x128xi1>, vector<8x128xf32>
    %606 = tpu.concatenate %601, %605 in 1 : vector<8x128xf32>, vector<8x128xf32> -> vector<8x256xf32>
    %607 = arith.truncf %606 : vector<8x256xf32> to vector<8x256xbf16>
    %c0_154 = arith.constant 0 : index
    %c0_155 = arith.constant 0 : index
    %608 = vector.load %arg5[%c0_154, %c0_155] : memref<256x768xbf16, #tpu.memory_space<vmem>>, vector<256x768xbf16>
    %cst_156 = arith.constant dense<0.000000e+00> : vector<8x768xf32>
    %609 = tpu.matmul %607, %608, %cst_156 {dimension_numbers = #tpu.dot_dimension_numbers<[1], [0], [0], [1], [0, 0, 1, 1], [], []>} : vector<8x256xbf16>, vector<256x768xbf16>, vector<8x768xf32> -> vector<8x768xf32>
    %c7_157 = arith.constant 7 : index
    %c0_158 = arith.constant 0 : index
    %c0_159 = arith.constant 0 : index
    %610 = vector.load %arg14[%c7_157, %c0_158, %c0_159] : memref<8x8x768xbf16, #tpu.memory_space<vmem>>, vector<1x8x384xbf16>
    %611 = vector.shape_cast %610 : vector<1x8x384xbf16> to vector<8x384xbf16>
    %612 = arith.extf %611 : vector<8x384xbf16> to vector<8x384xf32>
    %c0_160 = arith.constant 0 : index
    %c0_161 = arith.constant 0 : index
    %c384_162 = arith.constant 384 : index
    %613 = vector.load %arg14[%c0_160, %c0_161, %c384_162] : memref<8x8x768xbf16, #tpu.memory_space<vmem>>, vector<1x8x384xbf16>
    %614 = vector.shape_cast %613 : vector<1x8x384xbf16> to vector<8x384xbf16>
    %615 = arith.extf %614 : vector<8x384xbf16> to vector<8x384xf32>
    %616 = vector.extract_strided_slice %609 {offsets = [0, 0], sizes = [8, 384], strides = [1, 1]} : vector<8x768xf32> to vector<8x384xf32>
    %617 = vector.extract_strided_slice %609 {offsets = [0, 384], sizes = [8, 384], strides = [1, 1]} : vector<8x768xf32> to vector<8x384xf32>
    %618 = vector.extract_strided_slice %612 {offsets = [0, 0], sizes = [8, 256], strides = [1, 1]} : vector<8x384xf32> to vector<8x256xf32>
    %619 = vector.extract_strided_slice %616 {offsets = [0, 0], sizes = [8, 256], strides = [1, 1]} : vector<8x384xf32> to vector<8x256xf32>
    %620 = arith.addf %618, %619 : vector<8x256xf32>
    %621 = arith.negf %620 : vector<8x256xf32>
    %622 = math.exp %621 : vector<8x256xf32>
    %cst_163 = arith.constant 1.000000e+00 : f32
    %623 = vector.broadcast %cst_163 : f32 to vector<8x256xf32>
    %624 = arith.addf %623, %622 : vector<8x256xf32>
    %625 = arith.divf %623, %624 : vector<8x256xf32>
    %626 = vector.extract_strided_slice %612 {offsets = [0, 256], sizes = [8, 128], strides = [1, 1]} : vector<8x384xf32> to vector<8x128xf32>
    %627 = vector.extract_strided_slice %625 {offsets = [0, 0], sizes = [8, 128], strides = [1, 1]} : vector<8x256xf32> to vector<8x128xf32>
    %628 = vector.extract_strided_slice %616 {offsets = [0, 256], sizes = [8, 128], strides = [1, 1]} : vector<8x384xf32> to vector<8x128xf32>
    %629 = vector.broadcast %16 : vector<1x128xf32> to vector<8x128xf32>
    %630 = arith.addf %628, %629 : vector<8x128xf32>
    %631 = arith.mulf %627, %630 : vector<8x128xf32>
    %632 = arith.addf %626, %631 : vector<8x128xf32>
    %633 = math.tanh %632 : vector<8x128xf32>
    %634 = vector.extract_strided_slice %625 {offsets = [0, 128], sizes = [8, 128], strides = [1, 1]} : vector<8x256xf32> to vector<8x128xf32>
    %cst_164 = arith.constant 1.000000e+00 : f32
    %635 = vector.broadcast %cst_164 : f32 to vector<8x128xf32>
    %636 = arith.subf %635, %634 : vector<8x128xf32>
    %637 = arith.mulf %636, %633 : vector<8x128xf32>
    %638 = vector.extract_strided_slice %606 {offsets = [0, 0], sizes = [8, 128], strides = [1, 1]} : vector<8x256xf32> to vector<8x128xf32>
    %639 = arith.mulf %634, %638 : vector<8x128xf32>
    %640 = arith.addf %637, %639 : vector<8x128xf32>
    %641 = vector.extract_strided_slice %615 {offsets = [0, 0], sizes = [8, 256], strides = [1, 1]} : vector<8x384xf32> to vector<8x256xf32>
    %642 = vector.extract_strided_slice %617 {offsets = [0, 0], sizes = [8, 256], strides = [1, 1]} : vector<8x384xf32> to vector<8x256xf32>
    %643 = arith.addf %641, %642 : vector<8x256xf32>
    %644 = arith.negf %643 : vector<8x256xf32>
    %645 = math.exp %644 : vector<8x256xf32>
    %cst_165 = arith.constant 1.000000e+00 : f32
    %646 = vector.broadcast %cst_165 : f32 to vector<8x256xf32>
    %647 = arith.addf %646, %645 : vector<8x256xf32>
    %648 = arith.divf %646, %647 : vector<8x256xf32>
    %649 = vector.extract_strided_slice %615 {offsets = [0, 256], sizes = [8, 128], strides = [1, 1]} : vector<8x384xf32> to vector<8x128xf32>
    %650 = vector.extract_strided_slice %648 {offsets = [0, 0], sizes = [8, 128], strides = [1, 1]} : vector<8x256xf32> to vector<8x128xf32>
    %651 = vector.extract_strided_slice %617 {offsets = [0, 256], sizes = [8, 128], strides = [1, 1]} : vector<8x384xf32> to vector<8x128xf32>
    %652 = vector.broadcast %17 : vector<1x128xf32> to vector<8x128xf32>
    %653 = arith.addf %651, %652 : vector<8x128xf32>
    %654 = arith.mulf %650, %653 : vector<8x128xf32>
    %655 = arith.addf %649, %654 : vector<8x128xf32>
    %656 = math.tanh %655 : vector<8x128xf32>
    %657 = vector.extract_strided_slice %648 {offsets = [0, 128], sizes = [8, 128], strides = [1, 1]} : vector<8x256xf32> to vector<8x128xf32>
    %cst_166 = arith.constant 1.000000e+00 : f32
    %658 = vector.broadcast %cst_166 : f32 to vector<8x128xf32>
    %659 = arith.subf %658, %657 : vector<8x128xf32>
    %660 = arith.mulf %659, %656 : vector<8x128xf32>
    %661 = vector.extract_strided_slice %606 {offsets = [0, 128], sizes = [8, 128], strides = [1, 1]} : vector<8x256xf32> to vector<8x128xf32>
    %662 = arith.mulf %657, %661 : vector<8x128xf32>
    %663 = arith.addf %660, %662 : vector<8x128xf32>
    %664 = vector.extract_strided_slice %15 {offsets = [7, 0, 0], sizes = [1, 8, 1], strides = [1, 1, 1]} : vector<8x8x1xi1> to vector<1x8x1xi1>
    %665 = vector.shape_cast %664 : vector<1x8x1xi1> to vector<8x1xi1>
    %666 = vector.extract_strided_slice %15 {offsets = [0, 0, 0], sizes = [1, 8, 1], strides = [1, 1, 1]} : vector<8x8x1xi1> to vector<1x8x1xi1>
    %667 = vector.shape_cast %666 : vector<1x8x1xi1> to vector<8x1xi1>
    %cst_167 = arith.constant 0.000000e+00 : f32
    %668 = vector.shape_cast %665 : vector<8x1xi1> to vector<8x1xi1>
    %669 = vector.broadcast %668 : vector<8x1xi1> to vector<8x128xi1>
    %670 = vector.broadcast %cst_167 : f32 to vector<8x128xf32>
    %671 = arith.select %669, %640, %670 : vector<8x128xi1>, vector<8x128xf32>
    %c7_168 = arith.constant 7 : index
    %c0_169 = arith.constant 0 : index
    %c0_170 = arith.constant 0 : index
    %672 = vector.load %arg15[%c7_168, %c0_169, %c0_170] : memref<8x8x256xf32, #tpu.memory_space<vmem>>, vector<1x8x128xf32>
    %673 = vector.shape_cast %672 : vector<1x8x128xf32> to vector<8x128xf32>
    %674 = vector.shape_cast %671 : vector<8x128xf32> to vector<1x8x128xf32>
    tpu.vector_store %arg15[%c7_168, %c0_169, %c0_170], %674 {strides = array<i32>} : memref<8x8x256xf32, #tpu.memory_space<vmem>>, vector<1x8x128xf32>,
    %cst_171 = arith.constant 0.000000e+00 : f32
    %675 = vector.shape_cast %667 : vector<8x1xi1> to vector<8x1xi1>
    %676 = vector.broadcast %675 : vector<8x1xi1> to vector<8x128xi1>
    %677 = vector.broadcast %cst_171 : f32 to vector<8x128xf32>
    %678 = arith.select %676, %663, %677 : vector<8x128xi1>, vector<8x128xf32>
    %c0_172 = arith.constant 0 : index
    %c0_173 = arith.constant 0 : index
    %c128_174 = arith.constant 128 : index
    %679 = vector.load %arg15[%c0_172, %c0_173, %c128_174] : memref<8x8x256xf32, #tpu.memory_space<vmem>>, vector<1x8x128xf32>
    %680 = vector.shape_cast %679 : vector<1x8x128xf32> to vector<8x128xf32>
    %681 = vector.shape_cast %678 : vector<8x128xf32> to vector<1x8x128xf32>
    tpu.vector_store %arg15[%c0_172, %c0_173, %c128_174], %681 {strides = array<i32>} : memref<8x8x256xf32, #tpu.memory_space<vmem>>, vector<1x8x128xf32>,
    %682 = vector.extract_strided_slice %606 {offsets = [0, 0], sizes = [8, 128], strides = [1, 1]} : vector<8x256xf32> to vector<8x128xf32>
    %683 = vector.shape_cast %665 : vector<8x1xi1> to vector<8x1xi1>
    %684 = vector.broadcast %683 : vector<8x1xi1> to vector<8x128xi1>
    %685 = arith.select %684, %640, %682 : vector<8x128xi1>, vector<8x128xf32>
    %686 = vector.extract_strided_slice %606 {offsets = [0, 128], sizes = [8, 128], strides = [1, 1]} : vector<8x256xf32> to vector<8x128xf32>
    %687 = vector.shape_cast %667 : vector<8x1xi1> to vector<8x1xi1>
    %688 = vector.broadcast %687 : vector<8x1xi1> to vector<8x128xi1>
    %689 = arith.select %688, %663, %686 : vector<8x128xi1>, vector<8x128xf32>
    %690 = tpu.concatenate %685, %689 in 1 : vector<8x128xf32>, vector<8x128xf32> -> vector<8x256xf32>
    %c0_175 = arith.constant 0 : index
    %c0_176 = arith.constant 0 : index
    %c0_177 = arith.constant 0 : index
    %691 = vector.load %arg15[%c0_175, %c0_176, %c0_177] : memref<8x8x256xf32, #tpu.memory_space<vmem>>, vector<8x8x256xf32>
    %692 = arith.truncf %690 : vector<8x256xf32> to vector<8x256xbf16>
    %c0_178 = arith.constant 0 : index
    %c0_179 = arith.constant 0 : index
    %693 = vector.load %arg7[%c0_178, %c0_179] : memref<256x256xbf16, #tpu.memory_space<vmem>>, vector<256x256xbf16>
    %cst_180 = arith.constant dense<0.000000e+00> : vector<8x256xf32>
    %694 = tpu.matmul %692, %693, %cst_180 {dimension_numbers = #tpu.dot_dimension_numbers<[1], [0], [0], [1], [0, 0, 1, 1], [], []>} : vector<8x256xbf16>, vector<256x256xbf16>, vector<8x256xf32> -> vector<8x256xf32>
    %c0_181 = arith.constant 0 : index
    %c0_182 = arith.constant 0 : index
    %695 = vector.load %arg8[%c0_181, %c0_182] : memref<1x256xf32, #tpu.memory_space<vmem>>, vector<1x256xf32>
    %696 = vector.broadcast %695 : vector<1x256xf32> to vector<8x256xf32>
    %697 = arith.addf %694, %696 : vector<8x256xf32>
    %698 = vector.shape_cast %697 : vector<8x256xf32> to vector<1x8x256xf32>
    %699 = vector.broadcast %698 : vector<1x8x256xf32> to vector<8x8x256xf32>
    %700 = arith.addf %691, %699 : vector<8x8x256xf32>
    %701 = math.tanh %700 : vector<8x8x256xf32>
    %c0_183 = arith.constant 0 : index
    %c0_184 = arith.constant 0 : index
    %702 = vector.load %arg9[%c0_183, %c0_184] : memref<1x256xf32, #tpu.memory_space<vmem>>, vector<1x256xf32>
    %703 = vector.shape_cast %702 : vector<1x256xf32> to vector<1x1x256xf32>
    %704 = vector.broadcast %703 : vector<1x1x256xf32> to vector<8x8x256xf32>
    %705 = arith.mulf %701, %704 : vector<8x8x256xf32>
    %cst_185 = arith.constant dense<0.000000e+00> : vector<8x8xf32>
    %706 = vector.multi_reduction <add>, %705, %cst_185 [2] : vector<8x8x256xf32> to vector<8x8xf32>
    %707 = vector.shape_cast %706 : vector<8x8xf32> to vector<8x8x1xf32>
    %cst_186 = arith.constant dense<0xFF800000> : vector<8x1xf32>
    %708 = vector.multi_reduction <maximumf>, %707, %cst_186 [0] : vector<8x8x1xf32> to vector<8x1xf32>
    %709 = vector.shape_cast %708 : vector<8x1xf32> to vector<1x8x1xf32>
    %710 = vector.broadcast %709 : vector<1x8x1xf32> to vector<8x8x1xf32>
    %711 = arith.subf %707, %710 : vector<8x8x1xf32>
    %712 = math.exp %711 : vector<8x8x1xf32>
    %cst_187 = arith.constant dense<0.000000e+00> : vector<8x1xf32>
    %713 = vector.multi_reduction <add>, %712, %cst_187 [0] : vector<8x8x1xf32> to vector<8x1xf32>
    %714 = vector.shape_cast %713 : vector<8x1xf32> to vector<1x8x1xf32>
    %715 = tpu.reciprocal %714 {approx = true} : vector<1x8x1xf32> -> vector<1x8x1xf32>
    %716 = arith.mulf %714, %715 : vector<1x8x1xf32>
    %cst_188 = arith.constant 2.000000e+00 : f32
    %717 = vector.broadcast %cst_188 : f32 to vector<1x8x1xf32>
    %718 = arith.subf %717, %716 : vector<1x8x1xf32>
    %719 = arith.mulf %715, %718 : vector<1x8x1xf32>
    %720 = vector.broadcast %719 : vector<1x8x1xf32> to vector<8x8x1xf32>
    %721 = arith.mulf %712, %720 : vector<8x8x1xf32>
    %722 = vector.broadcast %721 : vector<8x8x1xf32> to vector<8x8x256xf32>
    %723 = arith.mulf %722, %691 : vector<8x8x256xf32>
    %cst_189 = arith.constant dense<0.000000e+00> : vector<8x256xf32>
    %724 = vector.multi_reduction <add>, %723, %cst_189 [0] : vector<8x8x256xf32> to vector<8x256xf32>
    %c0_190 = arith.constant 0 : index
    %c0_191 = arith.constant 0 : index
    %725 = vector.load %arg12[%c0_190, %c0_191] : memref<8x128xf32, #tpu.memory_space<vmem>>, vector<8x128xf32>
    %726 = tpu.concatenate %724, %725 in 1 : vector<8x256xf32>, vector<8x128xf32> -> vector<8x384xf32>
    %727 = arith.truncf %726 : vector<8x384xf32> to vector<8x384xbf16>
    %c0_192 = arith.constant 0 : index
    %c0_193 = arith.constant 0 : index
    %728 = vector.load %arg10[%c0_192, %c0_193] : memref<384x128xbf16, #tpu.memory_space<vmem>>, vector<384x128xbf16>
    %cst_194 = arith.constant dense<0.000000e+00> : vector<8x128xf32>
    %729 = tpu.matmul %727, %728, %cst_194 {dimension_numbers = #tpu.dot_dimension_numbers<[1], [0], [0], [1], [0, 0, 1, 1], [], []>} : vector<8x384xbf16>, vector<384x128xbf16>, vector<8x128xf32> -> vector<8x128xf32>
    %c0_195 = arith.constant 0 : index
    %c0_196 = arith.constant 0 : index
    %730 = vector.load %arg11[%c0_195, %c0_196] : memref<1x128xf32, #tpu.memory_space<vmem>>, vector<1x128xf32>
    %731 = vector.broadcast %730 : vector<1x128xf32> to vector<8x128xf32>
    %732 = arith.addf %729, %731 : vector<8x128xf32>
    %c0_197 = arith.constant 0 : index
    %c0_198 = arith.constant 0 : index
    %733 = vector.load %arg13[%c0_197, %c0_198] : memref<8x128xf32, #tpu.memory_space<vmem>>, vector<8x128xf32>
    tpu.vector_store %arg13[%c0_197, %c0_198], %732 {strides = array<i32>} : memref<8x128xf32, #tpu.memory_space<vmem>>, vector<8x128xf32>,
    return
  }
  func.func @transform_0(%arg0: i32) -> (i32, i32, i32) {
    %c0_i32 = arith.constant 0 : i32
    %c0_i32_0 = arith.constant 0 : i32
    %c0_i32_1 = arith.constant 0 : i32
    return %c0_i32, %arg0, %c0_i32_0 : i32, i32, i32
  }
  func.func @transform_1(%arg0: i32) -> (i32, i32) {
    %c0_i32 = arith.constant 0 : i32
    %c0_i32_0 = arith.constant 0 : i32
    return %arg0, %c0_i32 : i32, i32
  }
  func.func @transform_2(%arg0: i32) -> (i32, i32) {
    %c0_i32 = arith.constant 0 : i32
    %c0_i32_0 = arith.constant 0 : i32
    %c0_i32_1 = arith.constant 0 : i32
    return %c0_i32, %c0_i32_0 : i32, i32
  }
  func.func @transform_3(%arg0: i32) -> (i32, i32) {
    %c0_i32 = arith.constant 0 : i32
    %c0_i32_0 = arith.constant 0 : i32
    %c0_i32_1 = arith.constant 0 : i32
    return %c0_i32, %c0_i32_0 : i32, i32
  }
  func.func @transform_4(%arg0: i32) -> (i32, i32) {
    %c0_i32 = arith.constant 0 : i32
    %c0_i32_0 = arith.constant 0 : i32
    %c0_i32_1 = arith.constant 0 : i32
    return %c0_i32, %c0_i32_0 : i32, i32
  }
  func.func @transform_5(%arg0: i32) -> (i32, i32) {
    %c0_i32 = arith.constant 0 : i32
    %c0_i32_0 = arith.constant 0 : i32
    %c0_i32_1 = arith.constant 0 : i32
    return %c0_i32, %c0_i32_0 : i32, i32
  }
  func.func @transform_6(%arg0: i32) -> (i32, i32) {
    %c0_i32 = arith.constant 0 : i32
    %c0_i32_0 = arith.constant 0 : i32
    %c0_i32_1 = arith.constant 0 : i32
    return %c0_i32, %c0_i32_0 : i32, i32
  }
  func.func @transform_7(%arg0: i32) -> (i32, i32) {
    %c0_i32 = arith.constant 0 : i32
    %c0_i32_0 = arith.constant 0 : i32
    %c0_i32_1 = arith.constant 0 : i32
    return %c0_i32, %c0_i32_0 : i32, i32
  }
  func.func @transform_8(%arg0: i32) -> (i32, i32) {
    %c0_i32 = arith.constant 0 : i32
    %c0_i32_0 = arith.constant 0 : i32
    %c0_i32_1 = arith.constant 0 : i32
    return %c0_i32, %c0_i32_0 : i32, i32
  }
  func.func @transform_9(%arg0: i32) -> (i32, i32) {
    %c0_i32 = arith.constant 0 : i32
    %c0_i32_0 = arith.constant 0 : i32
    %c0_i32_1 = arith.constant 0 : i32
    return %c0_i32, %c0_i32_0 : i32, i32
  }
  func.func @transform_10(%arg0: i32) -> (i32, i32) {
    %c0_i32 = arith.constant 0 : i32
    %c0_i32_0 = arith.constant 0 : i32
    %c0_i32_1 = arith.constant 0 : i32
    return %c0_i32, %c0_i32_0 : i32, i32
  }
  func.func @transform_11(%arg0: i32) -> (i32, i32) {
    %c0_i32 = arith.constant 0 : i32
    %c0_i32_0 = arith.constant 0 : i32
    return %arg0, %c0_i32 : i32, i32
  }
  func.func @transform_12(%arg0: i32) -> (i32, i32) {
    %c0_i32 = arith.constant 0 : i32
    %c0_i32_0 = arith.constant 0 : i32
    return %arg0, %c0_i32 : i32, i32
  }
}

</mosaic_0001>

<bundles_post_ra>
// kernel: appro_sound_forward.1
= control target key start
LH: loop header
LB: loop body
LE: loop exit
PB: predicated region body
PF: predicated region fallthrough
CT: control target
= control target key end

     0   :  { %v9745_v1 = vmov 0   ;;  %s13286_s2 = inlined_call_operand.vmem [shape: bf16[128,768], index: 2, kind: input, shape index: {}]   ;;  %s13287_s4 = inlined_call_operand.vmem [shape: bf16[256,768], index: 4, kind: input, shape index: {}]   ;;  %s13288_s0 = inlined_call_operand.vmem [shape: f32[8,8,128], index: 0, kind: input, shape index: {}]   ;;  %s13289_s1 = inlined_call_operand.vmem [shape: s32[8,1], index: 1, kind: input, shape index: {}]   ;;  %s13290_s3 = inlined_call_operand.vmem [shape: f32[1,768], index: 3, kind: input, shape index: {}]   ;;  %s13291_s5 = inlined_call_operand.vmem [shape: f32[1,256], index: 5, kind: input, shape index: {}]   ;;  %s13292_s6 = inlined_call_operand.vmem [shape: bf16[256,256], index: 6, kind: input, shape index: {}]   ;;  %s13293_s7 = inlined_call_operand.vmem [shape: f32[1,256], index: 7, kind: input, shape index: {}]   ;;  %s13294_s8 = inlined_call_operand.vmem [shape: f32[1,256], index: 8, kind: input, shape index: {}]   ;;  %s13295_s9 = inlined_call_operand.vmem [shape: bf16[384,128], index: 9, kind: input, shape index: {}]   ;;  %s13296_s11 = inlined_call_operand.vmem [shape: f32[8,128], index: 11, kind: input, shape index: {}]   ;;  %s13297_s10 = inlined_call_operand.vmem [shape: f32[1,128], index: 10, kind: input, shape index: {}]   ;;  %s13298_s12 = inlined_call_operand.vmem [shape: f32[8,128], index: 12, kind: output, shape index: {}]  }
   0x1   :  { %v8714_v0 = vld [vmem:[%s13286_s2 + $0x4] ss:$24 sps:$4 sm:$0xff]   ;;  %406 = vmatprep.mubr.bf16.mxu0 %v9745_v1  ;;  %479 = vmatprep.mubr.bf16.mxu1 %v9745_v1  ;;  %v8718_v3 = vld [vmem:[%s13286_s2] ss:$24 sps:$4 sm:$0xff]   ;;  %v8720_v5 = vld [vmem:[%s13286_s2 + $0x34] ss:$24 sps:$4 sm:$0xff]  }
   0x2   :  { %v8716_v2 = vld [vmem:[%s13286_s2 + $0xc] ss:$24 sps:$4 sm:$0xff]   ;;  %8712 = vset.pattern.permute.xlu0 %v9745_v1  ;;  %8713 = vset.pattern.permute.xlu1 %v9745_v1  ;;  %v8719_v4 = vld [vmem:[%s13286_s2 + $0x8] ss:$24 sps:$4 sm:$0xff]   ;;  %v8722_v6 = vld [vmem:[%s13286_s2 + $0x3c] ss:$24 sps:$4 sm:$0xff]  }
   0x3   :  { %374 = vmatprep.subr.bf16.mxu0 %v8714_v0  ;;  %447 = vmatprep.subr.bf16.mxu1 %v8716_v2  ;;  %v8724_v7 = vld [vmem:[%s13286_s2 + $0x30] ss:$24 sps:$4 sm:$0xff]   ;;  %v8726_v9 = vld [vmem:[%s13286_s2 + $0x64] ss:$24 sps:$4 sm:$0xff]   ;;  %v8730_v11 = vld [vmem:[%s13286_s2 + $0x60] ss:$24 sps:$4 sm:$0xff]  }
   0x4   :  { %375 = vmatpush1.bf16.msra.mxu0 %v8718_v3  ;;  %448 = vmatpush1.bf16.msra.mxu1 %v8719_v4  ;;  %v8725_v8 = vld [vmem:[%s13286_s2 + $0x38] ss:$24 sps:$4 sm:$0xff]   ;;  %v8728_v10 = vld [vmem:[%s13286_s2 + $0x6c] ss:$24 sps:$4 sm:$0xff]   ;;  %v8731_v12 = vld [vmem:[%s13286_s2 + $0x68] ss:$24 sps:$4 sm:$0xff]  }
   0x5   :  { %376 = vmatprep.subr.bf16.mxu0 %v8720_v5  ;;  %449 = vmatprep.subr.bf16.mxu1 %v8722_v6  ;;  %v8732_v13 = vld [vmem:[%s13286_s2 + $0x94] ss:$24 sps:$4 sm:$0xff]   ;;  %v8736_v15 = vld [vmem:[%s13286_s2 + $0x90] ss:$24 sps:$4 sm:$0xff]   ;;  %v8738_v17 = vld [vmem:[%s13286_s2 + $0xc4] ss:$24 sps:$4 sm:$0xff]  }
   0x6   :  { %v8734_v14 = vld [vmem:[%s13286_s2 + $0x9c] ss:$24 sps:$4 sm:$0xff]   ;;  %v8737_v16 = vld [vmem:[%s13286_s2 + $0x98] ss:$24 sps:$4 sm:$0xff]   ;;  %v8740_v18 = vld [vmem:[%s13286_s2 + $0xcc] ss:$24 sps:$4 sm:$0xff]  }
   0x7   :  { %v8742_v19 = vld [vmem:[%s13286_s2 + $0xc0] ss:$24 sps:$4 sm:$0xff]   ;;  %v8744_v21 = vld [vmem:[%s13286_s2 + $0xf4] ss:$24 sps:$4 sm:$0xff]   ;;  %v8748_v23 = vld [vmem:[%s13286_s2 + $0xf0] ss:$24 sps:$4 sm:$0xff]  }
   0x8   :  { %377 = vmatpush1.bf16.msra.mxu0 %v8724_v7  ;;  %450 = vmatpush1.bf16.msra.mxu1 %v8725_v8  ;;  %v8743_v20 = vld [vmem:[%s13286_s2 + $0xc8] ss:$24 sps:$4 sm:$0xff]   ;;  %v8746_v22 = vld [vmem:[%s13286_s2 + $0xfc] ss:$24 sps:$4 sm:$0xff]   ;;  %v8749_v24 = vld [vmem:[%s13286_s2 + $0xf8] ss:$24 sps:$4 sm:$0xff]  }
   0x9   :  { %378 = vmatprep.subr.bf16.mxu0 %v8726_v9  ;;  %451 = vmatprep.subr.bf16.mxu1 %v8728_v10  ;;  %v8750_v25 = vld [vmem:[%s13286_s2 + $0x124] ss:$24 sps:$4 sm:$0xff]   ;;  %v8754_v27 = vld [vmem:[%s13286_s2 + $0x120] ss:$24 sps:$4 sm:$0xff]   ;;  %v8756_v29 = vld [vmem:[%s13286_s2 + $0x154] ss:$24 sps:$4 sm:$0xff]  }
   0xa   :  { %v8752_v26 = vld [vmem:[%s13286_s2 + $0x12c] ss:$24 sps:$4 sm:$0xff]   ;;  %v8755_v28 = vld [vmem:[%s13286_s2 + $0x128] ss:$24 sps:$4 sm:$0xff]   ;;  %v8758_v30 = vld [vmem:[%s13286_s2 + $0x15c] ss:$24 sps:$4 sm:$0xff]  }
   0xb   :  { %v8760_v31 = vld [vmem:[%s13286_s2 + $0x150] ss:$24 sps:$4 sm:$0xff]   ;;  %v42_v33 = vld [vmem:[%s13288_s0] sm:$0xff]  ;;  %v8764_v35 = vld [vmem:[%s13286_s2 + $0x14] ss:$24 sps:$4 sm:$0xff]  }
   0xc   :  { %379 = vmatpush1.bf16.msra.mxu0 %v8730_v11  ;;  %452 = vmatpush1.bf16.msra.mxu1 %v8731_v12  ;;  %v8761_v32 = vld [vmem:[%s13286_s2 + $0x158] ss:$24 sps:$4 sm:$0xff]   ;;  %v43_v34 = vld [vmem:[%s13288_s0 + $0x8] sm:$0xff]  ;;  %v8767_v36 = vld [vmem:[%s13287_s4 + $0x4] ss:$24 sps:$4 sm:$0xff]  }
   0xd   :  { %380 = vmatprep.subr.bf16.mxu0 %v8732_v13  ;;  %453 = vmatprep.subr.bf16.mxu1 %v8734_v14  ;;  %v9925_v37 = vpack.c.bf16 %v43_v34, %v42_v33  ;;  %v8762_v38 = vld [vmem:[%s13286_s2 + $0x10] ss:$24 sps:$4 sm:$0xff]   ;;  %v8765_v39 = vld [vmem:[%s13287_s4] ss:$24 sps:$4 sm:$0xff]   ;;  %v8770_v40 = vld [vmem:[%s13286_s2 + $0x44] ss:$24 sps:$4 sm:$0xff]  }
   0xe   :  { %v8773_v41 = vld [vmem:[%s13287_s4 + $0x34] ss:$24 sps:$4 sm:$0xff]   ;;  %v8768_v42 = vld [vmem:[%s13286_s2 + $0x40] ss:$24 sps:$4 sm:$0xff]   ;;  %v8771_v43 = vld [vmem:[%s13287_s4 + $0x30] ss:$24 sps:$4 sm:$0xff]  }
   0xf   :  { %v44_v44 = vld [vmem:[%s13288_s0 + $0x10] sm:$0xff]  ;;  %v45_v45 = vld [vmem:[%s13288_s0 + $0x18] sm:$0xff]  ;;  %v46_v55 = vld [vmem:[%s13288_s0 + $0x20] sm:$0xff] }
  0x10   :  { %381 = vmatpush1.bf16.msra.mxu0 %v8736_v15  ;;  %454 = vmatpush1.bf16.msra.mxu1 %v8737_v16  ;;  %v8776_v46 = vld [vmem:[%s13286_s2 + $0x74] ss:$24 sps:$4 sm:$0xff]   ;;  %v8779_v47 = vld [vmem:[%s13287_s4 + $0x64] ss:$24 sps:$4 sm:$0xff]   ;;  %v9961_v48 = vpack.c.bf16 %v45_v45, %v44_v44  ;;  %v8774_v49 = vld [vmem:[%s13286_s2 + $0x70] ss:$24 sps:$4 sm:$0xff]  }
  0x11   :  { %382 = vmatprep.subr.bf16.mxu0 %v8738_v17  ;;  %455 = vmatprep.subr.bf16.mxu1 %v8740_v18  ;;  %v8777_v50 = vld [vmem:[%s13287_s4 + $0x60] ss:$24 sps:$4 sm:$0xff]   ;;  %v8782_v51 = vld [vmem:[%s13286_s2 + $0xa4] ss:$24 sps:$4 sm:$0xff]   ;;  %v8785_v52 = vld [vmem:[%s13287_s4 + $0x94] ss:$24 sps:$4 sm:$0xff]  }
  0x12   :  { %v8780_v53 = vld [vmem:[%s13286_s2 + $0xa0] ss:$24 sps:$4 sm:$0xff]   ;;  %v8783_v54 = vld [vmem:[%s13287_s4 + $0x90] ss:$24 sps:$4 sm:$0xff]   ;;  %v8788_v57 = vld [vmem:[%s13286_s2 + $0xd4] ss:$24 sps:$4 sm:$0xff]  }
  0x13   :  { %v47_v56 = vld [vmem:[%s13288_s0 + $0x28] sm:$0xff]  ;;  %v8791_v58 = vld [vmem:[%s13287_s4 + $0xc4] ss:$24 sps:$4 sm:$0xff]   ;;  %v8789_v61 = vld [vmem:[%s13287_s4 + $0xc0] ss:$24 sps:$4 sm:$0xff]  }
  0x14   :  { %383 = vmatpush1.bf16.msra.mxu0 %v8742_v19  ;;  %456 = vmatpush1.bf16.msra.mxu1 %v8743_v20  ;;  %v9997_v59 = vpack.c.bf16 %v47_v56, %v46_v55  ;;  %v8786_v60 = vld [vmem:[%s13286_s2 + $0xd0] ss:$24 sps:$4 sm:$0xff]   ;;  %v8794_v62 = vld [vmem:[%s13286_s2 + $0x104] ss:$24 sps:$4 sm:$0xff]   ;;  %v8797_v63 = vld [vmem:[%s13287_s4 + $0xf4] ss:$24 sps:$4 sm:$0xff]  }
  0x15   :  { %384 = vmatprep.subr.bf16.mxu0 %v8744_v21  ;;  %457 = vmatprep.subr.bf16.mxu1 %v8746_v22  ;;  %v8792_v0 = vld [vmem:[%s13286_s2 + $0x100] ss:$24 sps:$4 sm:$0xff]   ;;  %v8795_v2 = vld [vmem:[%s13287_s4 + $0xf0] ss:$24 sps:$4 sm:$0xff]   ;;  %v8800_v5 = vld [vmem:[%s13286_s2 + $0x134] ss:$24 sps:$4 sm:$0xff]  }
  0x16   :  { %v48_v3 = vld [vmem:[%s13288_s0 + $0x30] sm:$0xff]  ;;  %v49_v4 = vld [vmem:[%s13288_s0 + $0x38] sm:$0xff]  ;;  %v10061_v15 = vld [vmem:[%s13287_s4 + $0xc] ss:$24 sps:$4 sm:$0xff]  }
  0x17   :  { %v8803_v6 = vld [vmem:[%s13287_s4 + $0x124] ss:$24 sps:$4 sm:$0xff]   ;;  %v10033_v7 = vpack.c.bf16 %v49_v4, %v48_v3  ;;  %v8798_v8 = vld [vmem:[%s13286_s2 + $0x130] ss:$24 sps:$4 sm:$0xff]   ;;  %v8801_v9 = vld [vmem:[%s13287_s4 + $0x120] ss:$24 sps:$4 sm:$0xff]  }
  0x18   :  { %385 = vmatpush1.bf16.msra.mxu0 %v8748_v23  ;;  %458 = vmatpush1.bf16.msra.mxu1 %v8749_v24  ;;  %v8806_v10 = vld [vmem:[%s13286_s2 + $0x164] ss:$24 sps:$4 sm:$0xff]   ;;  %v8809_v11 = vld [vmem:[%s13287_s4 + $0x154] ss:$24 sps:$4 sm:$0xff]   ;;  %v8804_v12 = vld [vmem:[%s13286_s2 + $0x160] ss:$24 sps:$4 sm:$0xff]  }
  0x19   :  { %386 = vmatprep.subr.bf16.mxu0 %v8750_v25  ;;  %459 = vmatprep.subr.bf16.mxu1 %v8752_v26  ;;  %v8807_v13 = vld [vmem:[%s13287_s4 + $0x150] ss:$24 sps:$4 sm:$0xff]   ;;  %v8812_v14 = vld [vmem:[%s13287_s4 + $0x184] ss:$24 sps:$4 sm:$0xff]   ;;  %v8810_v16 = vld [vmem:[%s13287_s4 + $0x180] ss:$24 sps:$4 sm:$0xff]  }
  0x1a   :  { %v10071_v17 = vld [vmem:[%s13287_s4 + $0x8] ss:$24 sps:$4 sm:$0xff]   ;;  %v8818_v18 = vld [vmem:[%s13287_s4 + $0x1b4] ss:$24 sps:$4 sm:$0xff]   ;;  %v10089_v21 = vld [vmem:[%s13287_s4 + $0x38] ss:$24 sps:$4 sm:$0xff]  }
  0x1b   :  { %v10080_v19 = vld [vmem:[%s13287_s4 + $0x3c] ss:$24 sps:$4 sm:$0xff]   ;;  %v8816_v20 = vld [vmem:[%s13287_s4 + $0x1b0] ss:$24 sps:$4 sm:$0xff]   ;;  %v10099_v23 = vld [vmem:[%s13287_s4 + $0x6c] ss:$24 sps:$4 sm:$0xff]  }
  0x1c   :  { %387 = vmatpush1.bf16.msra.mxu0 %v8754_v27  ;;  %460 = vmatpush1.bf16.msra.mxu1 %v8755_v28  ;;  %v8824_v22 = vld [vmem:[%s13287_s4 + $0x1e4] ss:$24 sps:$4 sm:$0xff]   ;;  %v8822_v24 = vld [vmem:[%s13287_s4 + $0x1e0] ss:$24 sps:$4 sm:$0xff]   ;;  %v8830_v26 = vld [vmem:[%s13287_s4 + $0x214] ss:$24 sps:$4 sm:$0xff]  }
  0x1d   :  { %388 = vmatprep.subr.bf16.mxu0 %v8756_v29  ;;  %461 = vmatprep.subr.bf16.mxu1 %v8758_v30  ;;  %v10108_v25 = vld [vmem:[%s13287_s4 + $0x68] ss:$24 sps:$4 sm:$0xff]   ;;  %v10118_v27 = vld [vmem:[%s13287_s4 + $0x9c] ss:$24 sps:$4 sm:$0xff]   ;;  %v10127_v29 = vld [vmem:[%s13287_s4 + $0x98] ss:$24 sps:$4 sm:$0xff]  }
  0x1e   :  { %v8828_v28 = vld [vmem:[%s13287_s4 + $0x210] ss:$24 sps:$4 sm:$0xff]   ;;  %v8836_v30 = vld [vmem:[%s13287_s4 + $0x244] ss:$24 sps:$4 sm:$0xff]   ;;  %v8842_v34 = vld [vmem:[%s13287_s4 + $0x274] ss:$24 sps:$4 sm:$0xff]  }
  0x1f   :  { %v10146_v33 = vld [vmem:[%s13287_s4 + $0xc8] ss:$24 sps:$4 sm:$0xff]   ;;  %v10203_v45 = vld [vmem:[%s13287_s4 + $0x158] ss:$24 sps:$4 sm:$0xff]   ;;  %v10251_v55 = vld [vmem:[%s13287_s4 + $0x1ec] ss:$24 sps:$4 sm:$0xff]  }
  0x20   :  { %389 = vmatpush1.bf16.msra.mxu0 %v8760_v31  ;;  %462 = vmatpush1.bf16.msra.mxu1 %v8761_v32  ;;  %v10137_v31 = vld [vmem:[%s13287_s4 + $0xcc] ss:$24 sps:$4 sm:$0xff]   ;;  %v8834_v32 = vld [vmem:[%s13287_s4 + $0x240] ss:$24 sps:$4 sm:$0xff]   ;;  %v8852_v44 = vld [vmem:[%s13287_s4 + $0x2d0] ss:$24 sps:$4 sm:$0xff]  }
  0x21   :  { %520 = vmatprep.subr.bf16.mxu0 %v8764_v35  ;;  %1396 = vmatprep.subr.bf16.mxu1 %v8767_v36  ;;  %v10156_v35 = vld [vmem:[%s13287_s4 + $0xfc] ss:$24 sps:$4 sm:$0xff]   ;;  %v8840_v36 = vld [vmem:[%s13287_s4 + $0x270] ss:$24 sps:$4 sm:$0xff]  }
  0x22   :  { %v8875_v56 = vld [vmem:[%s13287_s4 + $0x74] ss:$24 sps:$4 sm:$0xff]   ;;  %v10302_v4 = vld [vmem:[%s13287_s4 + $0x248] ss:$24 sps:$4 sm:$0xff]  }
  0x23   :  { %407 = vmatmul.mubr.bf16.vlgmr.msra.gmra.mrb[0].mxu0 %v9925_v37  ;;  %480 = vmatmul.mubr.bf16.vlgmr.msra.gmra.mrb[0].mxu1 %v9925_v37  ;;  %v8887_v3 = vld [vmem:[%s13287_s4 + $0xd4] ss:$24 sps:$4 sm:$0xff]  }
  0x24   :  { %521 = vmatpush1.bf16.msra.mxu0 %v8762_v38  ;;  %1397 = vmatpush1.bf16.msra.mxu1 %v8765_v39  ;;  %v8848_v38 = vld [vmem:[%s13287_s4 + $0x2a4] ss:$24 sps:$4 sm:$0xff]  }
  0x25   :  { %522 = vmatprep.subr.bf16.mxu0 %v8770_v40  ;;  %1398 = vmatprep.subr.bf16.mxu1 %v8773_v41  ;;  %v10175_v39 = vld [vmem:[%s13287_s4 + $0x12c] ss:$24 sps:$4 sm:$0xff]   ;;  %v8846_v40 = vld [vmem:[%s13287_s4 + $0x2a0] ss:$24 sps:$4 sm:$0xff]  }
  0x26   :  { %416 = vmatprep.mubr.bf16.mxu0 %v9745_v1  ;;  %489 = vmatprep.mubr.bf16.mxu1 %v9745_v1  ;;  %v10184_v41 = vld [vmem:[%s13287_s4 + $0x128] ss:$24 sps:$4 sm:$0xff]  }
  0x28   :  { %523 = vmatpush1.bf16.msra.mxu0 %v8768_v42  ;;  %1399 = vmatpush1.bf16.msra.mxu1 %v8771_v43  ;;  %v8854_v42 = vld [vmem:[%s13287_s4 + $0x2d4] ss:$24 sps:$4 sm:$0xff]  }
  0x29   :  { %524 = vmatprep.subr.bf16.mxu0 %v8776_v46  ;;  %1400 = vmatprep.subr.bf16.mxu1 %v8779_v47  ;;  %v10194_v43 = vld [vmem:[%s13287_s4 + $0x15c] ss:$24 sps:$4 sm:$0xff]   ;;  %v10209_v46 = vld [vmem:[%s13287_s4 + $0x18c] ss:$24 sps:$4 sm:$0xff]  }
  0x2a   :  { %v8863_v47 = vld [vmem:[%s13287_s4 + $0x14] ss:$24 sps:$4 sm:$0xff]  }
  0x2b   :  { %417 = vmatmul.mubr.bf16.gmra.mrb[4].mxu0 %v9961_v48  ;;  %490 = vmatmul.mubr.bf16.gmra.mrb[4].mxu1 %v9961_v48 }
  0x2c   :  { %525 = vmatpush1.bf16.msra.mxu0 %v8774_v49  ;;  %1401 = vmatpush1.bf16.msra.mxu1 %v8777_v50  ;;  %v8861_v49 = vld [vmem:[%s13287_s4 + $0x10] ss:$24 sps:$4 sm:$0xff]   ;;  %v10228_v50 = vld [vmem:[%s13287_s4 + $0x1bc] ss:$24 sps:$4 sm:$0xff]  }
  0x2d   :  { %526 = vmatprep.subr.bf16.mxu0 %v8782_v51  ;;  %1402 = vmatprep.subr.bf16.mxu1 %v8785_v52  ;;  %v8869_v51 = vld [vmem:[%s13287_s4 + $0x44] ss:$24 sps:$4 sm:$0xff]   ;;  %v10237_v52 = vld [vmem:[%s13287_s4 + $0x1b8] ss:$24 sps:$4 sm:$0xff]  }
  0x2e   :  { %426 = vmatprep.mubr.bf16.mxu0 %v9745_v1  ;;  %499 = vmatprep.mubr.bf16.mxu1 %v9745_v1 }
  0x30   :  { %527 = vmatpush1.bf16.msra.mxu0 %v8780_v53  ;;  %1403 = vmatpush1.bf16.msra.mxu1 %v8783_v54  ;;  %v8867_v53 = vld [vmem:[%s13287_s4 + $0x40] ss:$24 sps:$4 sm:$0xff]  }
  0x31   :  { %528 = vmatprep.subr.bf16.mxu0 %v8788_v57  ;;  %1404 = vmatprep.subr.bf16.mxu1 %v8791_v58  ;;  %v10245_v54 = vld [vmem:[%s13289_s1] sm:$0xff] }
  0x32   :  { %vm817_vm0 = vcmp.gt.s32.totalorder %v10245_v54, 7  ;;  %vm810_vm1 = vcmp.gt.s32.totalorder %v10245_v54, 0  ;;  %v10264_v58 = vld [vmem:[%s13287_s4 + $0x1e8] ss:$24 sps:$4 sm:$0xff]   ;;  %vm815_vm2 = vcmp.gt.s32.totalorder %v10245_v54, 5  ;;  %vm814_vm3 = vcmp.gt.s32.totalorder %v10245_v54, 4 }
  0x33   :  { %427 = vmatmul.mubr.bf16.gmra.mrb[8].mxu0 %v9997_v59  ;;  %500 = vmatmul.mubr.bf16.gmra.mrb[8].mxu1 %v9997_v59  ;;  %v1593_v57 = vsel %vm817_vm0, 1, %v9745_v1  ;;  %v10542_v54 = vld [vmem:[%s13287_s4 + $0x120] ss:$24 sps:$4 sm:$0xff]  }
  0x34   :  { %529 = vmatpush1.bf16.msra.mxu0 %v8786_v60  ;;  %1405 = vmatpush1.bf16.msra.mxu1 %v8789_v61  ;;  %v10273_v60 = vld [vmem:[%s13287_s4 + $0x21c] ss:$24 sps:$4 sm:$0xff]  }
  0x35   :  { %530 = vmatprep.subr.bf16.mxu0 %v8794_v62  ;;  %1406 = vmatprep.subr.bf16.mxu1 %v8797_v63  ;;  %v8881_v61 = vld [vmem:[%s13287_s4 + $0xa4] ss:$24 sps:$4 sm:$0xff]   ;;  %v1586_v62 = vsel %vm810_vm1, 1, %v9745_v1  ;;  %v10284_v63 = vld [vmem:[%s13287_s4 + $0x218] ss:$24 sps:$4 sm:$0xff]  }
  0x36   :  { %436 = vmatprep.mubr.bf16.mxu0 %v9745_v1  ;;  %509 = vmatprep.mubr.bf16.mxu1 %v9745_v1 }
  0x37   :  { %1595 = vperm.xlu0 %8712, %v1593_v57   ;;  %v8927_v57 = vld [vmem:[%s13287_s4 + $0x2e0] ss:$24 sps:$4 sm:$0xff]  }
  0x38   :  { %531 = vmatpush1.bf16.msra.mxu0 %v8792_v0  ;;  %1407 = vmatpush1.bf16.msra.mxu1 %v8795_v2  ;;  %v8879_v0 = vld [vmem:[%s13287_s4 + $0xa0] ss:$24 sps:$4 sm:$0xff]   ;;  %v10292_v2 = vld [vmem:[%s13287_s4 + $0x24c] ss:$24 sps:$4 sm:$0xff]  }
  0x39   :  { %532 = vmatprep.subr.bf16.mxu0 %v8800_v5  ;;  %1408 = vmatprep.subr.bf16.mxu1 %v8803_v6  ;;  %v8885_v5 = vld [vmem:[%s13287_s4 + $0xd0] ss:$24 sps:$4 sm:$0xff]   ;;  %v10310_v6 = vld [vmem:[%s13287_s4 + $0x27c] ss:$24 sps:$4 sm:$0xff]  }
  0x3b   :  { %437 = vmatmul.mubr.bf16.gmra.mrb[12].mxu0 %v10033_v7  ;;  %510 = vmatmul.mubr.bf16.gmra.mrb[12].mxu1 %v10033_v7 }
  0x3c   :  { %533 = vmatpush1.bf16.msra.mxu0 %v8798_v8  ;;  %1409 = vmatpush1.bf16.msra.mxu1 %v8801_v9  ;;  %v10320_v8 = vld [vmem:[%s13287_s4 + $0x278] ss:$24 sps:$4 sm:$0xff]  }
  0x3d   :  { %534 = vmatprep.subr.bf16.mxu0 %v8806_v10  ;;  %1410 = vmatprep.subr.bf16.mxu1 %v8809_v11  ;;  %v8891_v9 = vld [vmem:[%s13287_s4 + $0x100] ss:$24 sps:$4 sm:$0xff]   ;;  %v10328_v10 = vld [vmem:[%s13287_s4 + $0x2ac] ss:$24 sps:$4 sm:$0xff]  }
  0x3e   :  { %552 = vmatprep.mubr.bf16.mxu0 %v9745_v1  ;;  %1428 = vmatprep.mubr.bf16.mxu1 %v9745_v1  ;;  %v8899_v11 = vld [vmem:[%s13287_s4 + $0x134] ss:$24 sps:$4 sm:$0xff]  }
  0x3f   :  { %1588 = vperm.xlu0 %8712, %v1586_v62  }
  0x40   :  { %535 = vmatpush1.bf16.msra.mxu0 %v8804_v12  ;;  %1411 = vmatpush1.bf16.msra.mxu1 %v8807_v13  ;;  %v10338_v12 = vld [vmem:[%s13287_s4 + $0x2a8] ss:$24 sps:$4 sm:$0xff]  }
  0x41   :  { %1412 = vmatprep.subr.bf16.mxu1 %v8812_v14  ;;  %1437 = vmatprep.subr.bf16.mxu0 %v10061_v15  ;;  %v8897_v13 = vld [vmem:[%s13287_s4 + $0x130] ss:$24 sps:$4 sm:$0xff]   ;;  %v10346_v14 = vld [vmem:[%s13287_s4 + $0x2dc] ss:$24 sps:$4 sm:$0xff]  }
  0x43   :  { %553 = vmatmul.mubr.bf16.vlgmr.msra.gmra.mrb[16].mxu0 %v9925_v37  ;;  %v10165_v37 = vld [vmem:[%s13287_s4 + $0xf8] ss:$24 sps:$4 sm:$0xff]  }
  0x44   :  { %1413 = vmatpush1.bf16.msra.mxu1 %v8810_v16  ;;  %1438 = vmatpush1.bf16.msra.mxu0 %v10071_v17  ;;  %v8905_v16 = vld [vmem:[%s13287_s4 + $0x164] ss:$24 sps:$4 sm:$0xff]  }
  0x45   :  { %1414 = vmatprep.subr.bf16.mxu1 %v8818_v18  ;;  %1439 = vmatprep.subr.bf16.mxu0 %v10080_v19  ;;  %v10356_v18 = vld [vmem:[%s13287_s4 + $0x2d8] ss:$24 sps:$4 sm:$0xff]  }
  0x46   :  { %562 = vmatprep.mubr.bf16.mxu0 %v9745_v1 }
  0x48   :  { %1415 = vmatpush1.bf16.msra.mxu1 %v8816_v20  ;;  %1440 = vmatpush1.bf16.msra.mxu0 %v10089_v21  ;;  %v8903_v20 = vld [vmem:[%s13287_s4 + $0x160] ss:$24 sps:$4 sm:$0xff]  }
  0x49   :  { %1416 = vmatprep.subr.bf16.mxu1 %v8824_v22  ;;  %1441 = vmatprep.subr.bf16.mxu0 %v10099_v23  ;;  %v8908_v22 = vld [vmem:[%s13287_s4 + $0x194] ss:$24 sps:$4 sm:$0xff]  }
  0x4b   :  { %563 = vmatmul.mubr.bf16.gmra.mrb[20].mxu0 %v9961_v48  ;;  %v10219_v48 = vld [vmem:[%s13287_s4 + $0x188] ss:$24 sps:$4 sm:$0xff]  }
  0x4c   :  { %1417 = vmatpush1.bf16.msra.mxu1 %v8822_v24  ;;  %1442 = vmatpush1.bf16.msra.mxu0 %v10108_v25  ;;  %v8906_v24 = vld [vmem:[%s13287_s4 + $0x190] ss:$24 sps:$4 sm:$0xff]  }
  0x4d   :  { %1418 = vmatprep.subr.bf16.mxu1 %v8830_v26  ;;  %1443 = vmatprep.subr.bf16.mxu0 %v10118_v27  ;;  %v8911_v26 = vld [vmem:[%s13287_s4 + $0x1c4] ss:$24 sps:$4 sm:$0xff]  }
  0x4e   :  { %572 = vmatprep.mubr.bf16.mxu0 %v9745_v1 }
  0x50   :  { %1419 = vmatpush1.bf16.msra.mxu1 %v8828_v28  ;;  %1444 = vmatpush1.bf16.msra.mxu0 %v10127_v29  ;;  %v8909_v28 = vld [vmem:[%s13287_s4 + $0x1c0] ss:$24 sps:$4 sm:$0xff]  }
  0x51   :  { %1420 = vmatprep.subr.bf16.mxu1 %v8836_v30  ;;  %1445 = vmatprep.subr.bf16.mxu0 %v10137_v31  ;;  %v8914_v30 = vld [vmem:[%s13287_s4 + $0x1f4] ss:$24 sps:$4 sm:$0xff]  }
  0x53   :  { %573 = vmatmul.mubr.bf16.gmra.mrb[24].mxu0 %v9997_v59  ;;  %v8873_v59 = vld [vmem:[%s13287_s4 + $0x70] ss:$24 sps:$4 sm:$0xff]  }
  0x54   :  { %1421 = vmatpush1.bf16.msra.mxu1 %v8834_v32  ;;  %1446 = vmatpush1.bf16.msra.mxu0 %v10146_v33  ;;  %v8912_v32 = vld [vmem:[%s13287_s4 + $0x1f0] ss:$24 sps:$4 sm:$0xff]  }
  0x55   :  { %1422 = vmatprep.subr.bf16.mxu1 %v8842_v34  ;;  %1447 = vmatprep.subr.bf16.mxu0 %v10156_v35  ;;  %v8917_v34 = vld [vmem:[%s13287_s4 + $0x224] ss:$24 sps:$4 sm:$0xff]  }
  0x56   :  { %582 = vmatprep.mubr.bf16.mxu0 %v9745_v1 }
  0x58   :  { %1423 = vmatpush1.bf16.msra.mxu1 %v8840_v36  ;;  %1448 = vmatpush1.bf16.msra.mxu0 %v10165_v37  ;;  %v8915_v36 = vld [vmem:[%s13287_s4 + $0x220] ss:$24 sps:$4 sm:$0xff]  }
  0x59   :  { %1424 = vmatprep.subr.bf16.mxu1 %v8848_v38  ;;  %1449 = vmatprep.subr.bf16.mxu0 %v10175_v39  ;;  %v8920_v38 = vld [vmem:[%s13287_s4 + $0x254] ss:$24 sps:$4 sm:$0xff]  }
  0x5b   :  { %583 = vmatmul.mubr.bf16.gmra.mrb[28].mxu0 %v10033_v7  ;;  %v8893_v7 = vld [vmem:[%s13287_s4 + $0x104] ss:$24 sps:$4 sm:$0xff]  }
  0x5c   :  { %1425 = vmatpush1.bf16.msra.mxu1 %v8846_v40  ;;  %1450 = vmatpush1.bf16.msra.mxu0 %v10184_v41  ;;  %v8918_v40 = vld [vmem:[%s13287_s4 + $0x250] ss:$24 sps:$4 sm:$0xff]  }
  0x5d   :  { %1426 = vmatprep.subr.bf16.mxu1 %v8854_v42  ;;  %1451 = vmatprep.subr.bf16.mxu0 %v10194_v43  ;;  %v8923_v42 = vld [vmem:[%s13287_s4 + $0x284] ss:$24 sps:$4 sm:$0xff]  }
  0x5e   :  { %1469 = vmatprep.mubr.bf16.mxu0 %v9745_v1 }
  0x60   :  { %1427 = vmatpush1.bf16.msra.mxu1 %v8852_v44  ;;  %1452 = vmatpush1.bf16.msra.mxu0 %v10203_v45  ;;  %v3141_v44 = vsel %vm815_vm2, 1, %v9745_v1  ;;  %vm9747_vm2 = vmmov 0  }
  0x61   :  { %1453 = vmatprep.subr.bf16.mxu0 %v10209_v46  ;;  %1478 = vmatprep.subr.bf16.mxu1 %v8863_v47  ;;  %v8921_v47 = vld [vmem:[%s13287_s4 + $0x280] ss:$24 sps:$4 sm:$0xff]  }
  0x62   :  { %3143 = vperm.xlu0 %8712, %v3141_v44  }
  0x63   :  { %1429 = vmatmul.mubr.bf16.vlgmr.msra.gmra.mrb[16].mxu1 %v9745_v1 }
  0x64   :  { %1454 = vmatpush1.bf16.msra.mxu0 %v10219_v48  ;;  %1479 = vmatpush1.bf16.msra.mxu1 %v8861_v49  ;;  %v8926_v49 = vld [vmem:[%s13287_s4 + $0x2b4] ss:$24 sps:$4 sm:$0xff]  }
  0x65   :  { %1455 = vmatprep.subr.bf16.mxu0 %v10228_v50  ;;  %1480 = vmatprep.subr.bf16.mxu1 %v8869_v51  ;;  %v3916_v51 = vsel %vm814_vm3, 1, %v9745_v1 }
  0x66   :  { %1510 = vmatprep.mubr.bf16.mxu1 %v9745_v1  ;;  %3918 = vperm.xlu0 %8712, %v3916_v51  }
  0x68   :  { %1456 = vmatpush1.bf16.msra.mxu0 %v10237_v52  ;;  %1481 = vmatpush1.bf16.msra.mxu1 %v8867_v53  ;;  %v8924_v53 = vld [vmem:[%s13287_s4 + $0x2b0] ss:$24 sps:$4 sm:$0xff]  }
  0x69   :  { %1457 = vmatprep.subr.bf16.mxu0 %v10251_v55  ;;  %1482 = vmatprep.subr.bf16.mxu1 %v8875_v56  ;;  %v8929_v56 = vld [vmem:[%s13287_s4 + $0x2e4] ss:$24 sps:$4 sm:$0xff]  }
  0x6c   :  { %1458 = vmatpush1.bf16.msra.mxu0 %v10264_v58  ;;  %1483 = vmatpush1.bf16.msra.mxu1 %v8873_v59 }
  0x6d   :  { %1459 = vmatprep.subr.bf16.mxu0 %v10273_v60  ;;  %1484 = vmatprep.subr.bf16.mxu1 %v8881_v61  ;;  %v10563_v61 = vld [vmem:[%s13287_s4 + $0x154] ss:$24 sps:$4 sm:$0xff]  }
  0x70   :  { %1460 = vmatpush1.bf16.msra.mxu0 %v10284_v63  ;;  %1485 = vmatpush1.bf16.msra.mxu1 %v8879_v0  ;;  %v10568_v0 = vld [vmem:[%s13287_s4 + $0x150] ss:$24 sps:$4 sm:$0xff]  }
  0x71   :  { %1461 = vmatprep.subr.bf16.mxu0 %v10292_v2  ;;  %1486 = vmatprep.subr.bf16.mxu1 %v8887_v3 }
  0x74   :  { %1462 = vmatpush1.bf16.msra.mxu0 %v10302_v4  ;;  %1487 = vmatpush1.bf16.msra.mxu1 %v8885_v5 }
  0x75   :  { %1463 = vmatprep.subr.bf16.mxu0 %v10310_v6  ;;  %1488 = vmatprep.subr.bf16.mxu1 %v8893_v7 }
  0x78   :  { %1464 = vmatpush1.bf16.msra.mxu0 %v10320_v8  ;;  %1489 = vmatpush1.bf16.msra.mxu1 %v8891_v9 }
  0x79   :  { %1465 = vmatprep.subr.bf16.mxu0 %v10328_v10  ;;  %1490 = vmatprep.subr.bf16.mxu1 %v8899_v11 }
  0x7c   :  { %1466 = vmatpush1.bf16.msra.mxu0 %v10338_v12  ;;  %1491 = vmatpush1.bf16.msra.mxu1 %v8897_v13 }
  0x7d   :  { %1467 = vmatprep.subr.bf16.mxu0 %v10346_v14  ;;  %1492 = vmatprep.subr.bf16.mxu1 %v8905_v16 }
  0x80   :  { %1468 = vmatpush1.bf16.msra.mxu0 %v10356_v18  ;;  %1493 = vmatpush1.bf16.msra.mxu1 %v8903_v20 }
  0x81   :  { %1494 = vmatprep.subr.bf16.mxu1 %v8908_v22 }
  0x83   :  { %1470 = vmatmul.mubr.bf16.vlgmr.msra.gmra.mrb[32].mxu0 %v9745_v1 }
  0x84   :  { %1495 = vmatpush1.bf16.msra.mxu1 %v8906_v24  ;;  %v10590_v24 = vld [vmem:[%s13287_s4 + $0x180] ss:$24 sps:$4 sm:$0xff]  }
  0x85   :  { %1496 = vmatprep.subr.bf16.mxu1 %v8911_v26 }
  0x88   :  { %1497 = vmatpush1.bf16.msra.mxu1 %v8909_v28 }
  0x89   :  { %1498 = vmatprep.subr.bf16.mxu1 %v8914_v30  ;;  %v10597_v30 = vld [vmem:[%s13287_s4 + $0x1b4] ss:$24 sps:$4 sm:$0xff]  }
  0x8c   :  { %1499 = vmatpush1.bf16.msra.mxu1 %v8912_v32 }
  0x8d   :  { %1500 = vmatprep.subr.bf16.mxu1 %v8917_v34 }
  0x90   :  { %1501 = vmatpush1.bf16.msra.mxu1 %v8915_v36  ;;  %v10602_v36 = vld [vmem:[%s13287_s4 + $0x1b0] ss:$24 sps:$4 sm:$0xff]  }
  0x91   :  { %1502 = vmatprep.subr.bf16.mxu1 %v8920_v38 }
  0x94   :  { %1503 = vmatpush1.bf16.msra.mxu1 %v8918_v40 }
  0x95   :  { %1504 = vmatprep.subr.bf16.mxu1 %v8923_v42 }
  0x98   :  { %1505 = vmatpush1.bf16.msra.mxu1 %v8921_v47 }
  0x99   :  { %1506 = vmatprep.subr.bf16.mxu1 %v8926_v49 }
  0x9c   :  { %1507 = vmatpush1.bf16.msra.mxu1 %v8924_v53 }
  0x9d   :  { %1508 = vmatprep.subr.bf16.mxu1 %v8929_v56 }
  0xa0   :  { %1509 = vmatpush1.bf16.msra.mxu1 %v8927_v57 }
  0xa1   :  { %2220 = vmatprep.subr.bf16.mxu1 %v10061_v15  ;;  %v8932_v15 = vld [vmem:[%s13287_s4 + $0x4] ss:$24 sps:$4 sm:$0xff]  }
  0xa2   :  { %2179 = vmatprep.subr.bf16.mxu0 %v8932_v15 }
  0xa3   :  { %1511 = vmatmul.mubr.bf16.vlgmr.msra.gmra.mrb[20].mxu1 %v9745_v1 }
  0xa4   :  { %2221 = vmatpush1.bf16.msra.mxu1 %v10071_v17  ;;  %v10453_v17 = vld [vmem:[%s13287_s4] ss:$24 sps:$4 sm:$0xff]  }
  0xa5   :  { %2222 = vmatprep.subr.bf16.mxu1 %v10080_v19  ;;  %2180 = vmatpush1.bf16.msra.mxu0 %v10453_v17  ;;  %v10460_v19 = vld [vmem:[%s13287_s4 + $0x34] ss:$24 sps:$4 sm:$0xff]  }
  0xa6   :  { %2181 = vmatprep.subr.bf16.mxu0 %v10460_v19 }
  0xa8   :  { %2223 = vmatpush1.bf16.msra.mxu1 %v10089_v21  ;;  %v10466_v21 = vld [vmem:[%s13287_s4 + $0x30] ss:$24 sps:$4 sm:$0xff]  }
  0xa9   :  { %2224 = vmatprep.subr.bf16.mxu1 %v10099_v23  ;;  %2182 = vmatpush1.bf16.msra.mxu0 %v10466_v21  ;;  %v10474_v23 = vld [vmem:[%s13287_s4 + $0x64] ss:$24 sps:$4 sm:$0xff]  }
  0xaa   :  { %2183 = vmatprep.subr.bf16.mxu0 %v10474_v23 }
  0xac   :  { %2225 = vmatpush1.bf16.msra.mxu1 %v10108_v25  ;;  %v10479_v25 = vld [vmem:[%s13287_s4 + $0x60] ss:$24 sps:$4 sm:$0xff]  }
  0xad   :  { %2226 = vmatprep.subr.bf16.mxu1 %v10118_v27  ;;  %2184 = vmatpush1.bf16.msra.mxu0 %v10479_v25  ;;  %v10486_v27 = vld [vmem:[%s13287_s4 + $0x94] ss:$24 sps:$4 sm:$0xff]  }
  0xae   :  { %2185 = vmatprep.subr.bf16.mxu0 %v10486_v27 }
  0xb0   :  { %2227 = vmatpush1.bf16.msra.mxu1 %v10127_v29  ;;  %v10491_v29 = vld [vmem:[%s13287_s4 + $0x90] ss:$24 sps:$4 sm:$0xff]  }
  0xb1   :  { %2228 = vmatprep.subr.bf16.mxu1 %v10137_v31  ;;  %v104_v31 = vlaneseq  ;;  %2186 = vmatpush1.bf16.msra.mxu0 %v10491_v29 }
  0xb4   :  { %2229 = vmatpush1.bf16.msra.mxu1 %v10146_v33  ;;  %v10498_v33 = vld [vmem:[%s13287_s4 + $0xc4] ss:$24 sps:$4 sm:$0xff]  }
  0xb5   :  { %2230 = vmatprep.subr.bf16.mxu1 %v10156_v35  ;;  %v10503_v35 = vld [vmem:[%s13287_s4 + $0xc0] ss:$24 sps:$4 sm:$0xff]   ;;  %2187 = vmatprep.subr.bf16.mxu0 %v10498_v33 }
  0xb6   :  { %2188 = vmatpush1.bf16.msra.mxu0 %v10503_v35 }
  0xb8   :  { %2231 = vmatpush1.bf16.msra.mxu1 %v10165_v37  ;;  %v10505_v37 = vshrl.u32 %v104_v31, 7 }
  0xb9   :  { %2232 = vmatprep.subr.bf16.mxu1 %v10175_v39  ;;  %v10512_v39 = vld [vmem:[%s13287_s4 + $0xf0] ss:$24 sps:$4 sm:$0xff]  }
  0xbc   :  { %2233 = vmatpush1.bf16.msra.mxu1 %v10184_v41  ;;  %v10517_v41 = vld [vmem:[%s13287_s4 + $0xf4] ss:$24 sps:$4 sm:$0xff]  }
  0xbd   :  { %2234 = vmatprep.subr.bf16.mxu1 %v10194_v43  ;;  %v10522_v43 = vld [vmem:[%s13287_s4 + $0x124] ss:$24 sps:$4 sm:$0xff]   ;;  %2189 = vmatprep.subr.bf16.mxu0 %v10517_v41 }
  0xbe   :  { %2190 = vmatpush1.bf16.msra.mxu0 %v10512_v39 }
  0xbf   :  { %2191 = vmatprep.subr.bf16.mxu0 %v10522_v43 }
  0xc0   :  { %2235 = vmatpush1.bf16.msra.mxu1 %v10203_v45  ;;  %v114_v45 = vsub.s32 2, %v10505_v37 }
  0xc1   :  { %2236 = vmatprep.subr.bf16.mxu1 %v10209_v46  ;;  %v10527_v46 = vsub.s32 0, %v10505_v37 }
  0xc2   :  { %2192 = vmatpush1.bf16.msra.mxu0 %v10542_v54 }
  0xc3   :  { %13405 = vst [vmem:[#allocation4_spill] sm:$0xff] %v10527_v46  ;;  %2193 = vmatprep.subr.bf16.mxu0 %v10563_v61 }
  0xc4   :  { %2237 = vmatpush1.bf16.msra.mxu1 %v10219_v48  ;;  %v10532_v48 = vld [vmem:[%s13290_s3] sm:$0x3f] }
  0xc5   :  { %2238 = vmatprep.subr.bf16.mxu1 %v10228_v50  ;;  %v118_v50 = vsub.s32 3, %v10505_v37 }
  0xc6   :  { %2194 = vmatpush1.bf16.msra.mxu0 %v10568_v0 }
  0xc7   :  { %v10553_v59 = vrot.slane %v10532_v48, %v118_v50 }
  0xc8   :  { %2239 = vmatpush1.bf16.msra.mxu1 %v10237_v52  ;;  %v10536_v52 = vsub.s32 1, %v10505_v37 }
  0xc9   :  { %2240 = vmatprep.subr.bf16.mxu1 %v10251_v55  ;;  %v10546_v55 = vrot.slane %v10532_v48, %v114_v45  ;;  %v10615_v45 = vld [vmem:[%s13287_s4 + $0x1e4] ss:$24 sps:$4 sm:$0xff]  }
  0xca   :  { %13406 = vst [vmem:[#allocation5_spill] sm:$0xff] %v10536_v52 }
  0xcc   :  { %2241 = vmatpush1.bf16.msra.mxu1 %v10264_v58  ;;  %v10550_v58 = vrot.slane %v10532_v48, %v10527_v46  ;;  %v11144_v46 = vld [vmem:[%s13287_s4 + $0x27c] ss:$24 sps:$4 sm:$0xff]  }
  0xcd   :  { %2242 = vmatprep.subr.bf16.mxu1 %v10273_v60  ;;  %v10557_v60 = vrot.slane %v10532_v48, %v10536_v52  ;;  %v11138_v52 = vld [vmem:[%s13287_s4 + $0x248] ss:$24 sps:$4 sm:$0xff]   ;;  %13431 = vst [vmem:[#allocation28_spill] sm:$0xff] %v11144_v46 }
  0xce   :  { %13430 = vst [vmem:[#allocation27_spill] sm:$0xff] %v11138_v52 }
  0xd0   :  { %2243 = vmatpush1.bf16.msra.mxu1 %v10284_v63 }
  0xd1   :  { %2244 = vmatprep.subr.bf16.mxu1 %v10292_v2 }
  0xd4   :  { %2245 = vmatpush1.bf16.msra.mxu1 %v10302_v4 }
  0xd5   :  { %2246 = vmatprep.subr.bf16.mxu1 %v10310_v6 }
  0xd8   :  { %2247 = vmatpush1.bf16.msra.mxu1 %v10320_v8 }
  0xd9   :  { %2248 = vmatprep.subr.bf16.mxu1 %v10328_v10 }
  0xdc   :  { %2249 = vmatpush1.bf16.msra.mxu1 %v10338_v12 }
  0xdd   :  { %2250 = vmatprep.subr.bf16.mxu1 %v10346_v14  ;;  %v10581_v14 = vld [vmem:[%s13287_s4 + $0x184] ss:$24 sps:$4 sm:$0xff]  }
  0xde   :  { %2195 = vmatprep.subr.bf16.mxu0 %v10581_v14 }
  0xdf   :  { %2196 = vmatpush1.bf16.msra.mxu0 %v10590_v24 }
  0xe0   :  { %2251 = vmatpush1.bf16.msra.mxu1 %v10356_v18  ;;  %2197 = vmatprep.subr.bf16.mxu0 %v10597_v30 }
  0xe1   :  { %2954 = vmatprep.subr.bf16.mxu1 %v8932_v15 }
  0xe3   :  { %2198 = vmatpush1.bf16.msra.mxu0 %v10602_v36 }
  0xe4   :  { %2199 = vmatprep.subr.bf16.mxu0 %v10615_v45 }
  0xf6   :  { %v481_v62 = vpop.f32.mrb[0].mxu1  ;;  %v408_v63 = vpop.f32.mrb[0].mxu0 }
  0xf7   :  { %v482_v2 = vadd.f32 %v481_v62, %v10546_v55  ;;  %v483_v3 = vpop.f32.mrb[1].mxu1  ;;  %v409_v4 = vadd.f32 %v408_v63, %v10550_v58  ;;  %v410_v5 = vpop.f32.mrb[1].mxu0 }
  0xf8   :  { %v484_v6 = vadd.f32 %v483_v3, %v10553_v59  ;;  %v485_v7 = vpop.f32.mrb[2].mxu1  ;;  %v411_v8 = vadd.f32 %v410_v5, %v10557_v60  ;;  %v412_v9 = vpop.f32.mrb[2].mxu0  ;;  %v10622_v3 = vld [vmem:[%s13287_s4 + $0x1e0] ss:$24 sps:$4 sm:$0xff]  }
  0xf9   :  { %v486_v10 = vadd.f32 %v485_v7, %v10546_v55  ;;  %v487_v11 = vpop.f32.mrb[3].mxu1  ;;  %v413_v12 = vadd.f32 %v412_v9, %v10550_v58  ;;  %v414_v13 = vpop.f32.mrb[3].mxu0  ;;  %2200 = vmatpush1.bf16.msra.mxu0 %v10622_v3  ;;  %v10634_v9 = vld [vmem:[%s13287_s4 + $0x210] ss:$24 sps:$4 sm:$0xff]  }
  0xfa   :  { %v8635_v16 = vpack.c.bf16 %v484_v6, %v482_v2  ;;  %v488_v18 = vadd.f32 %v487_v11, %v10553_v59  ;;  %v10584_v20 = vpack.c.bf16 %v411_v8, %v409_v4  ;;  %v415_v22 = vadd.f32 %v414_v13, %v10557_v60  ;;  %v10629_v6 = vld [vmem:[%s13287_s4 + $0x214] ss:$24 sps:$4 sm:$0xff]  }
  0xfb   :  { %2201 = vmatprep.subr.bf16.mxu0 %v10629_v6 }
  0xfc   :  { %786 = vst [vmem:[#allocation2 + $0x8] sm:$0xff] %v8635_v16  ;;  %v8638_v26 = vpack.c.bf16 %v488_v18, %v486_v10  ;;  %v8637_v28 = vpack.c.bf16 %v415_v22, %v413_v12 }
  0xfd   :  { %2202 = vmatpush1.bf16.msra.mxu0 %v10634_v9 }
  0xfe   :  { %789 = vst [vmem:[#allocation2 + $0x20] sm:$0xff] %v8638_v26  ;;  %788 = vst [vmem:[#allocation2 + $0x18] sm:$0xff] %v8637_v28  ;;  %v418_v32 = vpop.f32.mrb[4].mxu0  ;;  %v491_v34 = vpop.f32.mrb[4].mxu1  ;;  %v10645_v28 = vld [vmem:[%s13287_s4 + $0x240] ss:$24 sps:$4 sm:$0xff]  }
  0xff   :  { %v419_v38 = vadd.f32 %v418_v32, %v10550_v58  ;;  %v420_v40 = vpop.f32.mrb[5].mxu0  ;;  %v492_v42 = vadd.f32 %v491_v34, %v10546_v55  ;;  %v493_v44 = vpop.f32.mrb[5].mxu1  ;;  %v10650_v32 = vld [vmem:[%s13287_s4 + $0x244] ss:$24 sps:$4 sm:$0xff]  }
 0x100   :  { %v421_v47 = vadd.f32 %v420_v40, %v10557_v60  ;;  %v422_v49 = vpop.f32.mrb[6].mxu0  ;;  %v494_v51 = vadd.f32 %v493_v44, %v10553_v59  ;;  %v495_v53 = vpop.f32.mrb[6].mxu1  ;;  %v10657_v44 = vld [vmem:[%s13287_s4 + $0x274] ss:$24 sps:$4 sm:$0xff]   ;;  %2203 = vmatprep.subr.bf16.mxu0 %v10650_v32 }
 0x101   :  { %v423_v56 = vadd.f32 %v422_v49, %v10550_v58  ;;  %v424_v57 = vpop.f32.mrb[7].mxu0  ;;  %v496_v15 = vadd.f32 %v495_v53, %v10546_v55  ;;  %v497_v31 = vpop.f32.mrb[7].mxu1  ;;  %2204 = vmatpush1.bf16.msra.mxu0 %v10645_v28 }
 0x102   :  { %v8640_v50 = vpack.c.bf16 %v421_v47, %v419_v38  ;;  %v425_v62 = vadd.f32 %v424_v57, %v10557_v60  ;;  %v8641_v63 = vpack.c.bf16 %v494_v51, %v492_v42  ;;  %v498_v2 = vadd.f32 %v497_v31, %v10553_v59  ;;  %2205 = vmatprep.subr.bf16.mxu0 %v10657_v44  ;;  %v10672_v31 = vld [vmem:[%s13287_s4 + $0x2a4] ss:$24 sps:$4 sm:$0xff]  }
 0x104   :  { %791 = vst [vmem:[#allocation2 + $0x30] sm:$0xff] %v8640_v50  ;;  %v8643_v4 = vpack.c.bf16 %v425_v62, %v423_v56  ;;  %792 = vst [vmem:[#allocation2 + $0x38] sm:$0xff] %v8641_v63  ;;  %v8644_v5 = vpack.c.bf16 %v498_v2, %v496_v15  ;;  %v10666_v15 = vld [vmem:[%s13287_s4 + $0x270] ss:$24 sps:$4 sm:$0xff]  }
 0x105   :  { %2206 = vmatpush1.bf16.msra.mxu0 %v10666_v15 }
 0x106   :  { %794 = vst [vmem:[#allocation2 + $0x48] sm:$0xff] %v8643_v4  ;;  %v428_v7 = vpop.f32.mrb[8].mxu0  ;;  %795 = vst [vmem:[#allocation2 + $0x50] sm:$0xff] %v8644_v5  ;;  %v501_v8 = vpop.f32.mrb[8].mxu1  ;;  %v122_v4 = vsub.s32 4, %v10505_v37  ;;  %2207 = vmatprep.subr.bf16.mxu0 %v10672_v31 }
 0x107   :  { %v429_v10 = vadd.f32 %v428_v7, %v10550_v58  ;;  %v430_v11 = vpop.f32.mrb[9].mxu0  ;;  %v502_v12 = vadd.f32 %v501_v8, %v10546_v55  ;;  %v503_v13 = vpop.f32.mrb[9].mxu1 }
 0x108   :  { %v431_v16 = vadd.f32 %v430_v11, %v10557_v60  ;;  %v432_v18 = vpop.f32.mrb[10].mxu0  ;;  %v504_v22 = vadd.f32 %v503_v13, %v10553_v59  ;;  %v505_v26 = vpop.f32.mrb[10].mxu1  ;;  %v126_v11 = vsub.s32 5, %v10505_v37  ;;  %v10692_v37 = vld [vmem:[%s13287_s4 + $0x2d4] ss:$24 sps:$4 sm:$0xff]  }
 0x109   :  { %v433_v34 = vadd.f32 %v432_v18, %v10550_v58  ;;  %v434_v38 = vpop.f32.mrb[11].mxu0  ;;  %v506_v40 = vadd.f32 %v505_v26, %v10546_v55  ;;  %v507_v42 = vpop.f32.mrb[11].mxu1 }
 0x10a   :  { %v8646_v47 = vpack.c.bf16 %v431_v16, %v429_v10  ;;  %v435_v49 = vadd.f32 %v434_v38, %v10557_v60  ;;  %v8647_v51 = vpack.c.bf16 %v504_v22, %v502_v12  ;;  %v508_v53 = vadd.f32 %v507_v42, %v10553_v59  ;;  %v10684_v16 = vld [vmem:[%s13287_s4 + $0x2a0] ss:$24 sps:$4 sm:$0xff]  }
 0x10b   :  { %2208 = vmatpush1.bf16.msra.mxu0 %v10684_v16 }
 0x10c   :  { %797 = vst [vmem:[#allocation2 + $0x60] sm:$0xff] %v8646_v47  ;;  %v8649_v56 = vpack.c.bf16 %v435_v49, %v433_v34  ;;  %798 = vst [vmem:[#allocation2 + $0x68] sm:$0xff] %v8647_v51  ;;  %v8650_v57 = vpack.c.bf16 %v508_v53, %v506_v40  ;;  %v123_v49 = vrot.slane %v10532_v48, %v122_v4  ;;  %v10702_v53 = vld [vmem:[%s13287_s4 + $0x2d0] ss:$24 sps:$4 sm:$0xff]   ;;  %2209 = vmatprep.subr.bf16.mxu0 %v10692_v37 }
 0x10e   :  { %800 = vst [vmem:[#allocation2 + $0x78] sm:$0xff] %v8649_v56  ;;  %v438_v50 = vpop.f32.mrb[12].mxu0  ;;  %801 = vst [vmem:[#allocation2 + $0x80] sm:$0xff] %v8650_v57  ;;  %v511_v62 = vpop.f32.mrb[12].mxu1 }
 0x10f   :  { %v439_v63 = vadd.f32 %v438_v50, %v10550_v58  ;;  %v440_v2 = vpop.f32.mrb[13].mxu0  ;;  %v512_v5 = vadd.f32 %v511_v62, %v10546_v55  ;;  %v513_v7 = vpop.f32.mrb[13].mxu1  ;;  %2210 = vmatpush1.bf16.msra.mxu0 %v10702_v53 }
 0x110   :  { %v441_v8 = vadd.f32 %v440_v2, %v10557_v60  ;;  %v442_v10 = vpop.f32.mrb[14].mxu0  ;;  %v514_v12 = vadd.f32 %v513_v7, %v10553_v59  ;;  %v515_v13 = vpop.f32.mrb[14].mxu1 }
 0x111   :  { %v443_v18 = vadd.f32 %v442_v10, %v10550_v58  ;;  %v444_v22 = vpop.f32.mrb[15].mxu0  ;;  %v516_v26 = vadd.f32 %v515_v13, %v10546_v55  ;;  %v517_v34 = vpop.f32.mrb[15].mxu1  ;;  %v127_v55 = vrot.slane %v10532_v48, %v126_v11 }
 0x112   :  { %v8652_v38 = vpack.c.bf16 %v441_v8, %v439_v63  ;;  %v445_v40 = vadd.f32 %v444_v22, %v10557_v60  ;;  %v8653_v42 = vpack.c.bf16 %v514_v12, %v512_v5  ;;  %v518_v47 = vadd.f32 %v517_v34, %v10553_v59  ;;  %v10709_v63 = vld [vmem:[%s13287_s4 + $0x14] ss:$24 sps:$4 sm:$0xff]  }
 0x113   :  { %2261 = vmatprep.subr.bf16.mxu0 %v10709_v63 }
 0x114   :  { %803 = vst [vmem:[#allocation2 + $0x90] sm:$0xff] %v8652_v38  ;;  %v8655_v58 = vpack.c.bf16 %v445_v40, %v443_v18  ;;  %804 = vst [vmem:[#allocation2 + $0x98] sm:$0xff] %v8653_v42  ;;  %v8656_v51 = vpack.c.bf16 %v518_v47, %v516_v26 }
 0x116   :  { %806 = vst [vmem:[#allocation2 + $0xa8] sm:$0xff] %v8655_v58  ;;  %v554_v60 = vpop.f32.mrb[16].mxu0  ;;  %807 = vst [vmem:[#allocation2 + $0xb0] sm:$0xff] %v8656_v51 }
 0x117   :  { %v555_v59 = vadd.f32 %v554_v60, %v123_v49  ;;  %v556_v56 = vpop.f32.mrb[17].mxu0 }
 0x118   :  { %v557_v57 = vadd.f32 %v556_v56, %v127_v55  ;;  %v558_v50 = vpop.f32.mrb[18].mxu0 }
 0x119   :  { %v559_v48 = vadd.f32 %v558_v50, %v123_v49  ;;  %v560_v62 = vpop.f32.mrb[19].mxu0 }
 0x11a   :  { %v8636_v2 = vpack.c.bf16 %v557_v57, %v555_v59  ;;  %v561_v4 = vadd.f32 %v560_v62, %v127_v55 }
 0x11c   :  { %787 = vst [vmem:[#allocation2 + $0x10] sm:$0xff] %v8636_v2  ;;  %v8639_v5 = vpack.c.bf16 %v561_v4, %v559_v48 }
 0x11e   :  { %790 = vst [vmem:[#allocation2 + $0x28] sm:$0xff] %v8639_v5  ;;  %v564_v7 = vpop.f32.mrb[20].mxu0 }
 0x11f   :  { %v565_v8 = vadd.f32 %v564_v7, %v123_v49  ;;  %v566_v10 = vpop.f32.mrb[21].mxu0 }
 0x120   :  { %v567_v11 = vadd.f32 %v566_v10, %v127_v55  ;;  %v568_v12 = vpop.f32.mrb[22].mxu0 }
 0x121   :  { %v569_v13 = vadd.f32 %v568_v12, %v123_v49  ;;  %v570_v18 = vpop.f32.mrb[23].mxu0  ;;  %v1521_v12 = vunpack.c.l.bf16 %v10584_v20 }
 0x122   :  { %v8642_v22 = vpack.c.bf16 %v567_v11, %v565_v8  ;;  %v571_v26 = vadd.f32 %v570_v18, %v127_v55  ;;  %v1522_v18 = vunpack.c.h.bf16 %v10584_v20 }
 0x124   :  { %793 = vst [vmem:[#allocation2 + $0x40] sm:$0xff] %v8642_v22  ;;  %v8645_v34 = vpack.c.bf16 %v571_v26, %v569_v13 }
 0x126   :  { %796 = vst [vmem:[#allocation2 + $0x58] sm:$0xff] %v8645_v34  ;;  %v574_v38 = vpop.f32.mrb[24].mxu0 }
 0x127   :  { %v575_v40 = vadd.f32 %v574_v38, %v123_v49  ;;  %v576_v42 = vpop.f32.mrb[25].mxu0 }
 0x128   :  { %v577_v47 = vadd.f32 %v576_v42, %v127_v55  ;;  %v578_v58 = vpop.f32.mrb[26].mxu0 }
 0x129   :  { %v579_v51 = vadd.f32 %v578_v58, %v123_v49  ;;  %v580_v60 = vpop.f32.mrb[27].mxu0 }
 0x12a   :  { %v8648_v59 = vpack.c.bf16 %v577_v47, %v575_v40  ;;  %v581_v56 = vadd.f32 %v580_v60, %v127_v55  ;;  %v10717_v60 = vld [vmem:[%s13291_s5] ss:$0 sm:$0xff] }
 0x12c   :  { %799 = vst [vmem:[#allocation2 + $0x70] sm:$0xff] %v8648_v59  ;;  %v8651_v57 = vpack.c.bf16 %v581_v56, %v579_v51 }
 0x12e   :  { %802 = vst [vmem:[#allocation2 + $0x88] sm:$0xff] %v8651_v57  ;;  %v584_v50 = vpop.f32.mrb[28].mxu0 }
 0x12f   :  { %v585_v48 = vadd.f32 %v584_v50, %v123_v49  ;;  %v586_v62 = vpop.f32.mrb[29].mxu0 }
 0x130   :  { %v587_v2 = vadd.f32 %v586_v62, %v127_v55  ;;  %v588_v4 = vpop.f32.mrb[30].mxu0 }
 0x131   :  { %v589_v5 = vadd.f32 %v588_v4, %v123_v49  ;;  %v590_v7 = vpop.f32.mrb[31].mxu0 }
 0x132   :  { %v8654_v8 = vpack.c.bf16 %v587_v2, %v585_v48  ;;  %v591_v10 = vadd.f32 %v590_v7, %v127_v55 }
 0x134   :  { %805 = vst [vmem:[#allocation2 + $0xa0] sm:$0xff] %v8654_v8  ;;  %v8657_v11 = vpack.c.bf16 %v591_v10, %v589_v5 }
 0x136   :  { %808 = vst [vmem:[#allocation2 + $0xb8] sm:$0xff] %v8657_v11  ;;  %v1430_v13 = vpop.f32.mrb[16].mxu1 }
 0x137   :  { %v1530_v22 = vadd.f32 %v1521_v12, %v1430_v13  ;;  %v1432_v26 = vpop.f32.mrb[17].mxu1  ;;  %v9740_v12 = vld [vmem:[%s13289_s1] sm:$0xff] }
 0x138   :  { %v1531_v34 = vadd.f32 %v1522_v18, %v1432_v26  ;;  %v1434_v38 = vpop.f32.mrb[18].mxu1  ;;  %vm816_vm4 = vcmp.gt.s32.totalorder %v9740_v12, 6  ;;  %vm811_vm5 = vcmp.gt.s32.totalorder %v9740_v12, 1  ;;  %vm812_vm6 = vcmp.gt.s32.totalorder %v9740_v12, 2 }
 0x139   :  { %v7853_v40 = vmul.f32 -1.442695, %v1530_v22  ;;  %v1435_v42 = vpop.f32.mrb[19].mxu1  ;;  %v2366_v13 = vsel %vm816_vm4, 1, %v9745_v1  ;;  %v2358_v18 = vsel %vm811_vm5, 1, %v9745_v1  ;;  %v3133_v26 = vsel %vm812_vm6, 1, %v9745_v1 }
 0x13a   :  { %v7854_v47 = vmul.f32 -1.442695, %v1531_v34  ;;  %2368 = vperm.xlu1 %8713, %v2366_v13   ;;  %vm813_vm7 = vcmp.gt.s32.totalorder %v9740_v12, 3  ;;  %v10735_v12 = vpop.permute.xlu0 %1595 }
 0x13b   :  { %9530 = vpow2.f32 %v7853_v40  ;;  %v3908_v40 = vsel %vm813_vm7, 1, %v9745_v1  ;;  %13407 = vst [vmem:[#allocation6_spill] sm:$0xff] %v10735_v12  ;;  %vm1597_vm8 = vcmp.eq.s32.totalorder %v10735_v12, 1  ;;  %v11887_v12 = vld [vmem:[%s13287_s4 + $0x27c] ss:$24 sps:$4 sm:$0xff]  }
 0x13c   :  { %9532 = vpow2.f32 %v7854_v47  ;;  %vm7955_vm10 = vmpackc.low %vm1597_vm8, %vm1597_vm8 }
 0x13d   :  { %v1525_v51 = vld [vmem:[#allocation2 + $0xb4] sm:$0xff]  ;;  %v1520_v56 = vld [vmem:[#allocation2 + $0x8] ss:$180 sps:$4 sm:$0xff]  }
 0x13e   :  { %v1527_v57 = vunpack.c.l.bf16 %v1525_v51  ;;  %v1523_v5 = vunpack.c.l.bf16 %v1520_v56  ;;  %2360 = vperm.xlu1 %8713, %v2358_v18  }
 0x142   :  { %3135 = vperm.xlu1 %8713, %v3133_v26  }
 0x145   :  { %v9531_v49 = vpop.eup %9530 }
 0x146   :  { %v1538_v58 = vadd.f32 1.0, %v9531_v49  ;;  %v9533_v55 = vpop.eup %9532  ;;  %3910 = vperm.xlu1 %8713, %v3908_v40  }
 0x147   :  { %v1539_v20 = vadd.f32 1.0, %v9533_v55 }
 0x148   :  { %9534 = vrcp.f32 %v1538_v58 }
 0x149   :  { %9536 = vrcp.f32 %v1539_v20  ;;  %v1528_v20 = vunpack.c.h.bf16 %v1525_v51 }
 0x152   :  { %v9535_v62 = vpop.eup %9534 }
 0x153   :  { %v9537_v22 = vpop.eup %9536 }
 0x154   :  { %v1554_v34 = vsub.f32 1.0, %v9537_v22  ;;  %v1556_v49 = vmul.f32 0.0, %v9537_v22 }
 0x156   :  { %v1471_v59 = vpop.f32.mrb[32].mxu0 }
 0x157   :  { %v1550_v50 = vadd.f32 %v10717_v60, %v1471_v59  ;;  %v1473_v48 = vpop.f32.mrb[33].mxu0  ;;  %v10732_v59 = vld [vmem:[%s13291_s5 + $0x1] ss:$0 sm:$0xff] }
 0x158   :  { %v1558_v2 = vadd.f32 %v1527_v57, %v1473_v48  ;;  %v1475_v4 = vpop.f32.mrb[34].mxu0 }
 0x159   :  { %v1551_v7 = vmul.f32 %v9535_v62, %v1550_v50  ;;  %v1476_v8 = vpop.f32.mrb[35].mxu0 }
 0x15a   :  { %v7856_v10 = vmul.f32 -1.442695, %v1558_v2  ;;  %v1529_v8 = vunpack.c.h.bf16 %v1520_v56 }
 0x15b   :  { %v1552_v11 = vadd.f32 %v1551_v7, %v1523_v5 }
 0x15d   :  { %9538 = vtanh.f32 %v1552_v11 }
 0x15e   :  { %9540 = vpow2.f32 %v7856_v10 }
 0x167   :  { %v9539_v38 = vpop.eup %9538 }
 0x168   :  { %v9541_v42 = vpop.eup %9540  ;;  %v1555_v47 = vmul.f32 %v9539_v38, %v1554_v34  ;;  %v10738_v38 = vpop.permute.xlu0 %1588 }
 0x169   :  { %v1566_v55 = vadd.f32 1.0, %v9541_v42  ;;  %13408 = vst [vmem:[#allocation7_spill] sm:$0xff] %v10738_v38  ;;  %v10747_v42 = vld [vmem:[%s13287_s4 + $0x10] ss:$24 sps:$4 sm:$0xff]   ;;  %vm1590_vm9 = vcmp.eq.s32.totalorder %v10738_v38, 1 }
 0x16a   :  { %v10727_v58 = vadd.f32 %v1556_v49, %v1555_v47  ;;  %v10760_v49 = vld [vmem:[%s13287_s4 + $0x44] ss:$24 sps:$4 sm:$0xff]   ;;  %vm10765_vm11 = vmpackc.low %vm1590_vm9, %vm1590_vm9  ;;  %v11881_v38 = vld [vmem:[%s13287_s4 + $0x248] ss:$24 sps:$4 sm:$0xff]  }
 0x16b   :  { %9542 = vrcp.f32 %v1566_v55  ;;  %v11131_v55 = vld [vmem:[%s13287_s4 + $0x24c] ss:$24 sps:$4 sm:$0xff]  }
 0x16c   :  { %v10752_v47 = vpack.c.bf16 %v10727_v58, %v10727_v58  ;;  %13429 = vst [vmem:[#allocation26_spill] sm:$0xff] %v11131_v55 }
 0x175   :  { %v9543_v2 = vpop.eup %9542 }
 0x176   :  { %v1512_v57 = vpop.f32.mrb[20].mxu1 }
 0x177   :  { %v1559_v50 = vadd.f32 %v1528_v20, %v1512_v57  ;;  %v1514_v48 = vpop.f32.mrb[21].mxu1  ;;  %v10779_v20 = vld [vmem:[%s13287_s4 + $0x40] ss:$24 sps:$4 sm:$0xff]   ;;  %v10785_v57 = vld [vmem:[%s13287_s4 + $0x74] ss:$24 sps:$4 sm:$0xff]  }
 0x178   :  { %v1578_v62 = vadd.f32 %v10732_v59, %v1514_v48  ;;  %v1516_v1 = vpop.f32.mrb[22].mxu1  ;;  %v10799_v48 = vld [vmem:[%s13287_s4 + $0xa4] ss:$24 sps:$4 sm:$0xff]  }
 0x179   :  { %v7857_v4 = vmul.f32 -1.442695, %v1559_v50  ;;  %v1517_v5 = vpop.f32.mrb[23].mxu1  ;;  %v10793_v50 = vld [vmem:[%s13287_s4 + $0x70] ss:$24 sps:$4 sm:$0xff]  }
 0x17a   :  { %v1579_v7 = vmul.f32 %v9543_v2, %v1578_v62  ;;  %v11030_v62 = vld [vmem:[%s13287_s4 + $0x9c] ss:$24 sps:$4 sm:$0xff]   ;;  %v11035_v1 = vld [vmem:[%s13287_s4 + $0xcc] ss:$24 sps:$4 sm:$0xff]   ;;  %v11042_v2 = vld [vmem:[%s13287_s4 + $0xc8] ss:$24 sps:$4 sm:$0xff]  }
 0x17b   :  { %9544 = vpow2.f32 %v7857_v4  ;;  %13412 = vst [vmem:[#allocation9_spill] sm:$0xff] %v11030_v62  ;;  %13413 = vst [vmem:[#allocation10_spill] sm:$0xff] %v11035_v1  ;;  %v11048_v4 = vld [vmem:[%s13287_s4 + $0xfc] ss:$24 sps:$4 sm:$0xff]   ;;  %v11054_v5 = vld [vmem:[%s13287_s4 + $0xf8] ss:$24 sps:$4 sm:$0xff]  }
 0x17c   :  { %v1580_v51 = vadd.f32 %v1579_v7, %v1529_v8  ;;  %13414 = vst [vmem:[#allocation11_spill] sm:$0xff] %v11042_v2  ;;  %13415 = vst [vmem:[#allocation12_spill] sm:$0xff] %v11048_v4  ;;  %v11060_v7 = vld [vmem:[%s13287_s4 + $0x12c] ss:$24 sps:$4 sm:$0xff]   ;;  %v11066_v8 = vld [vmem:[%s13287_s4 + $0x128] ss:$24 sps:$4 sm:$0xff]  }
 0x17d   :  { %13416 = vst [vmem:[#allocation13_spill] sm:$0xff] %v11054_v5  ;;  %13417 = vst [vmem:[#allocation14_spill] sm:$0xff] %v11060_v7 }
 0x17e   :  { %13418 = vst [vmem:[#allocation15_spill] sm:$0xff] %v11066_v8 }
 0x185   :  { %v9545_v10 = vpop.eup %9544 }
 0x186   :  { %v1567_v11 = vadd.f32 1.0, %v9545_v10  ;;  %v11073_v10 = vld [vmem:[%s13287_s4 + $0x15c] ss:$24 sps:$4 sm:$0xff]  }
 0x187   :  { %13419 = vst [vmem:[#allocation16_spill] sm:$0xff] %v11073_v10 }
 0x188   :  { %9546 = vrcp.f32 %v1567_v11  ;;  %v11078_v11 = vld [vmem:[%s13287_s4 + $0x158] ss:$24 sps:$4 sm:$0xff]  }
 0x189   :  { %9548 = vtanh.f32 %v1580_v51  ;;  %13420 = vst [vmem:[#allocation17_spill] sm:$0xff] %v11078_v11  ;;  %v11085_v51 = vld [vmem:[%s13287_s4 + $0x18c] ss:$24 sps:$4 sm:$0xff]  }
 0x18a   :  { %13421 = vst [vmem:[#allocation18_spill] sm:$0xff] %v11085_v51 }
 0x192   :  { %v9547_v13 = vpop.eup %9546 }
 0x193   :  { %v1582_v18 = vsub.f32 1.0, %v9547_v13  ;;  %v9549_v22 = vpop.eup %9548  ;;  %v1584_v34 = vmul.f32 0.0, %v9547_v13  ;;  %v11090_v13 = vld [vmem:[%s13287_s4 + $0x188] ss:$24 sps:$4 sm:$0xff]  }
 0x194   :  { %13422 = vst [vmem:[#allocation19_spill] sm:$0xff] %v11090_v13 }
 0x195   :  { %v1583_v26 = vmul.f32 %v9549_v22, %v1582_v18  ;;  %v11097_v18 = vld [vmem:[%s13287_s4 + $0x1bc] ss:$24 sps:$4 sm:$0xff]   ;;  %v11102_v22 = vld [vmem:[%s13287_s4 + $0x1b8] ss:$24 sps:$4 sm:$0xff]  }
 0x196   :  { %13423 = vst [vmem:[#allocation20_spill] sm:$0xff] %v11097_v18  ;;  %13424 = vst [vmem:[#allocation21_spill] sm:$0xff] %v11102_v22 }
 0x197   :  { %v10740_v40 = vadd.f32 %v1584_v34, %v1583_v26  ;;  %v11109_v26 = vld [vmem:[%s13287_s4 + $0x1ec] ss:$24 sps:$4 sm:$0xff]   ;;  %v11114_v34 = vld [vmem:[%s13287_s4 + $0x1e8] ss:$24 sps:$4 sm:$0xff]  }
 0x198   :  { %13425 = vst [vmem:[#allocation22_spill] sm:$0xff] %v11109_v26  ;;  %13426 = vst [vmem:[#allocation23_spill] sm:$0xff] %v11114_v34 }
 0x199   :  { %v7956_v56 = vpack.c.bf16 %v10740_v40, %v10740_v40 }
 0x19b   :  { %7957 = vmatprep.mubr.msk.bf16.mxu0 %vm7955_vm10, %v7956_v56  ;;  %7963 = vmatprep.mubr.msk.bf16.mxu1 %vm7955_vm10, %v7956_v56 }
 0x19c   :  { %7960 = vmatmul.mubr.msk.bf16.vlgmr.msra.gmra.mrb[36].mxu0 %vm10765_vm11, %v10752_v47  ;;  %7966 = vmatmul.mubr.msk.bf16.vlgmr.msra.gmra.mrb[24].mxu1 %vm10765_vm11, %v10752_v47 }
 0x19d   :  { %2262 = vmatpush1.bf16.msra.mxu0 %v10747_v42  ;;  %7969 = vmatprep.mubr.msk.bf16.mxu0 %vm7955_vm10, %v7956_v56  ;;  %v11121_v56 = vld [vmem:[%s13287_s4 + $0x21c] ss:$24 sps:$4 sm:$0xff]  }
 0x19e   :  { %2263 = vmatprep.subr.bf16.mxu0 %v10760_v49  ;;  %2955 = vmatpush1.bf16.msra.mxu1 %v10453_v17  ;;  %v10807_v17 = vld [vmem:[%s13287_s4 + $0xa0] ss:$24 sps:$4 sm:$0xff]   ;;  %13427 = vst [vmem:[#allocation24_spill] sm:$0xff] %v11121_v56 }
 0x19f   :  { %2956 = vmatprep.subr.bf16.mxu1 %v10460_v19  ;;  %v10813_v19 = vld [vmem:[%s13287_s4 + $0xd4] ss:$24 sps:$4 sm:$0xff]  }
 0x1a1   :  { %2264 = vmatpush1.bf16.msra.mxu0 %v10779_v20 }
 0x1a2   :  { %2265 = vmatprep.subr.bf16.mxu0 %v10785_v57  ;;  %2957 = vmatpush1.bf16.msra.mxu1 %v10466_v21  ;;  %v10821_v21 = vld [vmem:[%s13287_s4 + $0xd0] ss:$24 sps:$4 sm:$0xff]  }
 0x1a3   :  { %2958 = vmatprep.subr.bf16.mxu1 %v10474_v23  ;;  %v10827_v23 = vld [vmem:[%s13287_s4 + $0x104] ss:$24 sps:$4 sm:$0xff]  }
 0x1a5   :  { %2266 = vmatpush1.bf16.msra.mxu0 %v10793_v50 }
 0x1a6   :  { %2267 = vmatprep.subr.bf16.mxu0 %v10799_v48  ;;  %2959 = vmatpush1.bf16.msra.mxu1 %v10479_v25  ;;  %v10835_v25 = vld [vmem:[%s13287_s4 + $0x100] ss:$24 sps:$4 sm:$0xff]  }
 0x1a7   :  { %2960 = vmatprep.subr.bf16.mxu1 %v10486_v27  ;;  %v10841_v27 = vld [vmem:[%s13287_s4 + $0x134] ss:$24 sps:$4 sm:$0xff]  }
 0x1a9   :  { %2268 = vmatpush1.bf16.msra.mxu0 %v10807_v17 }
 0x1aa   :  { %2269 = vmatprep.subr.bf16.mxu0 %v10813_v19  ;;  %2961 = vmatpush1.bf16.msra.mxu1 %v10491_v29  ;;  %v10849_v29 = vld [vmem:[%s13287_s4 + $0x130] ss:$24 sps:$4 sm:$0xff]  }
 0x1ab   :  { %2962 = vmatprep.subr.bf16.mxu1 %v10498_v33  ;;  %v10855_v33 = vld [vmem:[%s13287_s4 + $0x164] ss:$24 sps:$4 sm:$0xff]  }
 0x1ad   :  { %2270 = vmatpush1.bf16.msra.mxu0 %v10821_v21 }
 0x1ae   :  { %2271 = vmatprep.subr.bf16.mxu0 %v10827_v23  ;;  %2963 = vmatpush1.bf16.msra.mxu1 %v10503_v35  ;;  %v10863_v35 = vld [vmem:[%s13287_s4 + $0x160] ss:$24 sps:$4 sm:$0xff]  }
 0x1af   :  { %2964 = vmatprep.subr.bf16.mxu1 %v10517_v41  ;;  %v10869_v41 = vld [vmem:[%s13287_s4 + $0x194] ss:$24 sps:$4 sm:$0xff]  }
 0x1b1   :  { %2272 = vmatpush1.bf16.msra.mxu0 %v10835_v25 }
 0x1b2   :  { %2273 = vmatprep.subr.bf16.mxu0 %v10841_v27  ;;  %2965 = vmatpush1.bf16.msra.mxu1 %v10512_v39  ;;  %v10877_v39 = vld [vmem:[%s13287_s4 + $0x190] ss:$24 sps:$4 sm:$0xff]  }
 0x1b3   :  { %2966 = vmatprep.subr.bf16.mxu1 %v10522_v43  ;;  %v10883_v43 = vld [vmem:[%s13287_s4 + $0x1c4] ss:$24 sps:$4 sm:$0xff]  }
 0x1b5   :  { %2274 = vmatpush1.bf16.msra.mxu0 %v10849_v29 }
 0x1b6   :  { %2275 = vmatprep.subr.bf16.mxu0 %v10855_v33  ;;  %2967 = vmatpush1.bf16.msra.mxu1 %v10542_v54  ;;  %v10891_v54 = vld [vmem:[%s13287_s4 + $0x1c0] ss:$24 sps:$4 sm:$0xff]  }
 0x1b7   :  { %2968 = vmatprep.subr.bf16.mxu1 %v10563_v61  ;;  %v10897_v61 = vld [vmem:[%s13287_s4 + $0x1f4] ss:$24 sps:$4 sm:$0xff]  }
 0x1b9   :  { %2276 = vmatpush1.bf16.msra.mxu0 %v10863_v35 }
 0x1ba   :  { %2277 = vmatprep.subr.bf16.mxu0 %v10869_v41  ;;  %2969 = vmatpush1.bf16.msra.mxu1 %v10568_v0  ;;  %v10905_v0 = vld [vmem:[%s13287_s4 + $0x1f0] ss:$24 sps:$4 sm:$0xff]  }
 0x1bb   :  { %2970 = vmatprep.subr.bf16.mxu1 %v10581_v14  ;;  %v10911_v14 = vld [vmem:[%s13287_s4 + $0x224] ss:$24 sps:$4 sm:$0xff]  }
 0x1bd   :  { %2278 = vmatpush1.bf16.msra.mxu0 %v10877_v39 }
 0x1be   :  { %2279 = vmatprep.subr.bf16.mxu0 %v10883_v43  ;;  %2971 = vmatpush1.bf16.msra.mxu1 %v10590_v24  ;;  %v10919_v24 = vld [vmem:[%s13287_s4 + $0x220] ss:$24 sps:$4 sm:$0xff]  }
 0x1bf   :  { %2972 = vmatprep.subr.bf16.mxu1 %v10597_v30  ;;  %v10925_v30 = vld [vmem:[%s13287_s4 + $0x254] ss:$24 sps:$4 sm:$0xff]  }
 0x1c1   :  { %2280 = vmatpush1.bf16.msra.mxu0 %v10891_v54 }
 0x1c2   :  { %2281 = vmatprep.subr.bf16.mxu0 %v10897_v61  ;;  %2973 = vmatpush1.bf16.msra.mxu1 %v10602_v36  ;;  %v10933_v36 = vld [vmem:[%s13287_s4 + $0x250] ss:$24 sps:$4 sm:$0xff]  }
 0x1c3   :  { %2974 = vmatprep.subr.bf16.mxu1 %v10615_v45  ;;  %v10939_v45 = vld [vmem:[%s13287_s4 + $0x284] ss:$24 sps:$4 sm:$0xff]  }
 0x1c5   :  { %2282 = vmatpush1.bf16.msra.mxu0 %v10905_v0 }
 0x1c6   :  { %2283 = vmatprep.subr.bf16.mxu0 %v10911_v14  ;;  %2975 = vmatpush1.bf16.msra.mxu1 %v10622_v3  ;;  %v10947_v3 = vld [vmem:[%s13287_s4 + $0x280] ss:$24 sps:$4 sm:$0xff]  }
 0x1c7   :  { %2976 = vmatprep.subr.bf16.mxu1 %v10629_v6  ;;  %v10953_v6 = vld [vmem:[%s13287_s4 + $0x2b4] ss:$24 sps:$4 sm:$0xff]  }
 0x1c9   :  { %2284 = vmatpush1.bf16.msra.mxu0 %v10919_v24 }
 0x1ca   :  { %2285 = vmatprep.subr.bf16.mxu0 %v10925_v30  ;;  %2977 = vmatpush1.bf16.msra.mxu1 %v10634_v9  ;;  %v10961_v9 = vld [vmem:[%s13287_s4 + $0x2b0] ss:$24 sps:$4 sm:$0xff]  }
 0x1cb   :  { %2978 = vmatprep.subr.bf16.mxu1 %v10650_v32  ;;  %v10967_v32 = vld [vmem:[%s13287_s4 + $0x2e4] ss:$24 sps:$4 sm:$0xff]  }
 0x1cd   :  { %2286 = vmatpush1.bf16.msra.mxu0 %v10933_v36 }
 0x1ce   :  { %2287 = vmatprep.subr.bf16.mxu0 %v10939_v45  ;;  %2979 = vmatpush1.bf16.msra.mxu1 %v10645_v28  ;;  %v10975_v28 = vld [vmem:[%s13287_s4 + $0x2e0] ss:$24 sps:$4 sm:$0xff]  }
 0x1cf   :  { %2980 = vmatprep.subr.bf16.mxu1 %v10657_v44  ;;  %v10989_v44 = vld [vmem:[%s13287_s4 + $0x8] ss:$24 sps:$4 sm:$0xff]  }
 0x1d1   :  { %2288 = vmatpush1.bf16.msra.mxu0 %v10947_v3 }
 0x1d2   :  { %2289 = vmatprep.subr.bf16.mxu0 %v10953_v6  ;;  %2981 = vmatpush1.bf16.msra.mxu1 %v10666_v15  ;;  %v10994_v15 = vld [vmem:[%s13287_s4 + $0xc] ss:$24 sps:$4 sm:$0xff]  }
 0x1d3   :  { %2982 = vmatprep.subr.bf16.mxu1 %v10672_v31  ;;  %v10999_v31 = vld [vmem:[%s13287_s4 + $0x3c] ss:$24 sps:$4 sm:$0xff]  }
 0x1d5   :  { %2290 = vmatpush1.bf16.msra.mxu0 %v10961_v9 }
 0x1d6   :  { %2291 = vmatprep.subr.bf16.mxu0 %v10967_v32  ;;  %2983 = vmatpush1.bf16.msra.mxu1 %v10684_v16  ;;  %v11006_v16 = vld [vmem:[%s13287_s4 + $0x38] ss:$24 sps:$4 sm:$0xff]  }
 0x1d7   :  { %2984 = vmatprep.subr.bf16.mxu1 %v10692_v37  ;;  %v11013_v37 = vld [vmem:[%s13287_s4 + $0x6c] ss:$24 sps:$4 sm:$0xff]  }
 0x1d9   :  { %2292 = vmatpush1.bf16.msra.mxu0 %v10975_v28 }
 0x1da   :  { %2985 = vmatpush1.bf16.msra.mxu1 %v10702_v53  ;;  %2995 = vmatprep.subr.bf16.mxu0 %v10994_v15  ;;  %v11018_v53 = vld [vmem:[%s13287_s4 + $0x68] ss:$24 sps:$4 sm:$0xff]  }
 0x1db   :  { %3036 = vmatprep.subr.bf16.mxu1 %v10709_v63  ;;  %v11025_v63 = vld [vmem:[%s13287_s4 + $0x98] ss:$24 sps:$4 sm:$0xff]  }
 0x1dc   :  { %7972 = vmatmul.mubr.msk.bf16.vlgmr.msra.gmra.mrb[40].mxu0 %vm10765_vm11, %v10752_v47  ;;  %13411 = vst [vmem:[#allocation8_spill] sm:$0xff] %v11025_v63  ;;  %v11126_v47 = vld [vmem:[%s13287_s4 + $0x218] ss:$24 sps:$4 sm:$0xff]  }
 0x1dd   :  { %2996 = vmatpush1.bf16.msra.mxu0 %v10989_v44  ;;  %13428 = vst [vmem:[#allocation25_spill] sm:$0xff] %v11126_v47 }
 0x1de   :  { %2997 = vmatprep.subr.bf16.mxu0 %v10999_v31 }
 0x1e1   :  { %2998 = vmatpush1.bf16.msra.mxu0 %v11006_v16 }
 0x1e2   :  { %2999 = vmatprep.subr.bf16.mxu0 %v11013_v37 }
 0x1e5   :  { %3000 = vmatpush1.bf16.msra.mxu0 %v11018_v53 }
 0x1e6   :  { %3001 = vmatprep.subr.bf16.mxu0 %v11030_v62 }
 0x1e9   :  { %3002 = vmatpush1.bf16.msra.mxu0 %v11025_v63  ;;  %v2304_v63 = vld [vmem:[#allocation2 + $0x20] ss:$132 sps:$4 sm:$0xff]  }
 0x1ea   :  { %3003 = vmatprep.subr.bf16.mxu0 %v11035_v1 }
 0x1ed   :  { %3004 = vmatpush1.bf16.msra.mxu0 %v11042_v2 }
 0x1ee   :  { %3005 = vmatprep.subr.bf16.mxu0 %v11048_v4 }
 0x1f1   :  { %3006 = vmatpush1.bf16.msra.mxu0 %v11054_v5 }
 0x1f2   :  { %3007 = vmatprep.subr.bf16.mxu0 %v11060_v7 }
 0x1f5   :  { %3008 = vmatpush1.bf16.msra.mxu0 %v11066_v8 }
 0x1f6   :  { %3009 = vmatprep.subr.bf16.mxu0 %v11073_v10 }
 0x1f9   :  { %3010 = vmatpush1.bf16.msra.mxu0 %v11078_v11 }
 0x1fa   :  { %3011 = vmatprep.subr.bf16.mxu0 %v11085_v51 }
 0x1fd   :  { %3012 = vmatpush1.bf16.msra.mxu0 %v11090_v13 }
 0x1fe   :  { %3013 = vmatprep.subr.bf16.mxu0 %v11097_v18 }
 0x201   :  { %3014 = vmatpush1.bf16.msra.mxu0 %v11102_v22 }
 0x202   :  { %3015 = vmatprep.subr.bf16.mxu0 %v11109_v26 }
 0x205   :  { %3016 = vmatpush1.bf16.msra.mxu0 %v11114_v34 }
 0x206   :  { %3017 = vmatprep.subr.bf16.mxu0 %v11121_v56  ;;  %v11150_v56 = vld [vmem:[%s13287_s4 + $0x278] ss:$24 sps:$4 sm:$0xff]  }
 0x207   :  { %13432 = vst [vmem:[#allocation29_spill] sm:$0xff] %v11150_v56 }
 0x209   :  { %3018 = vmatpush1.bf16.msra.mxu0 %v11126_v47  ;;  %v11156_v47 = vld [vmem:[%s13287_s4 + $0x2ac] ss:$24 sps:$4 sm:$0xff]  }
 0x20a   :  { %3019 = vmatprep.subr.bf16.mxu0 %v11131_v55  ;;  %13433 = vst [vmem:[#allocation30_spill] sm:$0xff] %v11156_v47  ;;  %v11162_v55 = vld [vmem:[%s13287_s4 + $0x2a8] ss:$24 sps:$4 sm:$0xff]  }
 0x20b   :  { %13434 = vst [vmem:[#allocation31_spill] sm:$0xff] %v11162_v55 }
 0x20d   :  { %3020 = vmatpush1.bf16.msra.mxu0 %v11138_v52  ;;  %v11168_v52 = vld [vmem:[%s13287_s4 + $0x2dc] ss:$24 sps:$4 sm:$0xff]  }
 0x20e   :  { %3021 = vmatprep.subr.bf16.mxu0 %v11144_v46  ;;  %13435 = vst [vmem:[#allocation32_spill] sm:$0xff] %v11168_v52  ;;  %v11174_v46 = vld [vmem:[%s13287_s4 + $0x2d8] ss:$24 sps:$4 sm:$0xff]  }
 0x20f   :  { %13436 = vst [vmem:[#allocation33_spill] sm:$0xff] %v11174_v46 }
 0x211   :  { %3022 = vmatpush1.bf16.msra.mxu0 %v11150_v56  ;;  %v2303_v56 = vld [vmem:[#allocation2 + $0x18] sm:$0xff] }
 0x212   :  { %3023 = vmatprep.subr.bf16.mxu0 %v11156_v47  ;;  %v2305_v34 = vunpack.c.l.bf16 %v2303_v56  ;;  %v2306_v51 = vunpack.c.h.bf16 %v2303_v56  ;;  %v2307_v56 = vunpack.c.l.bf16 %v2304_v63 }
 0x215   :  { %3024 = vmatpush1.bf16.msra.mxu0 %v11162_v55 }
 0x216   :  { %3025 = vmatprep.subr.bf16.mxu0 %v11168_v52 }
 0x219   :  { %3026 = vmatpush1.bf16.msra.mxu0 %v11174_v46 }
 0x26f   :  { %v2213_v26 = vpop.f32.mrb[36].mxu0  ;;  %v2254_v47 = vpop.f32.mrb[24].mxu1 }
 0x270   :  { %v2314_v22 = vadd.f32 %v2305_v34, %v2213_v26  ;;  %v2215_v18 = vpop.f32.mrb[37].mxu0  ;;  %v2256_v13 = vpop.f32.mrb[25].mxu1  ;;  %v2328_v26 = vadd.f32 %v10717_v60, %v2254_v47  ;;  %v2309_v34 = vld [vmem:[#allocation2 + $0x9c] sm:$0xff] }
 0x271   :  { %v2217_v11 = vpop.f32.mrb[38].mxu0  ;;  %v2258_v10 = vpop.f32.mrb[26].mxu1  ;;  %v2315_v5 = vadd.f32 %v2306_v51, %v2215_v18 }
 0x272   :  { %v7973_v55 = vmul.f32 -1.442695, %v2314_v22  ;;  %v2218_v8 = vpop.f32.mrb[39].mxu0  ;;  %v2259_v7 = vpop.f32.mrb[27].mxu1  ;;  %v2311_v10 = vunpack.c.l.bf16 %v2309_v34 }
 0x273   :  { %v7974_v4 = vmul.f32 -1.442695, %v2315_v5 }
 0x274   :  { %9550 = vpow2.f32 %v7973_v55  ;;  %v2336_v7 = vadd.f32 %v2311_v10, %v2256_v13  ;;  %v2312_v13 = vunpack.c.h.bf16 %v2309_v34 }
 0x275   :  { %9552 = vpow2.f32 %v7974_v4 }
 0x276   :  { %v7975_v51 = vmul.f32 -1.442695, %v2336_v7 }
 0x27e   :  { %v9551_v52 = vpop.eup %9550 }
 0x27f   :  { %v2322_v2 = vadd.f32 1.0, %v9551_v52  ;;  %v9553_v46 = vpop.eup %9552 }
 0x280   :  { %v2323_v1 = vadd.f32 1.0, %v9553_v46  ;;  %v11182_v46 = vsel %vm1590_vm9, %v10727_v58, 0.0 }
 0x281   :  { %9554 = vrcp.f32 %v2322_v2  ;;  %13437 = vst [vmem:[#allocation34_spill] sm:$0xff] %v11182_v46 }
 0x282   :  { %9556 = vrcp.f32 %v2323_v1 }
 0x28b   :  { %v9555_v62 = vpop.eup %9554 }
 0x28c   :  { %v2329_v11 = vmul.f32 %v9555_v62, %v2328_v26  ;;  %v9557_v5 = vpop.eup %9556 }
 0x28d   :  { %v2332_v4 = vsub.f32 1.0, %v9557_v5  ;;  %v2334_v18 = vmul.f32 %v9557_v5, %v11182_v46 }
 0x28e   :  { %v2330_v8 = vadd.f32 %v2329_v11, %v2307_v56 }
 0x290   :  { %9558 = vtanh.f32 %v2330_v8 }
 0x291   :  { %9560 = vpow2.f32 %v7975_v51  ;;  %v2313_v51 = vunpack.c.h.bf16 %v2304_v63 }
 0x29a   :  { %v9559_v52 = vpop.eup %9558 }
 0x29b   :  { %v2333_v2 = vmul.f32 %v9559_v52, %v2332_v4  ;;  %v9561_v62 = vpop.eup %9560 }
 0x29c   :  { %v2344_v1 = vadd.f32 1.0, %v9561_v62 }
 0x29d   :  { %v11185_v22 = vadd.f32 %v2334_v18, %v2333_v2  ;;  %v11188_v2 = vpop.permute.xlu1 %2368 }
 0x29e   :  { %9562 = vrcp.f32 %v2344_v1  ;;  %13439 = vst [vmem:[#allocation36_spill] sm:$0xff] %v11188_v2  ;;  %vm2370_vm13 = vcmp.eq.s32.totalorder %v11188_v2, 1  ;;  %v11899_v2 = vld [vmem:[%s13287_s4 + $0x2ac] ss:$24 sps:$4 sm:$0xff]  }
 0x29f   :  { %13438 = vst [vmem:[#allocation35_spill] sm:$0xff] %v11185_v22 }
 0x2a1   :  { %v11190_v18 = vpop.permute.xlu1 %2360 }
 0x2a2   :  { %13440 = vst [vmem:[#allocation37_spill] sm:$0xff] %v11190_v18  ;;  %vm2362_vm12 = vcmp.eq.s32.totalorder %v11190_v18, 1  ;;  %v11893_v18 = vld [vmem:[%s13287_s4 + $0x278] ss:$24 sps:$4 sm:$0xff]  }
 0x2a8   :  { %v9563_v10 = vpop.eup %9562 }
 0x2af   :  { %v2295_v47 = vpop.f32.mrb[40].mxu0 }
 0x2b0   :  { %v2337_v55 = vadd.f32 %v2312_v13, %v2295_v47  ;;  %v2297_v26 = vpop.f32.mrb[41].mxu0  ;;  %v11195_v13 = vsel %vm1597_vm8, %v10740_v40, 0.0 }
 0x2b1   :  { %v2350_v56 = vadd.f32 %v10732_v59, %v2297_v26  ;;  %v2299_v11 = vpop.f32.mrb[42].mxu0  ;;  %13441 = vst [vmem:[#allocation38_spill] sm:$0xff] %v11195_v13  ;;  %v11206_v26 = vsel %vm2362_vm12, %v11185_v22, %v11182_v46  ;;  %v11869_v46 = vld [vmem:[%s13287_s4 + $0x218] ss:$24 sps:$4 sm:$0xff]   ;;  %v11874_v22 = vld [vmem:[%s13287_s4 + $0x24c] ss:$24 sps:$4 sm:$0xff]  }
 0x2b2   :  { %v7976_v8 = vmul.f32 -1.442695, %v2337_v55  ;;  %v2300_v7 = vpop.f32.mrb[43].mxu0  ;;  %v2376_v11 = vpack.c.bf16 %v11206_v26, %v11206_v26 }
 0x2b3   :  { %v2351_v58 = vmul.f32 %v9563_v10, %v2350_v56  ;;  %v11346_v10 = vld [vmem:[%s13287_s4 + $0xf0] ss:$24 sps:$4 sm:$0xff]   ;;  %v11358_v7 = vld [vmem:[%s13287_s4 + $0x120] ss:$24 sps:$4 sm:$0xff]  }
 0x2b4   :  { %9564 = vpow2.f32 %v7976_v8  ;;  %v11352_v8 = vld [vmem:[%s13287_s4 + $0x124] ss:$24 sps:$4 sm:$0xff]  }
 0x2b5   :  { %v2352_v52 = vadd.f32 %v2351_v58, %v2313_v51  ;;  %v11365_v58 = vld [vmem:[%s13287_s4 + $0x154] ss:$24 sps:$4 sm:$0xff]   ;;  %v11370_v51 = vld [vmem:[%s13287_s4 + $0x150] ss:$24 sps:$4 sm:$0xff]  }
 0x2be   :  { %v9565_v4 = vpop.eup %9564 }
 0x2bf   :  { %v2345_v5 = vadd.f32 1.0, %v9565_v4  ;;  %v11377_v4 = vld [vmem:[%s13287_s4 + $0x184] ss:$24 sps:$4 sm:$0xff]  }
 0x2c1   :  { %9566 = vrcp.f32 %v2345_v5  ;;  %v11382_v5 = vld [vmem:[%s13287_s4 + $0x180] ss:$24 sps:$4 sm:$0xff]  }
 0x2c2   :  { %9568 = vtanh.f32 %v2352_v52  ;;  %v11389_v52 = vld [vmem:[%s13287_s4 + $0x1b4] ss:$24 sps:$4 sm:$0xff]  }
 0x2cb   :  { %v9567_v34 = vpop.eup %9566 }
 0x2cc   :  { %v2354_v62 = vsub.f32 1.0, %v9567_v34  ;;  %v9569_v1 = vpop.eup %9568  ;;  %v2356_v47 = vmul.f32 %v9567_v34, %v11195_v13  ;;  %v11394_v34 = vld [vmem:[%s13287_s4 + $0x1b0] ss:$24 sps:$4 sm:$0xff]  }
 0x2ce   :  { %v2355_v63 = vmul.f32 %v9569_v1, %v2354_v62  ;;  %v11401_v62 = vld [vmem:[%s13287_s4 + $0x1e4] ss:$24 sps:$4 sm:$0xff]   ;;  %v11406_v1 = vld [vmem:[%s13287_s4 + $0x1e0] ss:$24 sps:$4 sm:$0xff]  }
 0x2d0   :  { %v11199_v55 = vadd.f32 %v2356_v47, %v2355_v63  ;;  %v11413_v63 = vld [vmem:[%s13287_s4 + $0x214] ss:$24 sps:$4 sm:$0xff]   ;;  %v11418_v47 = vld [vmem:[%s13287_s4 + $0x210] ss:$24 sps:$4 sm:$0xff]  }
 0x2d2   :  { %13442 = vst [vmem:[#allocation39_spill] sm:$0xff] %v11199_v55  ;;  %v11212_v40 = vsel %vm2370_vm13, %v11199_v55, %v11195_v13  ;;  %v11857_v55 = vld [vmem:[%s13287_s4 + $0x1e8] ss:$24 sps:$4 sm:$0xff]  }
 0x2d3   :  { %v2377_v56 = vpack.c.bf16 %v11212_v40, %v11212_v40 }
 0x2d5   :  { %2986 = vmatprep.mubr.bf16.mxu1 %v2377_v56  ;;  %3027 = vmatprep.mubr.bf16.mxu0 %v2377_v56 }
 0x2d6   :  { %2987 = vmatmul.mubr.bf16.vlgmr.msra.gmra.mrb[28].mxu1 %v2376_v11  ;;  %3028 = vmatmul.mubr.bf16.vlgmr.msra.gmra.mrb[44].mxu0 %v2376_v11 }
 0x2d7   :  { %3037 = vmatpush1.bf16.msra.mxu1 %v10747_v42  ;;  %3068 = vmatprep.mubr.bf16.mxu1 %v2377_v56  ;;  %v13443_v42 = vld [vmem:[#allocation9_spill] sm:$0xff]  ;;  %v11424_v56 = vld [vmem:[%s13287_s4 + $0x244] ss:$24 sps:$4 sm:$0xff]  }
 0x2d8   :  { %3038 = vmatprep.subr.bf16.mxu1 %v10760_v49  ;;  %v13444_v49 = vld [vmem:[#allocation8_spill] sm:$0xff] }
 0x2db   :  { %3039 = vmatpush1.bf16.msra.mxu1 %v10779_v20  ;;  %v13445_v20 = vld [vmem:[#allocation10_spill] sm:$0xff] }
 0x2dc   :  { %3040 = vmatprep.subr.bf16.mxu1 %v10785_v57  ;;  %v13446_v57 = vld [vmem:[#allocation11_spill] sm:$0xff] }
 0x2df   :  { %3041 = vmatpush1.bf16.msra.mxu1 %v10793_v50  ;;  %v13447_v50 = vld [vmem:[#allocation12_spill] sm:$0xff] }
 0x2e0   :  { %3042 = vmatprep.subr.bf16.mxu1 %v10799_v48  ;;  %v13448_v48 = vld [vmem:[#allocation13_spill] sm:$0xff] }
 0x2e3   :  { %3043 = vmatpush1.bf16.msra.mxu1 %v10807_v17  ;;  %v13449_v17 = vld [vmem:[#allocation14_spill] sm:$0xff] }
 0x2e4   :  { %3044 = vmatprep.subr.bf16.mxu1 %v10813_v19  ;;  %v13450_v19 = vld [vmem:[#allocation15_spill] sm:$0xff] }
 0x2e7   :  { %3045 = vmatpush1.bf16.msra.mxu1 %v10821_v21  ;;  %v13451_v21 = vld [vmem:[#allocation16_spill] sm:$0xff] }
 0x2e8   :  { %3046 = vmatprep.subr.bf16.mxu1 %v10827_v23  ;;  %v13452_v23 = vld [vmem:[#allocation17_spill] sm:$0xff] }
 0x2eb   :  { %3047 = vmatpush1.bf16.msra.mxu1 %v10835_v25  ;;  %v13453_v25 = vld [vmem:[#allocation18_spill] sm:$0xff] }
 0x2ec   :  { %3048 = vmatprep.subr.bf16.mxu1 %v10841_v27  ;;  %v13454_v27 = vld [vmem:[#allocation19_spill] sm:$0xff] }
 0x2ef   :  { %3049 = vmatpush1.bf16.msra.mxu1 %v10849_v29  ;;  %v13455_v29 = vld [vmem:[#allocation20_spill] sm:$0xff] }
 0x2f0   :  { %3050 = vmatprep.subr.bf16.mxu1 %v10855_v33  ;;  %v13456_v33 = vld [vmem:[#allocation21_spill] sm:$0xff] }
 0x2f3   :  { %3051 = vmatpush1.bf16.msra.mxu1 %v10863_v35  ;;  %v13457_v35 = vld [vmem:[#allocation22_spill] sm:$0xff] }
 0x2f4   :  { %3052 = vmatprep.subr.bf16.mxu1 %v10869_v41  ;;  %v13458_v41 = vld [vmem:[#allocation23_spill] sm:$0xff] }
 0x2f5   :  { %13484 = vst [vmem:[#allocation23_spill] sm:$0xff] %v11857_v55 }
 0x2f7   :  { %3053 = vmatpush1.bf16.msra.mxu1 %v10877_v39  ;;  %v13459_v39 = vld [vmem:[#allocation24_spill] sm:$0xff] }
 0x2f8   :  { %3054 = vmatprep.subr.bf16.mxu1 %v10883_v43  ;;  %v13460_v43 = vld [vmem:[#allocation25_spill] sm:$0xff] }
 0x2f9   :  { %13486 = vst [vmem:[#allocation25_spill] sm:$0xff] %v11869_v46 }
 0x2fb   :  { %3055 = vmatpush1.bf16.msra.mxu1 %v10891_v54  ;;  %v13461_v54 = vld [vmem:[#allocation26_spill] sm:$0xff] }
 0x2fc   :  { %3056 = vmatprep.subr.bf16.mxu1 %v10897_v61  ;;  %v13462_v61 = vld [vmem:[#allocation27_spill] sm:$0xff]  ;;  %13487 = vst [vmem:[#allocation26_spill] sm:$0xff] %v11874_v22 }
 0x2fd   :  { %13488 = vst [vmem:[#allocation27_spill] sm:$0xff] %v11881_v38 }
 0x2ff   :  { %3057 = vmatpush1.bf16.msra.mxu1 %v10905_v0  ;;  %v13463_v0 = vld [vmem:[#allocation28_spill] sm:$0xff] }
 0x300   :  { %3058 = vmatprep.subr.bf16.mxu1 %v10911_v14  ;;  %v11279_v14 = vld [vmem:[%s13287_s4] ss:$24 sps:$4 sm:$0xff]   ;;  %13489 = vst [vmem:[#allocation28_spill] sm:$0xff] %v11887_v12 }
 0x303   :  { %3059 = vmatpush1.bf16.msra.mxu1 %v10919_v24  ;;  %v9076_v24 = vld [vmem:[%s13287_s4 + $0x4] ss:$24 sps:$4 sm:$0xff]  }
 0x304   :  { %3060 = vmatprep.subr.bf16.mxu1 %v10925_v30  ;;  %v11287_v30 = vld [vmem:[%s13287_s4 + $0x34] ss:$24 sps:$4 sm:$0xff]   ;;  %3729 = vmatprep.subr.bf16.mxu0 %v9076_v24 }
 0x305   :  { %3730 = vmatpush1.bf16.msra.mxu0 %v11279_v14 }
 0x306   :  { %3731 = vmatprep.subr.bf16.mxu0 %v11287_v30 }
 0x307   :  { %3061 = vmatpush1.bf16.msra.mxu1 %v10933_v36  ;;  %v13464_v36 = vld [vmem:[#allocation29_spill] sm:$0xff] }
 0x308   :  { %3062 = vmatprep.subr.bf16.mxu1 %v10939_v45  ;;  %v13465_v45 = vld [vmem:[#allocation30_spill] sm:$0xff]  ;;  %13490 = vst [vmem:[#allocation29_spill] sm:$0xff] %v11893_v18 }
 0x309   :  { %13491 = vst [vmem:[#allocation30_spill] sm:$0xff] %v11899_v2 }
 0x30b   :  { %3063 = vmatpush1.bf16.msra.mxu1 %v10947_v3  ;;  %v11295_v3 = vld [vmem:[%s13287_s4 + $0x30] ss:$24 sps:$4 sm:$0xff]  }
 0x30c   :  { %3064 = vmatprep.subr.bf16.mxu1 %v10953_v6  ;;  %v11301_v6 = vld [vmem:[%s13287_s4 + $0x64] ss:$24 sps:$4 sm:$0xff]   ;;  %3732 = vmatpush1.bf16.msra.mxu0 %v11295_v3 }
 0x30d   :  { %3733 = vmatprep.subr.bf16.mxu0 %v11301_v6 }
 0x30f   :  { %3065 = vmatpush1.bf16.msra.mxu1 %v10961_v9  ;;  %v13466_v9 = vld [vmem:[#allocation31_spill] sm:$0xff] }
 0x310   :  { %3066 = vmatprep.subr.bf16.mxu1 %v10967_v32  ;;  %v13467_v32 = vld [vmem:[#allocation32_spill] sm:$0xff] }
 0x313   :  { %3067 = vmatpush1.bf16.msra.mxu1 %v10975_v28  ;;  %v11309_v28 = vld [vmem:[%s13287_s4 + $0x60] ss:$24 sps:$4 sm:$0xff]  }
 0x314   :  { %3770 = vmatprep.subr.bf16.mxu1 %v10994_v15  ;;  %v13468_v15 = vld [vmem:[#allocation33_spill] sm:$0xff]  ;;  %3734 = vmatpush1.bf16.msra.mxu0 %v11309_v28 }
 0x316   :  { %3069 = vmatmul.mubr.bf16.vlgmr.msra.gmra.mrb[32].mxu1 %v2376_v11  ;;  %v11430_v11 = vld [vmem:[%s13287_s4 + $0x240] ss:$24 sps:$4 sm:$0xff]  }
 0x317   :  { %3771 = vmatpush1.bf16.msra.mxu1 %v10989_v44  ;;  %v11315_v44 = vld [vmem:[%s13287_s4 + $0x94] ss:$24 sps:$4 sm:$0xff]  }
 0x318   :  { %3772 = vmatprep.subr.bf16.mxu1 %v10999_v31  ;;  %v11322_v31 = vld [vmem:[%s13287_s4 + $0x90] ss:$24 sps:$4 sm:$0xff]   ;;  %3735 = vmatprep.subr.bf16.mxu0 %v11315_v44 }
 0x319   :  { %3736 = vmatpush1.bf16.msra.mxu0 %v11322_v31 }
 0x31b   :  { %3773 = vmatpush1.bf16.msra.mxu1 %v11006_v16  ;;  %v11328_v16 = vld [vmem:[%s13287_s4 + $0xc4] ss:$24 sps:$4 sm:$0xff]  }
 0x31c   :  { %3774 = vmatprep.subr.bf16.mxu1 %v11013_v37  ;;  %v11334_v37 = vld [vmem:[%s13287_s4 + $0xc0] ss:$24 sps:$4 sm:$0xff]   ;;  %3737 = vmatprep.subr.bf16.mxu0 %v11328_v16 }
 0x31d   :  { %3738 = vmatpush1.bf16.msra.mxu0 %v11334_v37 }
 0x31f   :  { %3775 = vmatpush1.bf16.msra.mxu1 %v11018_v53  ;;  %v11340_v53 = vld [vmem:[%s13287_s4 + $0xf4] ss:$24 sps:$4 sm:$0xff]  }
 0x320   :  { %3776 = vmatprep.subr.bf16.mxu1 %v13443_v42  ;;  %3739 = vmatprep.subr.bf16.mxu0 %v11340_v53  ;;  %v11436_v42 = vld [vmem:[%s13287_s4 + $0x274] ss:$24 sps:$4 sm:$0xff]  }
 0x321   :  { %3740 = vmatpush1.bf16.msra.mxu0 %v11346_v10 }
 0x322   :  { %3741 = vmatprep.subr.bf16.mxu0 %v11352_v8 }
 0x323   :  { %3777 = vmatpush1.bf16.msra.mxu1 %v13444_v49  ;;  %v11442_v49 = vld [vmem:[%s13287_s4 + $0x270] ss:$24 sps:$4 sm:$0xff]  }
 0x324   :  { %3778 = vmatprep.subr.bf16.mxu1 %v13445_v20  ;;  %v11448_v20 = vld [vmem:[%s13287_s4 + $0x2a4] ss:$24 sps:$4 sm:$0xff]  }
 0x325   :  { %3742 = vmatpush1.bf16.msra.mxu0 %v11358_v7 }
 0x326   :  { %3743 = vmatprep.subr.bf16.mxu0 %v11365_v58 }
 0x327   :  { %3779 = vmatpush1.bf16.msra.mxu1 %v13446_v57  ;;  %v11454_v57 = vld [vmem:[%s13287_s4 + $0x2a0] ss:$24 sps:$4 sm:$0xff]  }
 0x328   :  { %3780 = vmatprep.subr.bf16.mxu1 %v13447_v50  ;;  %v11460_v50 = vld [vmem:[%s13287_s4 + $0x2d4] ss:$24 sps:$4 sm:$0xff]  }
 0x329   :  { %3744 = vmatpush1.bf16.msra.mxu0 %v11370_v51 }
 0x32a   :  { %3745 = vmatprep.subr.bf16.mxu0 %v11377_v4 }
 0x32b   :  { %3781 = vmatpush1.bf16.msra.mxu1 %v13448_v48  ;;  %v11466_v48 = vld [vmem:[%s13287_s4 + $0x2d0] ss:$24 sps:$4 sm:$0xff]  }
 0x32c   :  { %3782 = vmatprep.subr.bf16.mxu1 %v13449_v17  ;;  %v11473_v17 = vld [vmem:[%s13287_s4 + $0x14] ss:$24 sps:$4 sm:$0xff]  }
 0x32d   :  { %3746 = vmatpush1.bf16.msra.mxu0 %v11382_v5 }
 0x32e   :  { %3747 = vmatprep.subr.bf16.mxu0 %v11389_v52 }
 0x32f   :  { %3783 = vmatpush1.bf16.msra.mxu1 %v13450_v19  ;;  %v3078_v19 = vld [vmem:[#allocation2 + $0x30] sm:$0xff] }
 0x330   :  { %3784 = vmatprep.subr.bf16.mxu1 %v13451_v21  ;;  %v3080_v21 = vunpack.c.l.bf16 %v3078_v19 }
 0x331   :  { %3748 = vmatpush1.bf16.msra.mxu0 %v11394_v34 }
 0x332   :  { %3749 = vmatprep.subr.bf16.mxu0 %v11401_v62 }
 0x333   :  { %3785 = vmatpush1.bf16.msra.mxu1 %v13452_v23 }
 0x334   :  { %3786 = vmatprep.subr.bf16.mxu1 %v13453_v25 }
 0x335   :  { %3750 = vmatpush1.bf16.msra.mxu0 %v11406_v1 }
 0x336   :  { %3751 = vmatprep.subr.bf16.mxu0 %v11413_v63 }
 0x337   :  { %3787 = vmatpush1.bf16.msra.mxu1 %v13454_v27 }
 0x338   :  { %3788 = vmatprep.subr.bf16.mxu1 %v13455_v29 }
 0x339   :  { %3752 = vmatpush1.bf16.msra.mxu0 %v11418_v47 }
 0x33a   :  { %3753 = vmatprep.subr.bf16.mxu0 %v11424_v56 }
 0x33b   :  { %3789 = vmatpush1.bf16.msra.mxu1 %v13456_v33 }
 0x33c   :  { %3790 = vmatprep.subr.bf16.mxu1 %v13457_v35  ;;  %v3081_v35 = vunpack.c.h.bf16 %v3078_v19 }
 0x33d   :  { %3754 = vmatpush1.bf16.msra.mxu0 %v11430_v11 }
 0x33e   :  { %3755 = vmatprep.subr.bf16.mxu0 %v11436_v42 }
 0x33f   :  { %3791 = vmatpush1.bf16.msra.mxu1 %v13458_v41 }
 0x340   :  { %3792 = vmatprep.subr.bf16.mxu1 %v13459_v39 }
 0x341   :  { %3756 = vmatpush1.bf16.msra.mxu0 %v11442_v49 }
 0x342   :  { %3757 = vmatprep.subr.bf16.mxu0 %v11448_v20 }
 0x343   :  { %3793 = vmatpush1.bf16.msra.mxu1 %v13460_v43 }
 0x344   :  { %3794 = vmatprep.subr.bf16.mxu1 %v13461_v54 }
 0x345   :  { %3758 = vmatpush1.bf16.msra.mxu0 %v11454_v57 }
 0x346   :  { %3759 = vmatprep.subr.bf16.mxu0 %v11460_v50 }
 0x347   :  { %3795 = vmatpush1.bf16.msra.mxu1 %v13462_v61 }
 0x348   :  { %3796 = vmatprep.subr.bf16.mxu1 %v13463_v0 }
 0x349   :  { %3760 = vmatpush1.bf16.msra.mxu0 %v11466_v48 }
 0x34a   :  { %3811 = vmatprep.subr.bf16.mxu0 %v11473_v17 }
 0x34b   :  { %3797 = vmatpush1.bf16.msra.mxu1 %v13464_v36 }
 0x34c   :  { %3798 = vmatprep.subr.bf16.mxu1 %v13465_v45 }
 0x34f   :  { %3799 = vmatpush1.bf16.msra.mxu1 %v13466_v9 }
 0x350   :  { %3800 = vmatprep.subr.bf16.mxu1 %v13467_v32 }
 0x353   :  { %3801 = vmatpush1.bf16.msra.mxu1 %v13468_v15  ;;  %v3079_v15 = vld [vmem:[#allocation2 + $0x38] ss:$84 sps:$4 sm:$0xff]  }
 0x354   :  { %4504 = vmatprep.subr.bf16.mxu1 %v9076_v24  ;;  %v3082_v19 = vunpack.c.l.bf16 %v3079_v15 }
 0x3a9   :  { %v2988_v23 = vpop.f32.mrb[28].mxu1  ;;  %v3029_v25 = vpop.f32.mrb[44].mxu0 }
 0x3aa   :  { %v3089_v27 = vadd.f32 %v3080_v21, %v2988_v23  ;;  %v2990_v29 = vpop.f32.mrb[29].mxu1  ;;  %v3031_v33 = vpop.f32.mrb[45].mxu0  ;;  %v3103_v21 = vadd.f32 %v10717_v60, %v3029_v25  ;;  %v3084_v23 = vld [vmem:[#allocation2 + $0x84] sm:$0xff] }
 0x3ab   :  { %v2992_v41 = vpop.f32.mrb[30].mxu1  ;;  %v3033_v39 = vpop.f32.mrb[46].mxu0  ;;  %v3090_v0 = vadd.f32 %v3081_v35, %v2990_v29 }
 0x3ac   :  { %v8073_v43 = vmul.f32 -1.442695, %v3089_v27  ;;  %v2993_v54 = vpop.f32.mrb[31].mxu1  ;;  %v3034_v61 = vpop.f32.mrb[47].mxu0  ;;  %v3086_v27 = vunpack.c.l.bf16 %v3084_v23 }
 0x3ad   :  { %v8074_v24 = vmul.f32 -1.442695, %v3090_v0 }
 0x3ae   :  { %9570 = vpow2.f32 %v8073_v43  ;;  %v3111_v54 = vadd.f32 %v3086_v27, %v3031_v33 }
 0x3af   :  { %9572 = vpow2.f32 %v8074_v24 }
 0x3b0   :  { %v8075_v29 = vmul.f32 -1.442695, %v3111_v54  ;;  %v3088_v54 = vunpack.c.h.bf16 %v3079_v15 }
 0x3b8   :  { %v9571_v36 = vpop.eup %9570 }
 0x3b9   :  { %v3097_v45 = vadd.f32 1.0, %v9571_v36  ;;  %v9573_v9 = vpop.eup %9572 }
 0x3ba   :  { %v3098_v32 = vadd.f32 1.0, %v9573_v9 }
 0x3bb   :  { %9574 = vrcp.f32 %v3097_v45  ;;  %v3087_v45 = vunpack.c.h.bf16 %v3084_v23 }
 0x3bc   :  { %9576 = vrcp.f32 %v3098_v32 }
 0x3c5   :  { %v9575_v13 = vpop.eup %9574 }
 0x3c6   :  { %v3104_v41 = vmul.f32 %v9575_v13, %v3103_v21  ;;  %v9577_v35 = vpop.eup %9576 }
 0x3c7   :  { %v3107_v43 = vsub.f32 1.0, %v9577_v35  ;;  %v3109_v0 = vmul.f32 %v9577_v35, %v11206_v26 }
 0x3c8   :  { %v3105_v39 = vadd.f32 %v3104_v41, %v3082_v19 }
 0x3ca   :  { %9578 = vtanh.f32 %v3105_v39 }
 0x3cb   :  { %9580 = vpow2.f32 %v8075_v29 }
 0x3d4   :  { %v9579_v61 = vpop.eup %9578 }
 0x3d5   :  { %v3108_v24 = vmul.f32 %v9579_v61, %v3107_v43  ;;  %v9581_v60 = vpop.eup %9580 }
 0x3d6   :  { %v3119_v25 = vadd.f32 1.0, %v9581_v60 }
 0x3d7   :  { %v11478_v36 = vadd.f32 %v3109_v0, %v3108_v24 }
 0x3d8   :  { %9582 = vrcp.f32 %v3119_v25  ;;  %v11482_v25 = vpop.permute.xlu1 %3135 }
 0x3d9   :  { %13469 = vst [vmem:[#allocation9_spill] sm:$0xff] %v11478_v36  ;;  %13470 = vst [vmem:[#allocation8_spill] sm:$0xff] %v11482_v25  ;;  %vm3137_vm14 = vcmp.eq.s32.totalorder %v11482_v25, 1  ;;  %v11905_v25 = vld [vmem:[%s13287_s4 + $0x2a8] ss:$24 sps:$4 sm:$0xff]  }
 0x3da   :  { %v11494_v15 = vsel %vm3137_vm14, %v11478_v36, %v11206_v26  ;;  %v11516_v26 = vld [vmem:[%s13287_s4 + $0x44] ss:$24 sps:$4 sm:$0xff]   ;;  %13492 = vst [vmem:[#allocation31_spill] sm:$0xff] %v11905_v25 }
 0x3db   :  { %v11864_v36 = vld [vmem:[%s13287_s4 + $0x21c] ss:$24 sps:$4 sm:$0xff]  }
 0x3dc   :  { %13485 = vst [vmem:[#allocation24_spill] sm:$0xff] %v11864_v36 }
 0x3e2   :  { %v9583_v19 = vpop.eup %9582 }
 0x3e9   :  { %v3070_v13 = vpop.f32.mrb[32].mxu1 }
 0x3ea   :  { %v3112_v9 = vadd.f32 %v3087_v45, %v3070_v13  ;;  %v3072_v32 = vpop.f32.mrb[33].mxu1 }
 0x3eb   :  { %v3125_v33 = vadd.f32 %v10732_v59, %v3072_v32  ;;  %v3074_v21 = vpop.f32.mrb[34].mxu1  ;;  %v11484_v59 = vpop.permute.xlu0 %3143  ;;  %v11507_v32 = vld [vmem:[%s13287_s4 + $0x10] ss:$24 sps:$4 sm:$0xff]  }
 0x3ec   :  { %v8076_v41 = vmul.f32 -1.442695, %v3112_v9  ;;  %v3075_v27 = vpop.f32.mrb[35].mxu1  ;;  %13471 = vst [vmem:[#allocation10_spill] sm:$0xff] %v11484_v59  ;;  %vm3145_vm15 = vcmp.eq.s32.totalorder %v11484_v59, 1 }
 0x3ed   :  { %v3126_v39 = vmul.f32 %v9583_v19, %v3125_v33  ;;  %v11511_v33 = vpack.c.bf16 %v11494_v15, %v11494_v15  ;;  %v11530_v21 = vld [vmem:[%s13287_s4 + $0x74] ss:$24 sps:$4 sm:$0xff]   ;;  %v11538_v19 = vld [vmem:[%s13287_s4 + $0x70] ss:$24 sps:$4 sm:$0xff]  }
 0x3ee   :  { %9584 = vpow2.f32 %v8076_v41  ;;  %v11544_v41 = vld [vmem:[%s13287_s4 + $0xa4] ss:$24 sps:$4 sm:$0xff]   ;;  %v11773_v27 = vld [vmem:[%s13287_s4 + $0x98] ss:$24 sps:$4 sm:$0xff]  }
 0x3ef   :  { %v3127_v43 = vadd.f32 %v3126_v39, %v3088_v54  ;;  %v11779_v39 = vld [vmem:[%s13287_s4 + $0xcc] ss:$24 sps:$4 sm:$0xff]   ;;  %v11785_v54 = vld [vmem:[%s13287_s4 + $0xc8] ss:$24 sps:$4 sm:$0xff]   ;;  %v11911_v59 = vld [vmem:[%s13287_s4 + $0x2dc] ss:$24 sps:$4 sm:$0xff]  }
 0x3f0   :  { %13493 = vst [vmem:[#allocation32_spill] sm:$0xff] %v11911_v59 }
 0x3f8   :  { %v9585_v29 = vpop.eup %9584 }
 0x3f9   :  { %v3120_v35 = vadd.f32 1.0, %v9585_v29  ;;  %v11791_v29 = vld [vmem:[%s13287_s4 + $0xfc] ss:$24 sps:$4 sm:$0xff]  }
 0x3fa   :  { %13473 = vst [vmem:[#allocation12_spill] sm:$0xff] %v11791_v29 }
 0x3fb   :  { %9586 = vrcp.f32 %v3120_v35  ;;  %v11797_v35 = vld [vmem:[%s13287_s4 + $0xf8] ss:$24 sps:$4 sm:$0xff]  }
 0x3fc   :  { %9588 = vtanh.f32 %v3127_v43  ;;  %13474 = vst [vmem:[#allocation13_spill] sm:$0xff] %v11797_v35  ;;  %v11803_v43 = vld [vmem:[%s13287_s4 + $0x12c] ss:$24 sps:$4 sm:$0xff]  }
 0x3fd   :  { %13475 = vst [vmem:[#allocation14_spill] sm:$0xff] %v11803_v43 }
 0x405   :  { %v9587_v61 = vpop.eup %9586 }
 0x406   :  { %v3129_v0 = vsub.f32 1.0, %v9587_v61  ;;  %v9589_v23 = vpop.eup %9588  ;;  %v3131_v60 = vmul.f32 %v9587_v61, %v11212_v40  ;;  %v11809_v61 = vld [vmem:[%s13287_s4 + $0x128] ss:$24 sps:$4 sm:$0xff]  }
 0x407   :  { %13476 = vst [vmem:[#allocation15_spill] sm:$0xff] %v11809_v61 }
 0x408   :  { %v3130_v24 = vmul.f32 %v9589_v23, %v3129_v0  ;;  %v11816_v0 = vld [vmem:[%s13287_s4 + $0x15c] ss:$24 sps:$4 sm:$0xff]   ;;  %v11821_v23 = vld [vmem:[%s13287_s4 + $0x158] ss:$24 sps:$4 sm:$0xff]  }
 0x409   :  { %13477 = vst [vmem:[#allocation16_spill] sm:$0xff] %v11816_v0  ;;  %13478 = vst [vmem:[#allocation17_spill] sm:$0xff] %v11821_v23 }
 0x40a   :  { %v11487_v45 = vadd.f32 %v3131_v60, %v3130_v24  ;;  %v11828_v24 = vld [vmem:[%s13287_s4 + $0x18c] ss:$24 sps:$4 sm:$0xff]   ;;  %v11833_v60 = vld [vmem:[%s13287_s4 + $0x188] ss:$24 sps:$4 sm:$0xff]  }
 0x40b   :  { %13479 = vst [vmem:[#allocation18_spill] sm:$0xff] %v11828_v24  ;;  %13480 = vst [vmem:[#allocation19_spill] sm:$0xff] %v11833_v60 }
 0x40c   :  { %13472 = vst [vmem:[#allocation11_spill] sm:$0xff] %v11487_v45  ;;  %v11500_v13 = vsel %vm3145_vm15, %v11487_v45, %v11212_v40  ;;  %v11524_v40 = vld [vmem:[%s13287_s4 + $0x40] ss:$24 sps:$4 sm:$0xff]   ;;  %v11852_v45 = vld [vmem:[%s13287_s4 + $0x1ec] ss:$24 sps:$4 sm:$0xff]  }
 0x40d   :  { %v3152_v9 = vpack.c.bf16 %v11500_v13, %v11500_v13  ;;  %13483 = vst [vmem:[#allocation22_spill] sm:$0xff] %v11852_v45 }
 0x40f   :  { %3761 = vmatprep.mubr.bf16.mxu0 %v3152_v9  ;;  %3802 = vmatprep.mubr.bf16.mxu1 %v3152_v9 }
 0x410   :  { %3762 = vmatmul.mubr.bf16.vlgmr.msra.gmra.mrb[48].mxu0 %v11511_v33  ;;  %3803 = vmatmul.mubr.bf16.vlgmr.msra.gmra.mrb[36].mxu1 %v11511_v33 }
 0x411   :  { %3812 = vmatpush1.bf16.msra.mxu0 %v11507_v32  ;;  %3843 = vmatprep.mubr.bf16.mxu0 %v3152_v9  ;;  %v11840_v9 = vld [vmem:[%s13287_s4 + $0x1bc] ss:$24 sps:$4 sm:$0xff]  }
 0x412   :  { %3813 = vmatprep.subr.bf16.mxu0 %v11516_v26  ;;  %4505 = vmatpush1.bf16.msra.mxu1 %v11279_v14  ;;  %v11552_v14 = vld [vmem:[%s13287_s4 + $0xa0] ss:$24 sps:$4 sm:$0xff]   ;;  %13481 = vst [vmem:[#allocation20_spill] sm:$0xff] %v11840_v9 }
 0x413   :  { %4506 = vmatprep.subr.bf16.mxu1 %v11287_v30  ;;  %v11558_v30 = vld [vmem:[%s13287_s4 + $0xd4] ss:$24 sps:$4 sm:$0xff]  }
 0x415   :  { %3814 = vmatpush1.bf16.msra.mxu0 %v11524_v40 }
 0x416   :  { %3815 = vmatprep.subr.bf16.mxu0 %v11530_v21  ;;  %4507 = vmatpush1.bf16.msra.mxu1 %v11295_v3  ;;  %v11566_v3 = vld [vmem:[%s13287_s4 + $0xd0] ss:$24 sps:$4 sm:$0xff]  }
 0x417   :  { %4508 = vmatprep.subr.bf16.mxu1 %v11301_v6  ;;  %v11572_v6 = vld [vmem:[%s13287_s4 + $0x104] ss:$24 sps:$4 sm:$0xff]  }
 0x419   :  { %3816 = vmatpush1.bf16.msra.mxu0 %v11538_v19 }
 0x41a   :  { %3817 = vmatprep.subr.bf16.mxu0 %v11544_v41  ;;  %4509 = vmatpush1.bf16.msra.mxu1 %v11309_v28  ;;  %v11580_v28 = vld [vmem:[%s13287_s4 + $0x100] ss:$24 sps:$4 sm:$0xff]  }
 0x41b   :  { %4510 = vmatprep.subr.bf16.mxu1 %v11315_v44  ;;  %v11586_v44 = vld [vmem:[%s13287_s4 + $0x134] ss:$24 sps:$4 sm:$0xff]  }
 0x41d   :  { %3818 = vmatpush1.bf16.msra.mxu0 %v11552_v14 }
 0x41e   :  { %3819 = vmatprep.subr.bf16.mxu0 %v11558_v30  ;;  %4511 = vmatpush1.bf16.msra.mxu1 %v11322_v31  ;;  %v11594_v31 = vld [vmem:[%s13287_s4 + $0x130] ss:$24 sps:$4 sm:$0xff]  }
 0x41f   :  { %4512 = vmatprep.subr.bf16.mxu1 %v11328_v16  ;;  %v11600_v16 = vld [vmem:[%s13287_s4 + $0x164] ss:$24 sps:$4 sm:$0xff]  }
 0x421   :  { %3820 = vmatpush1.bf16.msra.mxu0 %v11566_v3 }
 0x422   :  { %3821 = vmatprep.subr.bf16.mxu0 %v11572_v6  ;;  %4513 = vmatpush1.bf16.msra.mxu1 %v11334_v37  ;;  %v11608_v37 = vld [vmem:[%s13287_s4 + $0x160] ss:$24 sps:$4 sm:$0xff]  }
 0x423   :  { %4514 = vmatprep.subr.bf16.mxu1 %v11340_v53  ;;  %v11614_v53 = vld [vmem:[%s13287_s4 + $0x194] ss:$24 sps:$4 sm:$0xff]  }
 0x425   :  { %3822 = vmatpush1.bf16.msra.mxu0 %v11580_v28 }
 0x426   :  { %3823 = vmatprep.subr.bf16.mxu0 %v11586_v44  ;;  %4515 = vmatpush1.bf16.msra.mxu1 %v11346_v10  ;;  %v11622_v10 = vld [vmem:[%s13287_s4 + $0x190] ss:$24 sps:$4 sm:$0xff]  }
 0x427   :  { %4516 = vmatprep.subr.bf16.mxu1 %v11352_v8  ;;  %v11628_v8 = vld [vmem:[%s13287_s4 + $0x1c4] ss:$24 sps:$4 sm:$0xff]  }
 0x429   :  { %3824 = vmatpush1.bf16.msra.mxu0 %v11594_v31 }
 0x42a   :  { %3825 = vmatprep.subr.bf16.mxu0 %v11600_v16  ;;  %4517 = vmatpush1.bf16.msra.mxu1 %v11358_v7  ;;  %v11636_v7 = vld [vmem:[%s13287_s4 + $0x1c0] ss:$24 sps:$4 sm:$0xff]  }
 0x42b   :  { %4518 = vmatprep.subr.bf16.mxu1 %v11365_v58  ;;  %v11642_v58 = vld [vmem:[%s13287_s4 + $0x1f4] ss:$24 sps:$4 sm:$0xff]  }
 0x42d   :  { %3826 = vmatpush1.bf16.msra.mxu0 %v11608_v37 }
 0x42e   :  { %3827 = vmatprep.subr.bf16.mxu0 %v11614_v53  ;;  %4519 = vmatpush1.bf16.msra.mxu1 %v11370_v51  ;;  %v11650_v51 = vld [vmem:[%s13287_s4 + $0x1f0] ss:$24 sps:$4 sm:$0xff]  }
 0x42f   :  { %4520 = vmatprep.subr.bf16.mxu1 %v11377_v4  ;;  %v11656_v4 = vld [vmem:[%s13287_s4 + $0x224] ss:$24 sps:$4 sm:$0xff]  }
 0x431   :  { %3828 = vmatpush1.bf16.msra.mxu0 %v11622_v10 }
 0x432   :  { %3829 = vmatprep.subr.bf16.mxu0 %v11628_v8  ;;  %4521 = vmatpush1.bf16.msra.mxu1 %v11382_v5  ;;  %v11664_v5 = vld [vmem:[%s13287_s4 + $0x220] ss:$24 sps:$4 sm:$0xff]  }
 0x433   :  { %4522 = vmatprep.subr.bf16.mxu1 %v11389_v52  ;;  %v11670_v52 = vld [vmem:[%s13287_s4 + $0x254] ss:$24 sps:$4 sm:$0xff]  }
 0x435   :  { %3830 = vmatpush1.bf16.msra.mxu0 %v11636_v7 }
 0x436   :  { %3831 = vmatprep.subr.bf16.mxu0 %v11642_v58  ;;  %4523 = vmatpush1.bf16.msra.mxu1 %v11394_v34  ;;  %v11678_v34 = vld [vmem:[%s13287_s4 + $0x250] ss:$24 sps:$4 sm:$0xff]  }
 0x437   :  { %4524 = vmatprep.subr.bf16.mxu1 %v11401_v62  ;;  %v11684_v62 = vld [vmem:[%s13287_s4 + $0x284] ss:$24 sps:$4 sm:$0xff]  }
 0x439   :  { %3832 = vmatpush1.bf16.msra.mxu0 %v11650_v51 }
 0x43a   :  { %3833 = vmatprep.subr.bf16.mxu0 %v11656_v4  ;;  %4525 = vmatpush1.bf16.msra.mxu1 %v11406_v1  ;;  %v11692_v1 = vld [vmem:[%s13287_s4 + $0x280] ss:$24 sps:$4 sm:$0xff]  }
 0x43b   :  { %4526 = vmatprep.subr.bf16.mxu1 %v11413_v63  ;;  %v11698_v63 = vld [vmem:[%s13287_s4 + $0x2b4] ss:$24 sps:$4 sm:$0xff]  }
 0x43d   :  { %3834 = vmatpush1.bf16.msra.mxu0 %v11664_v5 }
 0x43e   :  { %3835 = vmatprep.subr.bf16.mxu0 %v11670_v52  ;;  %4527 = vmatpush1.bf16.msra.mxu1 %v11418_v47  ;;  %v11706_v47 = vld [vmem:[%s13287_s4 + $0x2b0] ss:$24 sps:$4 sm:$0xff]  }
 0x43f   :  { %4528 = vmatprep.subr.bf16.mxu1 %v11424_v56  ;;  %v11712_v56 = vld [vmem:[%s13287_s4 + $0x2e4] ss:$24 sps:$4 sm:$0xff]  }
 0x441   :  { %3836 = vmatpush1.bf16.msra.mxu0 %v11678_v34 }
 0x442   :  { %3837 = vmatprep.subr.bf16.mxu0 %v11684_v62  ;;  %4529 = vmatpush1.bf16.msra.mxu1 %v11430_v11  ;;  %v11720_v11 = vld [vmem:[%s13287_s4 + $0x2e0] ss:$24 sps:$4 sm:$0xff]  }
 0x443   :  { %4530 = vmatprep.subr.bf16.mxu1 %v11436_v42  ;;  %v11732_v42 = vld [vmem:[%s13287_s4 + $0x8] ss:$24 sps:$4 sm:$0xff]  }
 0x445   :  { %3838 = vmatpush1.bf16.msra.mxu0 %v11692_v1 }
 0x446   :  { %3839 = vmatprep.subr.bf16.mxu0 %v11698_v63  ;;  %4531 = vmatpush1.bf16.msra.mxu1 %v11442_v49  ;;  %v11737_v49 = vld [vmem:[%s13287_s4 + $0xc] ss:$24 sps:$4 sm:$0xff]  }
 0x447   :  { %4532 = vmatprep.subr.bf16.mxu1 %v11448_v20  ;;  %v11742_v20 = vld [vmem:[%s13287_s4 + $0x3c] ss:$24 sps:$4 sm:$0xff]  }
 0x449   :  { %3840 = vmatpush1.bf16.msra.mxu0 %v11706_v47 }
 0x44a   :  { %3841 = vmatprep.subr.bf16.mxu0 %v11712_v56  ;;  %4533 = vmatpush1.bf16.msra.mxu1 %v11454_v57  ;;  %v11749_v57 = vld [vmem:[%s13287_s4 + $0x38] ss:$24 sps:$4 sm:$0xff]  }
 0x44b   :  { %4534 = vmatprep.subr.bf16.mxu1 %v11460_v50  ;;  %v11755_v50 = vld [vmem:[%s13287_s4 + $0x6c] ss:$24 sps:$4 sm:$0xff]  }
 0x44d   :  { %3842 = vmatpush1.bf16.msra.mxu0 %v11720_v11 }
 0x44e   :  { %4535 = vmatpush1.bf16.msra.mxu1 %v11466_v48  ;;  %4545 = vmatprep.subr.bf16.mxu0 %v11737_v49  ;;  %v11761_v48 = vld [vmem:[%s13287_s4 + $0x68] ss:$24 sps:$4 sm:$0xff]  }
 0x44f   :  { %4586 = vmatprep.subr.bf16.mxu1 %v11473_v17  ;;  %v11767_v17 = vld [vmem:[%s13287_s4 + $0x9c] ss:$24 sps:$4 sm:$0xff]  }
 0x450   :  { %3844 = vmatmul.mubr.bf16.vlgmr.msra.gmra.mrb[52].mxu0 %v11511_v33  ;;  %v11845_v33 = vld [vmem:[%s13287_s4 + $0x1b8] ss:$24 sps:$4 sm:$0xff]  }
 0x451   :  { %4546 = vmatpush1.bf16.msra.mxu0 %v11732_v42  ;;  %13482 = vst [vmem:[#allocation21_spill] sm:$0xff] %v11845_v33 }
 0x452   :  { %4547 = vmatprep.subr.bf16.mxu0 %v11742_v20 }
 0x455   :  { %4548 = vmatpush1.bf16.msra.mxu0 %v11749_v57 }
 0x456   :  { %4549 = vmatprep.subr.bf16.mxu0 %v11755_v50 }
 0x459   :  { %4550 = vmatpush1.bf16.msra.mxu0 %v11761_v48 }
 0x45a   :  { %4551 = vmatprep.subr.bf16.mxu0 %v11767_v17 }
 0x45d   :  { %4552 = vmatpush1.bf16.msra.mxu0 %v11773_v27 }
 0x45e   :  { %4553 = vmatprep.subr.bf16.mxu0 %v11779_v39 }
 0x461   :  { %4554 = vmatpush1.bf16.msra.mxu0 %v11785_v54 }
 0x462   :  { %4555 = vmatprep.subr.bf16.mxu0 %v11791_v29 }
 0x465   :  { %4556 = vmatpush1.bf16.msra.mxu0 %v11797_v35  ;;  %v3854_v35 = vld [vmem:[#allocation2 + $0x50] ss:$36 sps:$4 sm:$0xff]  }
 0x466   :  { %4557 = vmatprep.subr.bf16.mxu0 %v11803_v43 }
 0x469   :  { %4558 = vmatpush1.bf16.msra.mxu0 %v11809_v61 }
 0x46a   :  { %4559 = vmatprep.subr.bf16.mxu0 %v11816_v0 }
 0x46d   :  { %4560 = vmatpush1.bf16.msra.mxu0 %v11821_v23 }
 0x46e   :  { %4561 = vmatprep.subr.bf16.mxu0 %v11828_v24 }
 0x471   :  { %4562 = vmatpush1.bf16.msra.mxu0 %v11833_v60 }
 0x472   :  { %4563 = vmatprep.subr.bf16.mxu0 %v11840_v9 }
 0x475   :  { %4564 = vmatpush1.bf16.msra.mxu0 %v11845_v33 }
 0x476   :  { %4565 = vmatprep.subr.bf16.mxu0 %v11852_v45 }
 0x479   :  { %4566 = vmatpush1.bf16.msra.mxu0 %v11857_v55 }
 0x47a   :  { %4567 = vmatprep.subr.bf16.mxu0 %v11864_v36 }
 0x47d   :  { %4568 = vmatpush1.bf16.msra.mxu0 %v11869_v46 }
 0x47e   :  { %4569 = vmatprep.subr.bf16.mxu0 %v11874_v22 }
 0x481   :  { %4570 = vmatpush1.bf16.msra.mxu0 %v11881_v38 }
 0x482   :  { %4571 = vmatprep.subr.bf16.mxu0 %v11887_v12  ;;  %v11917_v12 = vld [vmem:[%s13287_s4 + $0x2d8] ss:$24 sps:$4 sm:$0xff]  }
 0x483   :  { %13494 = vst [vmem:[#allocation33_spill] sm:$0xff] %v11917_v12 }
 0x485   :  { %4572 = vmatpush1.bf16.msra.mxu0 %v11893_v18  ;;  %v3853_v18 = vld [vmem:[#allocation2 + $0x48] sm:$0xff] }
 0x486   :  { %4573 = vmatprep.subr.bf16.mxu0 %v11899_v2  ;;  %v3855_v38 = vunpack.c.l.bf16 %v3853_v18  ;;  %v3856_v45 = vunpack.c.h.bf16 %v3853_v18 }
 0x489   :  { %4574 = vmatpush1.bf16.msra.mxu0 %v11905_v25 }
 0x48a   :  { %4575 = vmatprep.subr.bf16.mxu0 %v11911_v59 }
 0x48d   :  { %4576 = vmatpush1.bf16.msra.mxu0 %v11917_v12 }
 0x4e3   :  { %v3763_v22 = vpop.f32.mrb[48].mxu0  ;;  %v3804_v2 = vpop.f32.mrb[36].mxu1 }
 0x4e4   :  { %v3864_v46 = vadd.f32 %v3855_v38, %v3763_v22  ;;  %v3765_v36 = vpop.f32.mrb[49].mxu0  ;;  %v3806_v55 = vpop.f32.mrb[37].mxu1  ;;  %v11924_v38 = vld [vmem:[%s13291_s5] ss:$0 sm:$0xff] }
 0x4e5   :  { %v3767_v33 = vpop.f32.mrb[50].mxu0  ;;  %v3808_v9 = vpop.f32.mrb[38].mxu1  ;;  %v3865_v23 = vadd.f32 %v3856_v45, %v3765_v36  ;;  %13495 = vst [vmem:[#allocation40_spill] sm:$0xff] %v11924_v38  ;;  %v3878_v22 = vadd.f32 %v11924_v38, %v3804_v2 }
 0x4e6   :  { %v8173_v25 = vmul.f32 -1.442695, %v3864_v46  ;;  %v3768_v60 = vpop.f32.mrb[51].mxu0  ;;  %v3809_v24 = vpop.f32.mrb[39].mxu1  ;;  %v3859_v46 = vld [vmem:[#allocation2 + $0x6c] sm:$0xff] }
 0x4e7   :  { %v8174_v0 = vmul.f32 -1.442695, %v3865_v23  ;;  %v3857_v24 = vunpack.c.l.bf16 %v3854_v35  ;;  %v3862_v29 = vunpack.c.h.bf16 %v3859_v46 }
 0x4e8   :  { %9590 = vpow2.f32 %v8173_v25  ;;  %v3861_v25 = vunpack.c.l.bf16 %v3859_v46 }
 0x4e9   :  { %9592 = vpow2.f32 %v8174_v0 }
 0x4ea   :  { %v3886_v0 = vadd.f32 %v3861_v25, %v3806_v55  ;;  %v11933_v55 = vld [vmem:[%s13291_s5 + $0x1] ss:$0 sm:$0xff] }
 0x4f2   :  { %v9591_v59 = vpop.eup %9590 }
 0x4f3   :  { %v3872_v61 = vadd.f32 1.0, %v9591_v59  ;;  %v9593_v12 = vpop.eup %9592  ;;  %v8175_v59 = vmul.f32 -1.442695, %v3886_v0 }
 0x4f4   :  { %v3873_v43 = vadd.f32 1.0, %v9593_v12 }
 0x4f5   :  { %9594 = vrcp.f32 %v3872_v61 }
 0x4f6   :  { %9596 = vrcp.f32 %v3873_v43 }
 0x4ff   :  { %v9595_v18 = vpop.eup %9594 }
 0x500   :  { %v3879_v36 = vmul.f32 %v9595_v18, %v3878_v22  ;;  %v9597_v61 = vpop.eup %9596 }
 0x501   :  { %v3882_v12 = vsub.f32 1.0, %v9597_v61  ;;  %v3884_v60 = vmul.f32 %v9597_v61, %v11494_v15  ;;  %v3863_v61 = vunpack.c.h.bf16 %v3854_v35 }
 0x502   :  { %v3880_v45 = vadd.f32 %v3879_v36, %v3857_v24 }
 0x504   :  { %9598 = vtanh.f32 %v3880_v45 }
 0x505   :  { %9600 = vpow2.f32 %v8175_v59 }
 0x50e   :  { %v9599_v23 = vpop.eup %9598 }
 0x50f   :  { %v3883_v9 = vmul.f32 %v9599_v23, %v3882_v12  ;;  %v9601_v2 = vpop.eup %9600 }
 0x510   :  { %v3894_v38 = vadd.f32 1.0, %v9601_v2  ;;  %v11938_v2 = vpop.permute.xlu0 %3918 }
 0x511   :  { %v11928_v33 = vadd.f32 %v3884_v60, %v3883_v9  ;;  %v11936_v9 = vpop.permute.xlu1 %3910  ;;  %13498 = vst [vmem:[#allocation43_spill] sm:$0xff] %v11938_v2  ;;  %vm3920_vm1 = vcmp.eq.s32.totalorder %v11938_v2, 1  ;;  %v12630_v2 = vld [vmem:[%s13287_s4 + $0x278] ss:$24 sps:$4 sm:$0xff]  }
 0x512   :  { %9602 = vrcp.f32 %v3894_v38  ;;  %13497 = vst [vmem:[#allocation42_spill] sm:$0xff] %v11936_v9  ;;  %vm3912_vm0 = vcmp.eq.s32.totalorder %v11936_v9, 1  ;;  %v12611_v9 = vld [vmem:[%s13287_s4 + $0x24c] ss:$24 sps:$4 sm:$0xff]  }
 0x513   :  { %13496 = vst [vmem:[#allocation41_spill] sm:$0xff] %v11928_v33  ;;  %v11949_v35 = vsel %vm3912_vm0, %v11928_v33, %v11494_v15  ;;  %v13500_v15 = vld [vmem:[#allocation12_spill] sm:$0xff] }
 0x514   :  { %v12618_v33 = vld [vmem:[%s13287_s4 + $0x248] ss:$24 sps:$4 sm:$0xff]  }
 0x51c   :  { %v9603_v25 = vpop.eup %9602 }
 0x523   :  { %v3845_v22 = vpop.f32.mrb[52].mxu0 }
 0x524   :  { %v3887_v43 = vadd.f32 %v3862_v29, %v3845_v22  ;;  %v3847_v18 = vpop.f32.mrb[53].mxu0 }
 0x525   :  { %v3900_v24 = vadd.f32 %v11933_v55, %v3847_v18  ;;  %v3849_v36 = vpop.f32.mrb[54].mxu0 }
 0x526   :  { %v8176_v45 = vmul.f32 -1.442695, %v3887_v43  ;;  %v3850_v0 = vpop.f32.mrb[55].mxu0 }
 0x527   :  { %v3901_v59 = vmul.f32 %v9603_v25, %v3900_v24  ;;  %v3926_v25 = vpack.c.bf16 %v11949_v35, %v11949_v35  ;;  %v12156_v0 = vld [vmem:[%s13287_s4 + $0x214] ss:$24 sps:$4 sm:$0xff]  }
 0x528   :  { %9604 = vpow2.f32 %v8176_v45  ;;  %v12149_v45 = vld [vmem:[%s13287_s4 + $0x1e0] ss:$24 sps:$4 sm:$0xff]  }
 0x529   :  { %v3902_v46 = vadd.f32 %v3901_v59, %v3863_v61  ;;  %v12161_v59 = vld [vmem:[%s13287_s4 + $0x210] ss:$24 sps:$4 sm:$0xff]   ;;  %v12167_v61 = vld [vmem:[%s13287_s4 + $0x244] ss:$24 sps:$4 sm:$0xff]  }
 0x532   :  { %v9605_v12 = vpop.eup %9604 }
 0x533   :  { %v3895_v38 = vadd.f32 1.0, %v9605_v12  ;;  %v12173_v12 = vld [vmem:[%s13287_s4 + $0x240] ss:$24 sps:$4 sm:$0xff]  }
 0x535   :  { %9606 = vrcp.f32 %v3895_v38  ;;  %v12179_v38 = vld [vmem:[%s13287_s4 + $0x274] ss:$24 sps:$4 sm:$0xff]  }
 0x536   :  { %9608 = vtanh.f32 %v3902_v46  ;;  %v12185_v46 = vld [vmem:[%s13287_s4 + $0x270] ss:$24 sps:$4 sm:$0xff]  }
 0x53f   :  { %v9607_v29 = vpop.eup %9606 }
 0x540   :  { %v3904_v23 = vsub.f32 1.0, %v9607_v29  ;;  %v9609_v60 = vpop.eup %9608  ;;  %v3906_v18 = vmul.f32 %v9607_v29, %v11500_v13  ;;  %v12191_v29 = vld [vmem:[%s13287_s4 + $0x2a4] ss:$24 sps:$4 sm:$0xff]  }
 0x542   :  { %v3905_v22 = vmul.f32 %v9609_v60, %v3904_v23  ;;  %v12197_v23 = vld [vmem:[%s13287_s4 + $0x2a0] ss:$24 sps:$4 sm:$0xff]   ;;  %v12203_v60 = vld [vmem:[%s13287_s4 + $0x2d4] ss:$24 sps:$4 sm:$0xff]  }
 0x544   :  { %v11942_v43 = vadd.f32 %v3906_v18, %v3905_v22  ;;  %v12209_v22 = vld [vmem:[%s13287_s4 + $0x2d0] ss:$24 sps:$4 sm:$0xff]   ;;  %v12216_v18 = vld [vmem:[%s13287_s4 + $0x14] ss:$24 sps:$4 sm:$0xff]  }
 0x546   :  { %13499 = vst [vmem:[#allocation44_spill] sm:$0xff] %v11942_v43  ;;  %v11955_v24 = vsel %vm3920_vm1, %v11942_v43, %v11500_v13  ;;  %v13501_v13 = vld [vmem:[#allocation13_spill] sm:$0xff]  ;;  %v12624_v43 = vld [vmem:[%s13287_s4 + $0x27c] ss:$24 sps:$4 sm:$0xff]  }
 0x547   :  { %v3927_v36 = vpack.c.bf16 %v11955_v24, %v11955_v24 }
 0x549   :  { %4536 = vmatprep.mubr.bf16.mxu1 %v3927_v36  ;;  %4577 = vmatprep.mubr.bf16.mxu0 %v3927_v36 }
 0x54a   :  { %4537 = vmatmul.mubr.bf16.vlgmr.msra.gmra.mrb[40].mxu1 %v3926_v25  ;;  %4578 = vmatmul.mubr.bf16.vlgmr.msra.gmra.mrb[56].mxu0 %v3926_v25 }
 0x54b   :  { %4587 = vmatpush1.bf16.msra.mxu1 %v11507_v32  ;;  %4618 = vmatprep.mubr.bf16.mxu1 %v3927_v36  ;;  %v13502_v32 = vld [vmem:[#allocation14_spill] sm:$0xff]  ;;  %v4627_v36 = vld [vmem:[#allocation2 + $0x60] sm:$0xff] }
 0x54c   :  { %4588 = vmatprep.subr.bf16.mxu1 %v11516_v26  ;;  %v13503_v26 = vld [vmem:[#allocation15_spill] sm:$0xff] }
 0x54f   :  { %4589 = vmatpush1.bf16.msra.mxu1 %v11524_v40  ;;  %v13504_v40 = vld [vmem:[#allocation16_spill] sm:$0xff] }
 0x550   :  { %4590 = vmatprep.subr.bf16.mxu1 %v11530_v21  ;;  %v13505_v21 = vld [vmem:[#allocation17_spill] sm:$0xff] }
 0x553   :  { %4591 = vmatpush1.bf16.msra.mxu1 %v11538_v19  ;;  %v13506_v19 = vld [vmem:[#allocation18_spill] sm:$0xff] }
 0x554   :  { %4592 = vmatprep.subr.bf16.mxu1 %v11544_v41  ;;  %v13507_v41 = vld [vmem:[#allocation19_spill] sm:$0xff] }
 0x557   :  { %4593 = vmatpush1.bf16.msra.mxu1 %v11552_v14  ;;  %v13508_v14 = vld [vmem:[#allocation20_spill] sm:$0xff] }
 0x558   :  { %4594 = vmatprep.subr.bf16.mxu1 %v11558_v30  ;;  %v13509_v30 = vld [vmem:[#allocation21_spill] sm:$0xff] }
 0x55b   :  { %4595 = vmatpush1.bf16.msra.mxu1 %v11566_v3  ;;  %v13510_v3 = vld [vmem:[#allocation22_spill] sm:$0xff] }
 0x55c   :  { %4596 = vmatprep.subr.bf16.mxu1 %v11572_v6  ;;  %v13511_v6 = vld [vmem:[#allocation23_spill] sm:$0xff] }
 0x55f   :  { %4597 = vmatpush1.bf16.msra.mxu1 %v11580_v28  ;;  %v13512_v28 = vld [vmem:[#allocation24_spill] sm:$0xff] }
 0x560   :  { %4598 = vmatprep.subr.bf16.mxu1 %v11586_v44  ;;  %v13513_v44 = vld [vmem:[#allocation25_spill] sm:$0xff] }
 0x563   :  { %4599 = vmatpush1.bf16.msra.mxu1 %v11594_v31  ;;  %v13514_v31 = vld [vmem:[#allocation26_spill] sm:$0xff] }
 0x564   :  { %4600 = vmatprep.subr.bf16.mxu1 %v11600_v16  ;;  %v13515_v16 = vld [vmem:[#allocation27_spill] sm:$0xff] }
 0x567   :  { %4601 = vmatpush1.bf16.msra.mxu1 %v11608_v37  ;;  %v13516_v37 = vld [vmem:[#allocation28_spill] sm:$0xff] }
 0x568   :  { %4602 = vmatprep.subr.bf16.mxu1 %v11614_v53  ;;  %v12022_v53 = vld [vmem:[%s13287_s4] ss:$24 sps:$4 sm:$0xff]  }
 0x56b   :  { %4603 = vmatpush1.bf16.msra.mxu1 %v11622_v10  ;;  %v9220_v10 = vld [vmem:[%s13287_s4 + $0x4] ss:$24 sps:$4 sm:$0xff]  }
 0x56c   :  { %4604 = vmatprep.subr.bf16.mxu1 %v11628_v8  ;;  %v12030_v8 = vld [vmem:[%s13287_s4 + $0x34] ss:$24 sps:$4 sm:$0xff]   ;;  %5265 = vmatprep.subr.bf16.mxu0 %v9220_v10 }
 0x56d   :  { %5266 = vmatpush1.bf16.msra.mxu0 %v12022_v53 }
 0x56e   :  { %5267 = vmatprep.subr.bf16.mxu0 %v12030_v8 }
 0x56f   :  { %4605 = vmatpush1.bf16.msra.mxu1 %v11636_v7  ;;  %v13517_v7 = vld [vmem:[#allocation29_spill] sm:$0xff] }
 0x570   :  { %4606 = vmatprep.subr.bf16.mxu1 %v11642_v58  ;;  %v13518_v58 = vld [vmem:[#allocation30_spill] sm:$0xff] }
 0x571   :  { %13541 = vst [vmem:[#allocation30_spill] sm:$0xff] %v12611_v9 }
 0x573   :  { %4607 = vmatpush1.bf16.msra.mxu1 %v11650_v51  ;;  %v12038_v51 = vld [vmem:[%s13287_s4 + $0x30] ss:$24 sps:$4 sm:$0xff]  }
 0x574   :  { %4608 = vmatprep.subr.bf16.mxu1 %v11656_v4  ;;  %v12044_v4 = vld [vmem:[%s13287_s4 + $0x64] ss:$24 sps:$4 sm:$0xff]   ;;  %5268 = vmatpush1.bf16.msra.mxu0 %v12038_v51 }
 0x575   :  { %5269 = vmatprep.subr.bf16.mxu0 %v12044_v4 }
 0x577   :  { %4609 = vmatpush1.bf16.msra.mxu1 %v11664_v5  ;;  %v13519_v5 = vld [vmem:[#allocation31_spill] sm:$0xff] }
 0x578   :  { %4610 = vmatprep.subr.bf16.mxu1 %v11670_v52  ;;  %v13520_v52 = vld [vmem:[#allocation32_spill] sm:$0xff]  ;;  %13542 = vst [vmem:[#allocation31_spill] sm:$0xff] %v12618_v33 }
 0x579   :  { %13543 = vst [vmem:[#allocation32_spill] sm:$0xff] %v12624_v43 }
 0x57b   :  { %4611 = vmatpush1.bf16.msra.mxu1 %v11678_v34  ;;  %v12052_v34 = vld [vmem:[%s13287_s4 + $0x60] ss:$24 sps:$4 sm:$0xff]  }
 0x57c   :  { %4612 = vmatprep.subr.bf16.mxu1 %v11684_v62  ;;  %v12058_v62 = vld [vmem:[%s13287_s4 + $0x94] ss:$24 sps:$4 sm:$0xff]   ;;  %5270 = vmatpush1.bf16.msra.mxu0 %v12052_v34 }
 0x57d   :  { %5271 = vmatprep.subr.bf16.mxu0 %v12058_v62 }
 0x57f   :  { %4613 = vmatpush1.bf16.msra.mxu1 %v11692_v1  ;;  %v13521_v1 = vld [vmem:[#allocation33_spill] sm:$0xff] }
 0x580   :  { %4614 = vmatprep.subr.bf16.mxu1 %v11698_v63  ;;  %v12065_v63 = vld [vmem:[%s13287_s4 + $0x90] ss:$24 sps:$4 sm:$0xff]   ;;  %13544 = vst [vmem:[#allocation33_spill] sm:$0xff] %v12630_v2 }
 0x581   :  { %5272 = vmatpush1.bf16.msra.mxu0 %v12065_v63 }
 0x583   :  { %4615 = vmatpush1.bf16.msra.mxu1 %v11706_v47  ;;  %v12071_v47 = vld [vmem:[%s13287_s4 + $0xc4] ss:$24 sps:$4 sm:$0xff]  }
 0x584   :  { %4616 = vmatprep.subr.bf16.mxu1 %v11712_v56  ;;  %v12077_v56 = vld [vmem:[%s13287_s4 + $0xc0] ss:$24 sps:$4 sm:$0xff]   ;;  %5273 = vmatprep.subr.bf16.mxu0 %v12071_v47 }
 0x585   :  { %5274 = vmatpush1.bf16.msra.mxu0 %v12077_v56 }
 0x587   :  { %4617 = vmatpush1.bf16.msra.mxu1 %v11720_v11  ;;  %v12083_v11 = vld [vmem:[%s13287_s4 + $0xf4] ss:$24 sps:$4 sm:$0xff]  }
 0x588   :  { %5306 = vmatprep.subr.bf16.mxu1 %v11737_v49  ;;  %5275 = vmatprep.subr.bf16.mxu0 %v12083_v11  ;;  %v12095_v49 = vld [vmem:[%s13287_s4 + $0x124] ss:$24 sps:$4 sm:$0xff]  }
 0x58a   :  { %4619 = vmatmul.mubr.bf16.vlgmr.msra.gmra.mrb[44].mxu1 %v3926_v25  ;;  %v4629_v25 = vunpack.c.l.bf16 %v4627_v36 }
 0x58b   :  { %5307 = vmatpush1.bf16.msra.mxu1 %v11732_v42  ;;  %v12089_v42 = vld [vmem:[%s13287_s4 + $0xf0] ss:$24 sps:$4 sm:$0xff]  }
 0x58c   :  { %5308 = vmatprep.subr.bf16.mxu1 %v11742_v20  ;;  %5276 = vmatpush1.bf16.msra.mxu0 %v12089_v42  ;;  %v12101_v20 = vld [vmem:[%s13287_s4 + $0x120] ss:$24 sps:$4 sm:$0xff]  }
 0x58d   :  { %5277 = vmatprep.subr.bf16.mxu0 %v12095_v49 }
 0x58f   :  { %5309 = vmatpush1.bf16.msra.mxu1 %v11749_v57  ;;  %v12108_v57 = vld [vmem:[%s13287_s4 + $0x154] ss:$24 sps:$4 sm:$0xff]  }
 0x590   :  { %5310 = vmatprep.subr.bf16.mxu1 %v11755_v50  ;;  %5278 = vmatpush1.bf16.msra.mxu0 %v12101_v20  ;;  %v12113_v50 = vld [vmem:[%s13287_s4 + $0x150] ss:$24 sps:$4 sm:$0xff]  }
 0x591   :  { %5279 = vmatprep.subr.bf16.mxu0 %v12108_v57 }
 0x593   :  { %5311 = vmatpush1.bf16.msra.mxu1 %v11761_v48  ;;  %v12120_v48 = vld [vmem:[%s13287_s4 + $0x184] ss:$24 sps:$4 sm:$0xff]  }
 0x594   :  { %5312 = vmatprep.subr.bf16.mxu1 %v11767_v17  ;;  %5280 = vmatpush1.bf16.msra.mxu0 %v12113_v50  ;;  %v12125_v17 = vld [vmem:[%s13287_s4 + $0x180] ss:$24 sps:$4 sm:$0xff]  }
 0x595   :  { %5281 = vmatprep.subr.bf16.mxu0 %v12120_v48 }
 0x597   :  { %5313 = vmatpush1.bf16.msra.mxu1 %v11773_v27  ;;  %v12132_v27 = vld [vmem:[%s13287_s4 + $0x1b4] ss:$24 sps:$4 sm:$0xff]  }
 0x598   :  { %5314 = vmatprep.subr.bf16.mxu1 %v11779_v39  ;;  %5282 = vmatpush1.bf16.msra.mxu0 %v12125_v17  ;;  %v12137_v39 = vld [vmem:[%s13287_s4 + $0x1b0] ss:$24 sps:$4 sm:$0xff]  }
 0x599   :  { %5283 = vmatprep.subr.bf16.mxu0 %v12132_v27 }
 0x59b   :  { %5315 = vmatpush1.bf16.msra.mxu1 %v11785_v54  ;;  %v12144_v54 = vld [vmem:[%s13287_s4 + $0x1e4] ss:$24 sps:$4 sm:$0xff]  }
 0x59c   :  { %5316 = vmatprep.subr.bf16.mxu1 %v13500_v15  ;;  %5284 = vmatpush1.bf16.msra.mxu0 %v12137_v39 }
 0x59d   :  { %5285 = vmatprep.subr.bf16.mxu0 %v12144_v54 }
 0x59f   :  { %5317 = vmatpush1.bf16.msra.mxu1 %v13501_v13 }
 0x5a0   :  { %5318 = vmatprep.subr.bf16.mxu1 %v13502_v32  ;;  %5286 = vmatpush1.bf16.msra.mxu0 %v12149_v45 }
 0x5a1   :  { %5287 = vmatprep.subr.bf16.mxu0 %v12156_v0 }
 0x5a3   :  { %5319 = vmatpush1.bf16.msra.mxu1 %v13503_v26 }
 0x5a4   :  { %5320 = vmatprep.subr.bf16.mxu1 %v13504_v40  ;;  %5288 = vmatpush1.bf16.msra.mxu0 %v12161_v59 }
 0x5a5   :  { %5289 = vmatprep.subr.bf16.mxu0 %v12167_v61 }
 0x5a7   :  { %5321 = vmatpush1.bf16.msra.mxu1 %v13505_v21  ;;  %v4630_v21 = vunpack.c.h.bf16 %v4627_v36 }
 0x5a8   :  { %5322 = vmatprep.subr.bf16.mxu1 %v13506_v19  ;;  %5290 = vmatpush1.bf16.msra.mxu0 %v12173_v12 }
 0x5a9   :  { %5291 = vmatprep.subr.bf16.mxu0 %v12179_v38 }
 0x5ab   :  { %5323 = vmatpush1.bf16.msra.mxu1 %v13507_v41 }
 0x5ac   :  { %5324 = vmatprep.subr.bf16.mxu1 %v13508_v14  ;;  %5292 = vmatpush1.bf16.msra.mxu0 %v12185_v46 }
 0x5ad   :  { %5293 = vmatprep.subr.bf16.mxu0 %v12191_v29 }
 0x5af   :  { %5325 = vmatpush1.bf16.msra.mxu1 %v13509_v30 }
 0x5b0   :  { %5326 = vmatprep.subr.bf16.mxu1 %v13510_v3  ;;  %5294 = vmatpush1.bf16.msra.mxu0 %v12197_v23 }
 0x5b1   :  { %5295 = vmatprep.subr.bf16.mxu0 %v12203_v60 }
 0x5b3   :  { %5327 = vmatpush1.bf16.msra.mxu1 %v13511_v6 }
 0x5b4   :  { %5328 = vmatprep.subr.bf16.mxu1 %v13512_v28  ;;  %5296 = vmatpush1.bf16.msra.mxu0 %v12209_v22 }
 0x5b5   :  { %5347 = vmatprep.subr.bf16.mxu0 %v12216_v18 }
 0x5b7   :  { %5329 = vmatpush1.bf16.msra.mxu1 %v13513_v44 }
 0x5b8   :  { %5330 = vmatprep.subr.bf16.mxu1 %v13514_v31 }
 0x5bb   :  { %5331 = vmatpush1.bf16.msra.mxu1 %v13515_v16 }
 0x5bc   :  { %5332 = vmatprep.subr.bf16.mxu1 %v13516_v37 }
 0x5bf   :  { %5333 = vmatpush1.bf16.msra.mxu1 %v13517_v7  ;;  %v13522_v7 = vld [vmem:[#allocation40_spill] sm:$0xff] }
 0x5c0   :  { %5334 = vmatprep.subr.bf16.mxu1 %v13518_v58 }
 0x5c3   :  { %5335 = vmatpush1.bf16.msra.mxu1 %v13519_v5  ;;  %v4632_v5 = vld [vmem:[#allocation2 + $0x54] sm:$0xff] }
 0x5c4   :  { %5336 = vmatprep.subr.bf16.mxu1 %v13520_v52 }
 0x5c7   :  { %5337 = vmatpush1.bf16.msra.mxu1 %v13521_v1 }
 0x5c8   :  { %6026 = vmatprep.subr.bf16.mxu1 %v9220_v10  ;;  %v4628_v10 = vld [vmem:[#allocation2 + $0x5c] ss:$12 sps:$4 sm:$0xff]  }
 0x5c9   :  { %v4631_v1 = vunpack.c.h.bf16 %v4628_v10 }
 0x61d   :  { %v4538_v15 = vpop.f32.mrb[40].mxu1  ;;  %v4579_v13 = vpop.f32.mrb[56].mxu0 }
 0x61e   :  { %v4637_v32 = vadd.f32 %v4629_v25, %v4538_v15  ;;  %v4540_v26 = vpop.f32.mrb[41].mxu1  ;;  %v4581_v40 = vpop.f32.mrb[57].mxu0  ;;  %v4651_v58 = vadd.f32 %v13522_v7, %v4579_v13  ;;  %v4634_v25 = vunpack.c.l.bf16 %v4632_v5 }
 0x61f   :  { %v4542_v19 = vpop.f32.mrb[42].mxu1  ;;  %v4583_v41 = vpop.f32.mrb[58].mxu0  ;;  %v4638_v6 = vadd.f32 %v4630_v21, %v4540_v26 }
 0x620   :  { %v8273_v14 = vmul.f32 -1.442695, %v4637_v32  ;;  %v4543_v30 = vpop.f32.mrb[43].mxu1  ;;  %v4584_v3 = vpop.f32.mrb[59].mxu0  ;;  %v4659_v32 = vadd.f32 %v4634_v25, %v4581_v40  ;;  %v4636_v25 = vunpack.c.l.bf16 %v4628_v10 }
 0x621   :  { %v8274_v28 = vmul.f32 -1.442695, %v4638_v6 }
 0x622   :  { %9610 = vpow2.f32 %v8273_v14  ;;  %v8275_v26 = vmul.f32 -1.442695, %v4659_v32 }
 0x623   :  { %9612 = vpow2.f32 %v8274_v28  ;;  %v4635_v28 = vunpack.c.h.bf16 %v4632_v5 }
 0x62c   :  { %v9611_v44 = vpop.eup %9610 }
 0x62d   :  { %v4645_v31 = vadd.f32 1.0, %v9611_v44  ;;  %v9613_v16 = vpop.eup %9612 }
 0x62e   :  { %v4646_v37 = vadd.f32 1.0, %v9613_v16 }
 0x62f   :  { %9614 = vrcp.f32 %v4645_v31 }
 0x630   :  { %9616 = vrcp.f32 %v4646_v37 }
 0x639   :  { %v9615_v52 = vpop.eup %9614 }
 0x63a   :  { %v4652_v36 = vmul.f32 %v9615_v52, %v4651_v58  ;;  %v9617_v21 = vpop.eup %9616 }
 0x63b   :  { %v4655_v19 = vsub.f32 1.0, %v9617_v21  ;;  %v4657_v14 = vmul.f32 %v9617_v21, %v11949_v35 }
 0x63c   :  { %v4653_v15 = vadd.f32 %v4652_v36, %v4631_v1 }
 0x63e   :  { %9618 = vtanh.f32 %v4653_v15 }
 0x63f   :  { %9620 = vpow2.f32 %v8275_v26 }
 0x648   :  { %v9619_v41 = vpop.eup %9618 }
 0x649   :  { %v4656_v30 = vmul.f32 %v9619_v41, %v4655_v19  ;;  %v9621_v13 = vpop.eup %9620 }
 0x64a   :  { %v4667_v6 = vadd.f32 1.0, %v9621_v13 }
 0x64b   :  { %v12221_v3 = vadd.f32 %v4657_v14, %v4656_v30 }
 0x64c   :  { %9622 = vrcp.f32 %v4667_v6 }
 0x64d   :  { %13523 = vst [vmem:[#allocation12_spill] sm:$0xff] %v12221_v3  ;;  %v12231_v13 = vsel %vm3920_vm1, %v12221_v3, %v11949_v35  ;;  %v12253_v35 = vld [vmem:[%s13287_s4 + $0x44] ss:$24 sps:$4 sm:$0xff]  }
 0x64e   :  { %v12636_v3 = vld [vmem:[%s13287_s4 + $0x2ac] ss:$24 sps:$4 sm:$0xff]  }
 0x64f   :  { %13545 = vst [vmem:[#allocation40_spill] sm:$0xff] %v12636_v3 }
 0x656   :  { %v9623_v58 = vpop.eup %9622 }
 0x65d   :  { %v4620_v44 = vpop.f32.mrb[44].mxu1 }
 0x65e   :  { %v4660_v31 = vadd.f32 %v4635_v28, %v4620_v44  ;;  %v4622_v16 = vpop.f32.mrb[45].mxu1  ;;  %v12244_v28 = vld [vmem:[%s13287_s4 + $0x10] ss:$24 sps:$4 sm:$0xff]   ;;  %v12248_v44 = vpack.c.bf16 %v12231_v13, %v12231_v13 }
 0x65f   :  { %v4673_v40 = vadd.f32 %v11933_v55, %v4622_v16  ;;  %v4624_v37 = vpop.f32.mrb[46].mxu1  ;;  %v12275_v16 = vld [vmem:[%s13287_s4 + $0x70] ss:$24 sps:$4 sm:$0xff]  }
 0x660   :  { %v8276_v52 = vmul.f32 -1.442695, %v4660_v31  ;;  %v4625_v1 = vpop.f32.mrb[47].mxu1  ;;  %v12267_v31 = vld [vmem:[%s13287_s4 + $0x74] ss:$24 sps:$4 sm:$0xff]  }
 0x661   :  { %v4674_v36 = vmul.f32 %v9623_v58, %v4673_v40  ;;  %v12281_v40 = vld [vmem:[%s13287_s4 + $0xa4] ss:$24 sps:$4 sm:$0xff]   ;;  %v12510_v37 = vld [vmem:[%s13287_s4 + $0x98] ss:$24 sps:$4 sm:$0xff]  }
 0x662   :  { %9624 = vpow2.f32 %v8276_v52  ;;  %v12516_v58 = vld [vmem:[%s13287_s4 + $0xcc] ss:$24 sps:$4 sm:$0xff]   ;;  %v12522_v52 = vld [vmem:[%s13287_s4 + $0xc8] ss:$24 sps:$4 sm:$0xff]   ;;  %v12528_v1 = vld [vmem:[%s13287_s4 + $0xfc] ss:$24 sps:$4 sm:$0xff]  }
 0x663   :  { %v4675_v26 = vadd.f32 %v4674_v36, %v4636_v25  ;;  %13525 = vst [vmem:[#allocation14_spill] sm:$0xff] %v12516_v58  ;;  %13526 = vst [vmem:[#allocation15_spill] sm:$0xff] %v12522_v52  ;;  %v12534_v36 = vld [vmem:[%s13287_s4 + $0xf8] ss:$24 sps:$4 sm:$0xff]   ;;  %v12540_v25 = vld [vmem:[%s13287_s4 + $0x12c] ss:$24 sps:$4 sm:$0xff]  }
 0x664   :  { %13527 = vst [vmem:[#allocation16_spill] sm:$0xff] %v12528_v1  ;;  %13528 = vst [vmem:[#allocation17_spill] sm:$0xff] %v12534_v36 }
 0x665   :  { %13529 = vst [vmem:[#allocation18_spill] sm:$0xff] %v12540_v25 }
 0x66c   :  { %v9625_v15 = vpop.eup %9624 }
 0x66d   :  { %v4668_v32 = vadd.f32 1.0, %v9625_v15  ;;  %v12546_v15 = vld [vmem:[%s13287_s4 + $0x128] ss:$24 sps:$4 sm:$0xff]  }
 0x66e   :  { %13530 = vst [vmem:[#allocation19_spill] sm:$0xff] %v12546_v15 }
 0x66f   :  { %9626 = vrcp.f32 %v4668_v32  ;;  %v12553_v32 = vld [vmem:[%s13287_s4 + $0x15c] ss:$24 sps:$4 sm:$0xff]  }
 0x670   :  { %9628 = vtanh.f32 %v4675_v26  ;;  %13531 = vst [vmem:[#allocation20_spill] sm:$0xff] %v12553_v32  ;;  %v12558_v26 = vld [vmem:[%s13287_s4 + $0x158] ss:$24 sps:$4 sm:$0xff]  }
 0x671   :  { %13532 = vst [vmem:[#allocation21_spill] sm:$0xff] %v12558_v26 }
 0x679   :  { %v9627_v21 = vpop.eup %9626 }
 0x67a   :  { %v4677_v19 = vsub.f32 1.0, %v9627_v21  ;;  %v9629_v5 = vpop.eup %9628  ;;  %v4679_v14 = vmul.f32 %v9627_v21, %v11955_v24  ;;  %v12565_v21 = vld [vmem:[%s13287_s4 + $0x18c] ss:$24 sps:$4 sm:$0xff]  }
 0x67b   :  { %13533 = vst [vmem:[#allocation22_spill] sm:$0xff] %v12565_v21 }
 0x67c   :  { %v4678_v41 = vmul.f32 %v9629_v5, %v4677_v19  ;;  %v12570_v19 = vld [vmem:[%s13287_s4 + $0x188] ss:$24 sps:$4 sm:$0xff]   ;;  %v12577_v5 = vld [vmem:[%s13287_s4 + $0x1bc] ss:$24 sps:$4 sm:$0xff]  }
 0x67d   :  { %13534 = vst [vmem:[#allocation23_spill] sm:$0xff] %v12570_v19  ;;  %13535 = vst [vmem:[#allocation24_spill] sm:$0xff] %v12577_v5 }
 0x67e   :  { %v12225_v30 = vadd.f32 %v4679_v14, %v4678_v41  ;;  %v12582_v41 = vld [vmem:[%s13287_s4 + $0x1b8] ss:$24 sps:$4 sm:$0xff]   ;;  %v12589_v14 = vld [vmem:[%s13287_s4 + $0x1ec] ss:$24 sps:$4 sm:$0xff]  }
 0x67f   :  { %13536 = vst [vmem:[#allocation25_spill] sm:$0xff] %v12582_v41  ;;  %13537 = vst [vmem:[#allocation26_spill] sm:$0xff] %v12589_v14 }
 0x680   :  { %13524 = vst [vmem:[#allocation13_spill] sm:$0xff] %v12225_v30  ;;  %v12237_v10 = vsel %vm3912_vm0, %v12225_v30, %v11955_v24  ;;  %v12261_v24 = vld [vmem:[%s13287_s4 + $0x40] ss:$24 sps:$4 sm:$0xff]  }
 0x681   :  { %v4688_v6 = vpack.c.bf16 %v12237_v10, %v12237_v10  ;;  %v12606_v30 = vld [vmem:[%s13287_s4 + $0x218] ss:$24 sps:$4 sm:$0xff]  }
 0x682   :  { %13540 = vst [vmem:[#allocation29_spill] sm:$0xff] %v12606_v30 }
 0x683   :  { %5297 = vmatprep.mubr.bf16.mxu0 %v4688_v6  ;;  %5338 = vmatprep.mubr.bf16.mxu1 %v4688_v6 }
 0x684   :  { %5298 = vmatmul.mubr.bf16.vlgmr.msra.gmra.mrb[60].mxu0 %v12248_v44  ;;  %5339 = vmatmul.mubr.bf16.vlgmr.msra.gmra.mrb[48].mxu1 %v12248_v44 }
 0x685   :  { %5348 = vmatpush1.bf16.msra.mxu0 %v12244_v28  ;;  %5379 = vmatprep.mubr.bf16.mxu0 %v4688_v6  ;;  %v12594_v6 = vld [vmem:[%s13287_s4 + $0x1e8] ss:$24 sps:$4 sm:$0xff]  }
 0x686   :  { %5349 = vmatprep.subr.bf16.mxu0 %v12253_v35  ;;  %6027 = vmatpush1.bf16.msra.mxu1 %v12022_v53  ;;  %v12289_v53 = vld [vmem:[%s13287_s4 + $0xa0] ss:$24 sps:$4 sm:$0xff]   ;;  %13538 = vst [vmem:[#allocation27_spill] sm:$0xff] %v12594_v6 }
 0x687   :  { %6028 = vmatprep.subr.bf16.mxu1 %v12030_v8  ;;  %v12295_v8 = vld [vmem:[%s13287_s4 + $0xd4] ss:$24 sps:$4 sm:$0xff]  }
 0x689   :  { %5350 = vmatpush1.bf16.msra.mxu0 %v12261_v24 }
 0x68a   :  { %5351 = vmatprep.subr.bf16.mxu0 %v12267_v31  ;;  %6029 = vmatpush1.bf16.msra.mxu1 %v12038_v51  ;;  %v12303_v51 = vld [vmem:[%s13287_s4 + $0xd0] ss:$24 sps:$4 sm:$0xff]  }
 0x68b   :  { %6030 = vmatprep.subr.bf16.mxu1 %v12044_v4  ;;  %v12309_v4 = vld [vmem:[%s13287_s4 + $0x104] ss:$24 sps:$4 sm:$0xff]  }
 0x68d   :  { %5352 = vmatpush1.bf16.msra.mxu0 %v12275_v16 }
 0x68e   :  { %5353 = vmatprep.subr.bf16.mxu0 %v12281_v40  ;;  %6031 = vmatpush1.bf16.msra.mxu1 %v12052_v34  ;;  %v12317_v34 = vld [vmem:[%s13287_s4 + $0x100] ss:$24 sps:$4 sm:$0xff]  }
 0x68f   :  { %6032 = vmatprep.subr.bf16.mxu1 %v12058_v62  ;;  %v12323_v62 = vld [vmem:[%s13287_s4 + $0x134] ss:$24 sps:$4 sm:$0xff]  }
 0x691   :  { %5354 = vmatpush1.bf16.msra.mxu0 %v12289_v53 }
 0x692   :  { %5355 = vmatprep.subr.bf16.mxu0 %v12295_v8  ;;  %6033 = vmatpush1.bf16.msra.mxu1 %v12065_v63  ;;  %v12331_v63 = vld [vmem:[%s13287_s4 + $0x130] ss:$24 sps:$4 sm:$0xff]  }
 0x693   :  { %6034 = vmatprep.subr.bf16.mxu1 %v12071_v47  ;;  %v12337_v47 = vld [vmem:[%s13287_s4 + $0x164] ss:$24 sps:$4 sm:$0xff]  }
 0x695   :  { %5356 = vmatpush1.bf16.msra.mxu0 %v12303_v51 }
 0x696   :  { %5357 = vmatprep.subr.bf16.mxu0 %v12309_v4  ;;  %6035 = vmatpush1.bf16.msra.mxu1 %v12077_v56  ;;  %v12345_v56 = vld [vmem:[%s13287_s4 + $0x160] ss:$24 sps:$4 sm:$0xff]  }
 0x697   :  { %6036 = vmatprep.subr.bf16.mxu1 %v12083_v11  ;;  %v12351_v11 = vld [vmem:[%s13287_s4 + $0x194] ss:$24 sps:$4 sm:$0xff]  }
 0x699   :  { %5358 = vmatpush1.bf16.msra.mxu0 %v12317_v34 }
 0x69a   :  { %5359 = vmatprep.subr.bf16.mxu0 %v12323_v62  ;;  %6037 = vmatpush1.bf16.msra.mxu1 %v12089_v42  ;;  %v12359_v42 = vld [vmem:[%s13287_s4 + $0x190] ss:$24 sps:$4 sm:$0xff]  }
 0x69b   :  { %6038 = vmatprep.subr.bf16.mxu1 %v12095_v49  ;;  %v12365_v49 = vld [vmem:[%s13287_s4 + $0x1c4] ss:$24 sps:$4 sm:$0xff]  }
 0x69d   :  { %5360 = vmatpush1.bf16.msra.mxu0 %v12331_v63 }
 0x69e   :  { %5361 = vmatprep.subr.bf16.mxu0 %v12337_v47  ;;  %6039 = vmatpush1.bf16.msra.mxu1 %v12101_v20  ;;  %v12373_v20 = vld [vmem:[%s13287_s4 + $0x1c0] ss:$24 sps:$4 sm:$0xff]  }
 0x69f   :  { %6040 = vmatprep.subr.bf16.mxu1 %v12108_v57  ;;  %v12379_v57 = vld [vmem:[%s13287_s4 + $0x1f4] ss:$24 sps:$4 sm:$0xff]  }
 0x6a1   :  { %5362 = vmatpush1.bf16.msra.mxu0 %v12345_v56 }
 0x6a2   :  { %5363 = vmatprep.subr.bf16.mxu0 %v12351_v11  ;;  %6041 = vmatpush1.bf16.msra.mxu1 %v12113_v50  ;;  %v12387_v50 = vld [vmem:[%s13287_s4 + $0x1f0] ss:$24 sps:$4 sm:$0xff]  }
 0x6a3   :  { %6042 = vmatprep.subr.bf16.mxu1 %v12120_v48  ;;  %v12393_v48 = vld [vmem:[%s13287_s4 + $0x224] ss:$24 sps:$4 sm:$0xff]  }
 0x6a5   :  { %5364 = vmatpush1.bf16.msra.mxu0 %v12359_v42 }
 0x6a6   :  { %5365 = vmatprep.subr.bf16.mxu0 %v12365_v49  ;;  %6043 = vmatpush1.bf16.msra.mxu1 %v12125_v17  ;;  %v12401_v17 = vld [vmem:[%s13287_s4 + $0x220] ss:$24 sps:$4 sm:$0xff]  }
 0x6a7   :  { %6044 = vmatprep.subr.bf16.mxu1 %v12132_v27  ;;  %v12407_v27 = vld [vmem:[%s13287_s4 + $0x254] ss:$24 sps:$4 sm:$0xff]  }
 0x6a9   :  { %5366 = vmatpush1.bf16.msra.mxu0 %v12373_v20 }
 0x6aa   :  { %5367 = vmatprep.subr.bf16.mxu0 %v12379_v57  ;;  %6045 = vmatpush1.bf16.msra.mxu1 %v12137_v39  ;;  %v12415_v39 = vld [vmem:[%s13287_s4 + $0x250] ss:$24 sps:$4 sm:$0xff]  }
 0x6ab   :  { %6046 = vmatprep.subr.bf16.mxu1 %v12144_v54  ;;  %v12421_v54 = vld [vmem:[%s13287_s4 + $0x284] ss:$24 sps:$4 sm:$0xff]  }
 0x6ad   :  { %5368 = vmatpush1.bf16.msra.mxu0 %v12387_v50 }
 0x6ae   :  { %5369 = vmatprep.subr.bf16.mxu0 %v12393_v48  ;;  %6047 = vmatpush1.bf16.msra.mxu1 %v12149_v45  ;;  %v12429_v45 = vld [vmem:[%s13287_s4 + $0x280] ss:$24 sps:$4 sm:$0xff]  }
 0x6af   :  { %6048 = vmatprep.subr.bf16.mxu1 %v12156_v0  ;;  %v12435_v0 = vld [vmem:[%s13287_s4 + $0x2b4] ss:$24 sps:$4 sm:$0xff]  }
 0x6b1   :  { %5370 = vmatpush1.bf16.msra.mxu0 %v12401_v17 }
 0x6b2   :  { %5371 = vmatprep.subr.bf16.mxu0 %v12407_v27  ;;  %6049 = vmatpush1.bf16.msra.mxu1 %v12161_v59  ;;  %v12443_v59 = vld [vmem:[%s13287_s4 + $0x2b0] ss:$24 sps:$4 sm:$0xff]  }
 0x6b3   :  { %6050 = vmatprep.subr.bf16.mxu1 %v12167_v61  ;;  %v12449_v61 = vld [vmem:[%s13287_s4 + $0x2e4] ss:$24 sps:$4 sm:$0xff]  }
 0x6b5   :  { %5372 = vmatpush1.bf16.msra.mxu0 %v12415_v39 }
 0x6b6   :  { %5373 = vmatprep.subr.bf16.mxu0 %v12421_v54  ;;  %6051 = vmatpush1.bf16.msra.mxu1 %v12173_v12  ;;  %v12457_v12 = vld [vmem:[%s13287_s4 + $0x2e0] ss:$24 sps:$4 sm:$0xff]  }
 0x6b7   :  { %6052 = vmatprep.subr.bf16.mxu1 %v12179_v38  ;;  %v12469_v38 = vld [vmem:[%s13287_s4 + $0x8] ss:$24 sps:$4 sm:$0xff]  }
 0x6b9   :  { %5374 = vmatpush1.bf16.msra.mxu0 %v12429_v45 }
 0x6ba   :  { %5375 = vmatprep.subr.bf16.mxu0 %v12435_v0  ;;  %6053 = vmatpush1.bf16.msra.mxu1 %v12185_v46  ;;  %v12474_v46 = vld [vmem:[%s13287_s4 + $0xc] ss:$24 sps:$4 sm:$0xff]  }
 0x6bb   :  { %6054 = vmatprep.subr.bf16.mxu1 %v12191_v29  ;;  %v12479_v29 = vld [vmem:[%s13287_s4 + $0x3c] ss:$24 sps:$4 sm:$0xff]  }
 0x6bd   :  { %5376 = vmatpush1.bf16.msra.mxu0 %v12443_v59 }
 0x6be   :  { %5377 = vmatprep.subr.bf16.mxu0 %v12449_v61  ;;  %6055 = vmatpush1.bf16.msra.mxu1 %v12197_v23  ;;  %v12486_v23 = vld [vmem:[%s13287_s4 + $0x38] ss:$24 sps:$4 sm:$0xff]  }
 0x6bf   :  { %6056 = vmatprep.subr.bf16.mxu1 %v12203_v60  ;;  %v12492_v60 = vld [vmem:[%s13287_s4 + $0x6c] ss:$24 sps:$4 sm:$0xff]  }
 0x6c1   :  { %5378 = vmatpush1.bf16.msra.mxu0 %v12457_v12 }
 0x6c2   :  { %6057 = vmatpush1.bf16.msra.mxu1 %v12209_v22  ;;  %6067 = vmatprep.subr.bf16.mxu0 %v12474_v46  ;;  %v12498_v22 = vld [vmem:[%s13287_s4 + $0x68] ss:$24 sps:$4 sm:$0xff]  }
 0x6c3   :  { %6108 = vmatprep.subr.bf16.mxu1 %v12216_v18  ;;  %v12504_v18 = vld [vmem:[%s13287_s4 + $0x9c] ss:$24 sps:$4 sm:$0xff]  }
 0x6c4   :  { %5380 = vmatmul.mubr.bf16.vlgmr.msra.gmra.mrb[64].mxu0 %v12248_v44  ;;  %v12601_v44 = vld [vmem:[%s13287_s4 + $0x21c] ss:$24 sps:$4 sm:$0xff]  }
 0x6c5   :  { %6068 = vmatpush1.bf16.msra.mxu0 %v12469_v38  ;;  %13539 = vst [vmem:[#allocation28_spill] sm:$0xff] %v12601_v44 }
 0x6c6   :  { %6069 = vmatprep.subr.bf16.mxu0 %v12479_v29 }
 0x6c9   :  { %6070 = vmatpush1.bf16.msra.mxu0 %v12486_v23 }
 0x6ca   :  { %6071 = vmatprep.subr.bf16.mxu0 %v12492_v60 }
 0x6cd   :  { %6072 = vmatpush1.bf16.msra.mxu0 %v12498_v22 }
 0x6ce   :  { %6073 = vmatprep.subr.bf16.mxu0 %v12504_v18 }
 0x6d1   :  { %6074 = vmatpush1.bf16.msra.mxu0 %v12510_v37 }
 0x6d2   :  { %6075 = vmatprep.subr.bf16.mxu0 %v12516_v58 }
 0x6d5   :  { %6076 = vmatpush1.bf16.msra.mxu0 %v12522_v52  ;;  %v5389_v52 = vld [vmem:[#allocation2 + $0x44] ss:$60 sps:$4 sm:$0xff]  }
 0x6d6   :  { %6077 = vmatprep.subr.bf16.mxu0 %v12528_v1 }
 0x6d9   :  { %6078 = vmatpush1.bf16.msra.mxu0 %v12534_v36 }
 0x6da   :  { %6079 = vmatprep.subr.bf16.mxu0 %v12540_v25 }
 0x6dd   :  { %6080 = vmatpush1.bf16.msra.mxu0 %v12546_v15 }
 0x6de   :  { %6081 = vmatprep.subr.bf16.mxu0 %v12553_v32 }
 0x6e1   :  { %6082 = vmatpush1.bf16.msra.mxu0 %v12558_v26 }
 0x6e2   :  { %6083 = vmatprep.subr.bf16.mxu0 %v12565_v21 }
 0x6e5   :  { %6084 = vmatpush1.bf16.msra.mxu0 %v12570_v19 }
 0x6e6   :  { %6085 = vmatprep.subr.bf16.mxu0 %v12577_v5 }
 0x6e9   :  { %6086 = vmatpush1.bf16.msra.mxu0 %v12582_v41 }
 0x6ea   :  { %6087 = vmatprep.subr.bf16.mxu0 %v12589_v14 }
 0x6ed   :  { %6088 = vmatpush1.bf16.msra.mxu0 %v12594_v6 }
 0x6ee   :  { %6089 = vmatprep.subr.bf16.mxu0 %v12601_v44 }
 0x6f1   :  { %6090 = vmatpush1.bf16.msra.mxu0 %v12606_v30 }
 0x6f2   :  { %6091 = vmatprep.subr.bf16.mxu0 %v12611_v9  ;;  %v12642_v9 = vld [vmem:[%s13287_s4 + $0x2a8] ss:$24 sps:$4 sm:$0xff]  }
 0x6f3   :  { %13546 = vst [vmem:[#allocation45_spill] sm:$0xff] %v12642_v9 }
 0x6f5   :  { %6092 = vmatpush1.bf16.msra.mxu0 %v12618_v33  ;;  %v12648_v33 = vld [vmem:[%s13287_s4 + $0x2dc] ss:$24 sps:$4 sm:$0xff]  }
 0x6f6   :  { %6093 = vmatprep.subr.bf16.mxu0 %v12624_v43  ;;  %13547 = vst [vmem:[#allocation46_spill] sm:$0xff] %v12648_v33  ;;  %v12654_v43 = vld [vmem:[%s13287_s4 + $0x2d8] ss:$24 sps:$4 sm:$0xff]  }
 0x6f7   :  { %13548 = vst [vmem:[#allocation47_spill] sm:$0xff] %v12654_v43 }
 0x6f9   :  { %6094 = vmatpush1.bf16.msra.mxu0 %v12630_v2  ;;  %v5388_v2 = vld [vmem:[#allocation2 + $0x78] sm:$0xff] }
 0x6fa   :  { %6095 = vmatprep.subr.bf16.mxu0 %v12636_v3  ;;  %v5390_v30 = vunpack.c.l.bf16 %v5388_v2  ;;  %v5391_v5 = vunpack.c.h.bf16 %v5388_v2  ;;  %v5392_v2 = vunpack.c.h.bf16 %v5389_v52 }
 0x6fd   :  { %6096 = vmatpush1.bf16.msra.mxu0 %v12642_v9 }
 0x6fe   :  { %6097 = vmatprep.subr.bf16.mxu0 %v12648_v33 }
 0x701   :  { %6098 = vmatpush1.bf16.msra.mxu0 %v12654_v43 }
 0x757   :  { %v5299_v44 = vpop.f32.mrb[60].mxu0  ;;  %v5340_v3 = vpop.f32.mrb[48].mxu1 }
 0x758   :  { %v5398_v6 = vadd.f32 %v5390_v30, %v5299_v44  ;;  %v5301_v14 = vpop.f32.mrb[61].mxu0  ;;  %v5342_v41 = vpop.f32.mrb[49].mxu1  ;;  %v5412_v30 = vadd.f32 %v13522_v7, %v5340_v3  ;;  %v5393_v44 = vld [vmem:[#allocation2 + $0x3c] sm:$0xff] }
 0x759   :  { %v5303_v19 = vpop.f32.mrb[62].mxu0  ;;  %v5344_v21 = vpop.f32.mrb[50].mxu1  ;;  %v5399_v15 = vadd.f32 %v5391_v5, %v5301_v14  ;;  %v5396_v14 = vunpack.c.h.bf16 %v5393_v44 }
 0x75a   :  { %v8373_v9 = vmul.f32 -1.442695, %v5398_v6  ;;  %v5304_v26 = vpop.f32.mrb[63].mxu0  ;;  %v5345_v32 = vpop.f32.mrb[51].mxu1  ;;  %v5395_v21 = vunpack.c.l.bf16 %v5393_v44 }
 0x75b   :  { %v8374_v25 = vmul.f32 -1.442695, %v5399_v15 }
 0x75c   :  { %9630 = vpow2.f32 %v8373_v9  ;;  %v5420_v32 = vadd.f32 %v5395_v21, %v5342_v41 }
 0x75d   :  { %9632 = vpow2.f32 %v8374_v25 }
 0x75e   :  { %v8375_v9 = vmul.f32 -1.442695, %v5420_v32  ;;  %v5397_v32 = vunpack.c.l.bf16 %v5389_v52 }
 0x766   :  { %v9631_v33 = vpop.eup %9630 }
 0x767   :  { %v5406_v36 = vadd.f32 1.0, %v9631_v33  ;;  %v9633_v43 = vpop.eup %9632 }
 0x768   :  { %v5407_v1 = vadd.f32 1.0, %v9633_v43 }
 0x769   :  { %9634 = vrcp.f32 %v5406_v36 }
 0x76a   :  { %9636 = vrcp.f32 %v5407_v1 }
 0x773   :  { %v9635_v58 = vpop.eup %9634 }
 0x774   :  { %v5413_v19 = vmul.f32 %v9635_v58, %v5412_v30  ;;  %v9637_v15 = vpop.eup %9636 }
 0x775   :  { %v5416_v25 = vsub.f32 1.0, %v9637_v15  ;;  %v5418_v36 = vmul.f32 %v9637_v15, %v12231_v13 }
 0x776   :  { %v5414_v26 = vadd.f32 %v5413_v19, %v5392_v2 }
 0x778   :  { %9638 = vtanh.f32 %v5414_v26 }
 0x779   :  { %9640 = vpow2.f32 %v8375_v9 }
 0x782   :  { %v9639_v33 = vpop.eup %9638 }
 0x783   :  { %v5417_v43 = vmul.f32 %v9639_v33, %v5416_v25  ;;  %v9641_v7 = vpop.eup %9640 }
 0x784   :  { %v5428_v3 = vadd.f32 1.0, %v9641_v7 }
 0x785   :  { %v12660_v5 = vadd.f32 %v5418_v36, %v5417_v43 }
 0x786   :  { %9642 = vrcp.f32 %v5428_v3 }
 0x790   :  { %v9643_v2 = vpop.eup %9642 }
 0x797   :  { %v5381_v58 = vpop.f32.mrb[64].mxu0 }
 0x798   :  { %v5421_v1 = vadd.f32 %v5396_v14, %v5381_v58  ;;  %v5383_v6 = vpop.f32.mrb[65].mxu0  ;;  %v12670_v14 = vsel %vm3145_vm15, %v12660_v5, %v12231_v13  ;;  %v13551_v13 = vld [vmem:[#allocation14_spill] sm:$0xff] }
 0x799   :  { %v5434_v41 = vadd.f32 %v11933_v55, %v5383_v6  ;;  %v5385_v30 = vpop.f32.mrb[66].mxu0  ;;  %v5448_v6 = vpack.c.bf16 %v12670_v14, %v12670_v14 }
 0x79a   :  { %v8376_v19 = vmul.f32 -1.442695, %v5421_v1  ;;  %v5386_v21 = vpop.f32.mrb[67].mxu0  ;;  %v9391_v30 = vld [vmem:[%s13287_s4 + $0x1b4] ss:$24 sps:$4 sm:$0xff]  }
 0x79b   :  { %v5435_v26 = vmul.f32 %v9643_v2, %v5434_v41  ;;  %v9386_v41 = vld [vmem:[%s13287_s4 + $0x180] ss:$24 sps:$4 sm:$0xff]   ;;  %v9389_v2 = vld [vmem:[%s13287_s4 + $0x1b0] ss:$24 sps:$4 sm:$0xff]  }
 0x79c   :  { %9644 = vpow2.f32 %v8376_v19  ;;  %v9394_v19 = vld [vmem:[%s13287_s4 + $0x1e4] ss:$24 sps:$4 sm:$0xff]   ;;  %v9392_v21 = vld [vmem:[%s13287_s4 + $0x1e0] ss:$24 sps:$4 sm:$0xff]  }
 0x79d   :  { %v5436_v25 = vadd.f32 %v5435_v26, %v5397_v32  ;;  %v9397_v26 = vld [vmem:[%s13287_s4 + $0x214] ss:$24 sps:$4 sm:$0xff]   ;;  %v9395_v32 = vld [vmem:[%s13287_s4 + $0x210] ss:$24 sps:$4 sm:$0xff]  }
 0x7a6   :  { %v9645_v9 = vpop.eup %9644 }
 0x7a7   :  { %v5429_v15 = vadd.f32 1.0, %v9645_v9  ;;  %v9400_v9 = vld [vmem:[%s13287_s4 + $0x244] ss:$24 sps:$4 sm:$0xff]  }
 0x7a9   :  { %9646 = vrcp.f32 %v5429_v15  ;;  %v9398_v15 = vld [vmem:[%s13287_s4 + $0x240] ss:$24 sps:$4 sm:$0xff]  }
 0x7aa   :  { %9648 = vtanh.f32 %v5436_v25  ;;  %v9403_v25 = vld [vmem:[%s13287_s4 + $0x274] ss:$24 sps:$4 sm:$0xff]  }
 0x7b3   :  { %v9647_v33 = vpop.eup %9646 }
 0x7b4   :  { %v5438_v36 = vsub.f32 1.0, %v9647_v33  ;;  %v9649_v44 = vpop.eup %9648  ;;  %v5440_v7 = vmul.f32 %v9647_v33, %v12237_v10  ;;  %v9401_v33 = vld [vmem:[%s13287_s4 + $0x270] ss:$24 sps:$4 sm:$0xff]  }
 0x7b6   :  { %v5439_v43 = vmul.f32 %v9649_v44, %v5438_v36  ;;  %v9406_v36 = vld [vmem:[%s13287_s4 + $0x2a4] ss:$24 sps:$4 sm:$0xff]   ;;  %v9404_v44 = vld [vmem:[%s13287_s4 + $0x2a0] ss:$24 sps:$4 sm:$0xff]  }
 0x7b8   :  { %v12664_v3 = vadd.f32 %v5440_v7, %v5439_v43  ;;  %v9409_v43 = vld [vmem:[%s13287_s4 + $0x2d4] ss:$24 sps:$4 sm:$0xff]   ;;  %v9407_v7 = vld [vmem:[%s13287_s4 + $0x2d0] ss:$24 sps:$4 sm:$0xff]  }
 0x7ba   :  { %v12676_v58 = vsel %vm3137_vm14, %v12664_v3, %v12237_v10  ;;  %v13552_v10 = vld [vmem:[#allocation15_spill] sm:$0xff] }
 0x7bb   :  { %v5449_v1 = vpack.c.bf16 %v12676_v58, %v12676_v58 }
 0x7bd   :  { %6058 = vmatprep.mubr.bf16.mxu1 %v5449_v1  ;;  %6099 = vmatprep.mubr.bf16.mxu0 %v5449_v1 }
 0x7be   :  { %6059 = vmatmul.mubr.bf16.vlgmr.msra.gmra.mrb[52].mxu1 %v5448_v6  ;;  %6100 = vmatmul.mubr.bf16.vlgmr.msra.gmra.mrb[68].mxu0 %v5448_v6 }
 0x7bf   :  { %6109 = vmatpush1.bf16.msra.mxu1 %v12244_v28  ;;  %6140 = vmatprep.mubr.bf16.mxu1 %v5449_v1  ;;  %v13553_v28 = vld [vmem:[#allocation16_spill] sm:$0xff]  ;;  %v9412_v1 = vld [vmem:[%s13287_s4 + $0x14] ss:$24 sps:$4 sm:$0xff]  }
 0x7c0   :  { %6110 = vmatprep.subr.bf16.mxu1 %v12253_v35  ;;  %v13554_v35 = vld [vmem:[#allocation17_spill] sm:$0xff] }
 0x7c3   :  { %6111 = vmatpush1.bf16.msra.mxu1 %v12261_v24  ;;  %v13555_v24 = vld [vmem:[#allocation18_spill] sm:$0xff] }
 0x7c4   :  { %6112 = vmatprep.subr.bf16.mxu1 %v12267_v31  ;;  %v13556_v31 = vld [vmem:[#allocation19_spill] sm:$0xff] }
 0x7c7   :  { %6113 = vmatpush1.bf16.msra.mxu1 %v12275_v16  ;;  %v13557_v16 = vld [vmem:[#allocation20_spill] sm:$0xff] }
 0x7c8   :  { %6114 = vmatprep.subr.bf16.mxu1 %v12281_v40  ;;  %v13558_v40 = vld [vmem:[#allocation21_spill] sm:$0xff] }
 0x7cb   :  { %6115 = vmatpush1.bf16.msra.mxu1 %v12289_v53  ;;  %v13559_v53 = vld [vmem:[#allocation22_spill] sm:$0xff] }
 0x7cc   :  { %6116 = vmatprep.subr.bf16.mxu1 %v12295_v8  ;;  %v13560_v8 = vld [vmem:[#allocation23_spill] sm:$0xff] }
 0x7cf   :  { %6117 = vmatpush1.bf16.msra.mxu1 %v12303_v51  ;;  %v13561_v51 = vld [vmem:[#allocation24_spill] sm:$0xff] }
 0x7d0   :  { %6118 = vmatprep.subr.bf16.mxu1 %v12309_v4  ;;  %v13562_v4 = vld [vmem:[#allocation25_spill] sm:$0xff] }
 0x7d3   :  { %6119 = vmatpush1.bf16.msra.mxu1 %v12317_v34  ;;  %v13563_v34 = vld [vmem:[#allocation26_spill] sm:$0xff] }
 0x7d4   :  { %6120 = vmatprep.subr.bf16.mxu1 %v12323_v62  ;;  %v13564_v62 = vld [vmem:[#allocation27_spill] sm:$0xff] }
 0x7d7   :  { %6121 = vmatpush1.bf16.msra.mxu1 %v12331_v63  ;;  %v13565_v63 = vld [vmem:[#allocation28_spill] sm:$0xff] }
 0x7d8   :  { %6122 = vmatprep.subr.bf16.mxu1 %v12337_v47  ;;  %v13566_v47 = vld [vmem:[#allocation29_spill] sm:$0xff] }
 0x7db   :  { %6123 = vmatpush1.bf16.msra.mxu1 %v12345_v56  ;;  %v13567_v56 = vld [vmem:[#allocation30_spill] sm:$0xff] }
 0x7dc   :  { %6124 = vmatprep.subr.bf16.mxu1 %v12351_v11  ;;  %v13568_v11 = vld [vmem:[#allocation31_spill] sm:$0xff] }
 0x7df   :  { %6125 = vmatpush1.bf16.msra.mxu1 %v12359_v42  ;;  %v13569_v42 = vld [vmem:[#allocation32_spill] sm:$0xff] }
 0x7e0   :  { %6126 = vmatprep.subr.bf16.mxu1 %v12365_v49  ;;  %v9362_v49 = vld [vmem:[%s13287_s4] ss:$24 sps:$4 sm:$0xff]  }
 0x7e3   :  { %6127 = vmatpush1.bf16.msra.mxu1 %v12373_v20  ;;  %v9364_v20 = vld [vmem:[%s13287_s4 + $0x4] ss:$24 sps:$4 sm:$0xff]  }
 0x7e4   :  { %6128 = vmatprep.subr.bf16.mxu1 %v12379_v57  ;;  %v9367_v57 = vld [vmem:[%s13287_s4 + $0x34] ss:$24 sps:$4 sm:$0xff]   ;;  %6787 = vmatprep.subr.bf16.mxu0 %v9364_v20 }
 0x7e5   :  { %6788 = vmatpush1.bf16.msra.mxu0 %v9362_v49  ;;  %v12847_v49 = vld [vmem:[%s13291_s5] ss:$0 sm:$0xff] }
 0x7e6   :  { %6789 = vmatprep.subr.bf16.mxu0 %v9367_v57  ;;  %v6154_v57 = vld [vmem:[#allocation2 + $0x24] sm:$0xff] }
 0x7e7   :  { %6129 = vmatpush1.bf16.msra.mxu1 %v12387_v50  ;;  %v13570_v50 = vld [vmem:[#allocation33_spill] sm:$0xff] }
 0x7e8   :  { %6130 = vmatprep.subr.bf16.mxu1 %v12393_v48  ;;  %v13571_v48 = vld [vmem:[#allocation40_spill] sm:$0xff] }
 0x7eb   :  { %6131 = vmatpush1.bf16.msra.mxu1 %v12401_v17  ;;  %v9365_v17 = vld [vmem:[%s13287_s4 + $0x30] ss:$24 sps:$4 sm:$0xff]  }
 0x7ec   :  { %6132 = vmatprep.subr.bf16.mxu1 %v12407_v27  ;;  %v9370_v27 = vld [vmem:[%s13287_s4 + $0x64] ss:$24 sps:$4 sm:$0xff]   ;;  %6790 = vmatpush1.bf16.msra.mxu0 %v9365_v17 }
 0x7ed   :  { %6791 = vmatprep.subr.bf16.mxu0 %v9370_v27  ;;  %v6156_v27 = vunpack.c.l.bf16 %v6154_v57 }
 0x7ef   :  { %6133 = vmatpush1.bf16.msra.mxu1 %v12415_v39  ;;  %v13572_v39 = vld [vmem:[#allocation45_spill] sm:$0xff] }
 0x7f0   :  { %6134 = vmatprep.subr.bf16.mxu1 %v12421_v54  ;;  %v13573_v54 = vld [vmem:[#allocation46_spill] sm:$0xff] }
 0x7f3   :  { %6135 = vmatpush1.bf16.msra.mxu1 %v12429_v45  ;;  %v9368_v45 = vld [vmem:[%s13287_s4 + $0x60] ss:$24 sps:$4 sm:$0xff]  }
 0x7f4   :  { %6136 = vmatprep.subr.bf16.mxu1 %v12435_v0  ;;  %v9373_v0 = vld [vmem:[%s13287_s4 + $0x94] ss:$24 sps:$4 sm:$0xff]   ;;  %6792 = vmatpush1.bf16.msra.mxu0 %v9368_v45 }
 0x7f5   :  { %6793 = vmatprep.subr.bf16.mxu0 %v9373_v0 }
 0x7f7   :  { %6137 = vmatpush1.bf16.msra.mxu1 %v12443_v59  ;;  %v13574_v59 = vld [vmem:[#allocation47_spill] sm:$0xff] }
 0x7f8   :  { %6138 = vmatprep.subr.bf16.mxu1 %v12449_v61  ;;  %v9371_v61 = vld [vmem:[%s13287_s4 + $0x90] ss:$24 sps:$4 sm:$0xff]  }
 0x7f9   :  { %6794 = vmatpush1.bf16.msra.mxu0 %v9371_v61 }
 0x7fb   :  { %6139 = vmatpush1.bf16.msra.mxu1 %v12457_v12  ;;  %v9376_v12 = vld [vmem:[%s13287_s4 + $0xc4] ss:$24 sps:$4 sm:$0xff]  }
 0x7fc   :  { %6828 = vmatprep.subr.bf16.mxu1 %v12474_v46  ;;  %6795 = vmatprep.subr.bf16.mxu0 %v9376_v12  ;;  %v9379_v46 = vld [vmem:[%s13287_s4 + $0xf4] ss:$24 sps:$4 sm:$0xff]  }
 0x7fe   :  { %6141 = vmatmul.mubr.bf16.vlgmr.msra.gmra.mrb[56].mxu1 %v5448_v6  ;;  %v6149_v6 = vld [vmem:[#allocation2 + $0x90] sm:$0xff] }
 0x7ff   :  { %6829 = vmatpush1.bf16.msra.mxu1 %v12469_v38  ;;  %v9374_v38 = vld [vmem:[%s13287_s4 + $0xc0] ss:$24 sps:$4 sm:$0xff]  }
 0x800   :  { %6830 = vmatprep.subr.bf16.mxu1 %v12479_v29  ;;  %6796 = vmatpush1.bf16.msra.mxu0 %v9374_v38  ;;  %v9377_v29 = vld [vmem:[%s13287_s4 + $0xf0] ss:$24 sps:$4 sm:$0xff]  }
 0x801   :  { %6797 = vmatprep.subr.bf16.mxu0 %v9379_v46 }
 0x803   :  { %6831 = vmatpush1.bf16.msra.mxu1 %v12486_v23  ;;  %v9382_v23 = vld [vmem:[%s13287_s4 + $0x124] ss:$24 sps:$4 sm:$0xff]  }
 0x804   :  { %6832 = vmatprep.subr.bf16.mxu1 %v12492_v60  ;;  %6798 = vmatpush1.bf16.msra.mxu0 %v9377_v29  ;;  %v9380_v60 = vld [vmem:[%s13287_s4 + $0x120] ss:$24 sps:$4 sm:$0xff]  }
 0x805   :  { %6799 = vmatprep.subr.bf16.mxu0 %v9382_v23 }
 0x807   :  { %6833 = vmatpush1.bf16.msra.mxu1 %v12498_v22  ;;  %v9385_v22 = vld [vmem:[%s13287_s4 + $0x154] ss:$24 sps:$4 sm:$0xff]  }
 0x808   :  { %6834 = vmatprep.subr.bf16.mxu1 %v12504_v18  ;;  %6800 = vmatpush1.bf16.msra.mxu0 %v9380_v60  ;;  %v9383_v18 = vld [vmem:[%s13287_s4 + $0x150] ss:$24 sps:$4 sm:$0xff]   ;;  %v6157_v60 = vunpack.c.h.bf16 %v6154_v57 }
 0x809   :  { %6801 = vmatprep.subr.bf16.mxu0 %v9385_v22  ;;  %v9434_v57 = vld [vmem:[%s13287_s4 + $0x190] ss:$24 sps:$4 sm:$0xff]  }
 0x80b   :  { %6835 = vmatpush1.bf16.msra.mxu1 %v12510_v37  ;;  %v9388_v37 = vld [vmem:[%s13287_s4 + $0x184] ss:$24 sps:$4 sm:$0xff]  }
 0x80c   :  { %6836 = vmatprep.subr.bf16.mxu1 %v13551_v13  ;;  %6802 = vmatpush1.bf16.msra.mxu0 %v9383_v18  ;;  %v6151_v13 = vunpack.c.l.bf16 %v6149_v6 }
 0x80d   :  { %6803 = vmatprep.subr.bf16.mxu0 %v9388_v37 }
 0x80f   :  { %6837 = vmatpush1.bf16.msra.mxu1 %v13552_v10 }
 0x810   :  { %6838 = vmatprep.subr.bf16.mxu1 %v13553_v28  ;;  %6804 = vmatpush1.bf16.msra.mxu0 %v9386_v41  ;;  %v12856_v41 = vld [vmem:[%s13291_s5 + $0x1] ss:$0 sm:$0xff] }
 0x811   :  { %6805 = vmatprep.subr.bf16.mxu0 %v9391_v30 }
 0x813   :  { %6839 = vmatpush1.bf16.msra.mxu1 %v13554_v35 }
 0x814   :  { %6840 = vmatprep.subr.bf16.mxu1 %v13555_v24  ;;  %6806 = vmatpush1.bf16.msra.mxu0 %v9389_v2 }
 0x815   :  { %6807 = vmatprep.subr.bf16.mxu0 %v9394_v19 }
 0x817   :  { %6841 = vmatpush1.bf16.msra.mxu1 %v13556_v31 }
 0x818   :  { %6842 = vmatprep.subr.bf16.mxu1 %v13557_v16  ;;  %6808 = vmatpush1.bf16.msra.mxu0 %v9392_v21  ;;  %v6152_v16 = vunpack.c.h.bf16 %v6149_v6 }
 0x819   :  { %6809 = vmatprep.subr.bf16.mxu0 %v9397_v26 }
 0x81b   :  { %6843 = vmatpush1.bf16.msra.mxu1 %v13558_v40 }
 0x81c   :  { %6844 = vmatprep.subr.bf16.mxu1 %v13559_v53  ;;  %6810 = vmatpush1.bf16.msra.mxu0 %v9395_v32 }
 0x81d   :  { %6811 = vmatprep.subr.bf16.mxu0 %v9400_v9 }
 0x81f   :  { %6845 = vmatpush1.bf16.msra.mxu1 %v13560_v8 }
 0x820   :  { %6846 = vmatprep.subr.bf16.mxu1 %v13561_v51  ;;  %6812 = vmatpush1.bf16.msra.mxu0 %v9398_v15 }
 0x821   :  { %6813 = vmatprep.subr.bf16.mxu0 %v9403_v25 }
 0x823   :  { %6847 = vmatpush1.bf16.msra.mxu1 %v13562_v4 }
 0x824   :  { %6848 = vmatprep.subr.bf16.mxu1 %v13563_v34  ;;  %6814 = vmatpush1.bf16.msra.mxu0 %v9401_v33 }
 0x825   :  { %6815 = vmatprep.subr.bf16.mxu0 %v9406_v36 }
 0x827   :  { %6849 = vmatpush1.bf16.msra.mxu1 %v13564_v62 }
 0x828   :  { %6850 = vmatprep.subr.bf16.mxu1 %v13565_v63  ;;  %6816 = vmatpush1.bf16.msra.mxu0 %v9404_v44 }
 0x829   :  { %6817 = vmatprep.subr.bf16.mxu0 %v9409_v43 }
 0x82b   :  { %6851 = vmatpush1.bf16.msra.mxu1 %v13566_v47 }
 0x82c   :  { %6852 = vmatprep.subr.bf16.mxu1 %v13567_v56  ;;  %6818 = vmatpush1.bf16.msra.mxu0 %v9407_v7 }
 0x82d   :  { %6869 = vmatprep.subr.bf16.mxu0 %v9412_v1 }
 0x82f   :  { %6853 = vmatpush1.bf16.msra.mxu1 %v13568_v11 }
 0x830   :  { %6854 = vmatprep.subr.bf16.mxu1 %v13569_v42  ;;  %v6150_v42 = vld [vmem:[#allocation2 + $0x2c] ss:$108 sps:$4 sm:$0xff]  }
 0x831   :  { %v6158_v9 = vunpack.c.l.bf16 %v6150_v42 }
 0x833   :  { %6855 = vmatpush1.bf16.msra.mxu1 %v13570_v50 }
 0x834   :  { %6856 = vmatprep.subr.bf16.mxu1 %v13571_v48  ;;  %v6153_v48 = vunpack.c.h.bf16 %v6150_v42  ;;  %v9431_v42 = vld [vmem:[%s13287_s4 + $0x160] ss:$24 sps:$4 sm:$0xff]  }
 0x837   :  { %6857 = vmatpush1.bf16.msra.mxu1 %v13572_v39 }
 0x838   :  { %6858 = vmatprep.subr.bf16.mxu1 %v13573_v54 }
 0x83b   :  { %6859 = vmatpush1.bf16.msra.mxu1 %v13574_v59 }
 0x891   :  { %v6060_v10 = vpop.f32.mrb[52].mxu1  ;;  %v6101_v28 = vpop.f32.mrb[68].mxu0 }
 0x892   :  { %v6159_v35 = vadd.f32 %v6151_v13, %v6060_v10  ;;  %v6062_v24 = vpop.f32.mrb[53].mxu1  ;;  %v6103_v31 = vpop.f32.mrb[69].mxu0  ;;  %v6173_v20 = vadd.f32 %v12847_v49, %v6101_v28 }
 0x893   :  { %v6064_v40 = vpop.f32.mrb[54].mxu1  ;;  %v6105_v53 = vpop.f32.mrb[70].mxu0  ;;  %v6160_v34 = vadd.f32 %v6152_v16, %v6062_v24  ;;  %v6181_v54 = vadd.f32 %v6156_v27, %v6103_v31  ;;  %v9410_v31 = vld [vmem:[%s13287_s4 + $0x10] ss:$24 sps:$4 sm:$0xff]  }
 0x894   :  { %v8473_v8 = vmul.f32 -1.442695, %v6159_v35  ;;  %v6065_v51 = vpop.f32.mrb[55].mxu1  ;;  %v6106_v4 = vpop.f32.mrb[71].mxu0  ;;  %v9418_v40 = vld [vmem:[%s13287_s4 + $0x74] ss:$24 sps:$4 sm:$0xff]  }
 0x895   :  { %v8474_v62 = vmul.f32 -1.442695, %v6160_v34  ;;  %v8475_v45 = vmul.f32 -1.442695, %v6181_v54  ;;  %v9416_v53 = vld [vmem:[%s13287_s4 + $0x70] ss:$24 sps:$4 sm:$0xff]  }
 0x896   :  { %9650 = vpow2.f32 %v8473_v8  ;;  %v9421_v8 = vld [vmem:[%s13287_s4 + $0xa4] ss:$24 sps:$4 sm:$0xff]   ;;  %v9419_v51 = vld [vmem:[%s13287_s4 + $0xa0] ss:$24 sps:$4 sm:$0xff]   ;;  %v9424_v4 = vld [vmem:[%s13287_s4 + $0xd4] ss:$24 sps:$4 sm:$0xff]  }
 0x897   :  { %9652 = vpow2.f32 %v8474_v62  ;;  %v9422_v34 = vld [vmem:[%s13287_s4 + $0xd0] ss:$24 sps:$4 sm:$0xff]   ;;  %v9427_v62 = vld [vmem:[%s13287_s4 + $0x104] ss:$24 sps:$4 sm:$0xff]   ;;  %v9443_v54 = vld [vmem:[%s13287_s4 + $0x220] ss:$24 sps:$4 sm:$0xff]  }
 0x898   :  { %v9440_v27 = vld [vmem:[%s13287_s4 + $0x1f0] ss:$24 sps:$4 sm:$0xff]  }
 0x8a0   :  { %v9651_v63 = vpop.eup %9650 }
 0x8a1   :  { %v6167_v47 = vadd.f32 1.0, %v9651_v63  ;;  %v9653_v56 = vpop.eup %9652  ;;  %v9425_v63 = vld [vmem:[%s13287_s4 + $0x100] ss:$24 sps:$4 sm:$0xff]  }
 0x8a2   :  { %v6168_v11 = vadd.f32 1.0, %v9653_v56  ;;  %v9428_v56 = vld [vmem:[%s13287_s4 + $0x130] ss:$24 sps:$4 sm:$0xff]  }
 0x8a3   :  { %9654 = vrcp.f32 %v6167_v47  ;;  %v9430_v47 = vld [vmem:[%s13287_s4 + $0x134] ss:$24 sps:$4 sm:$0xff]  }
 0x8a4   :  { %9656 = vrcp.f32 %v6168_v11  ;;  %v9433_v11 = vld [vmem:[%s13287_s4 + $0x164] ss:$24 sps:$4 sm:$0xff]  }
 0x8ad   :  { %v9655_v50 = vpop.eup %9654 }
 0x8ae   :  { %v6174_v17 = vmul.f32 %v9655_v50, %v6173_v20  ;;  %v9657_v0 = vpop.eup %9656  ;;  %v9436_v20 = vld [vmem:[%s13287_s4 + $0x194] ss:$24 sps:$4 sm:$0xff]   ;;  %v9439_v50 = vld [vmem:[%s13287_s4 + $0x1c4] ss:$24 sps:$4 sm:$0xff]  }
 0x8af   :  { %v6177_v59 = vsub.f32 1.0, %v9657_v0  ;;  %v6179_v12 = vmul.f32 %v9657_v0, %v12670_v14  ;;  %v9446_v0 = vld [vmem:[%s13287_s4 + $0x250] ss:$24 sps:$4 sm:$0xff]  }
 0x8b0   :  { %v6175_v39 = vadd.f32 %v6174_v17, %v6153_v48  ;;  %v9437_v48 = vld [vmem:[%s13287_s4 + $0x1c0] ss:$24 sps:$4 sm:$0xff]   ;;  %v9442_v17 = vld [vmem:[%s13287_s4 + $0x1f4] ss:$24 sps:$4 sm:$0xff]  }
 0x8b2   :  { %9658 = vtanh.f32 %v6175_v39  ;;  %v9445_v39 = vld [vmem:[%s13287_s4 + $0x224] ss:$24 sps:$4 sm:$0xff]  }
 0x8b3   :  { %9660 = vpow2.f32 %v8475_v45  ;;  %v9448_v45 = vld [vmem:[%s13287_s4 + $0x254] ss:$24 sps:$4 sm:$0xff]  }
 0x8bc   :  { %v9659_v61 = vpop.eup %9658 }
 0x8bd   :  { %v6178_v38 = vmul.f32 %v9659_v61, %v6177_v59  ;;  %v9661_v29 = vpop.eup %9660  ;;  %v9451_v59 = vld [vmem:[%s13287_s4 + $0x284] ss:$24 sps:$4 sm:$0xff]   ;;  %v9449_v61 = vld [vmem:[%s13287_s4 + $0x280] ss:$24 sps:$4 sm:$0xff]  }
 0x8be   :  { %v6189_v23 = vadd.f32 1.0, %v9661_v29  ;;  %v9457_v29 = vld [vmem:[%s13287_s4 + $0x2e4] ss:$24 sps:$4 sm:$0xff]  }
 0x8bf   :  { %v12851_v46 = vadd.f32 %v6179_v12, %v6178_v38  ;;  %v9454_v12 = vld [vmem:[%s13287_s4 + $0x2b4] ss:$24 sps:$4 sm:$0xff]   ;;  %v9452_v38 = vld [vmem:[%s13287_s4 + $0x2b0] ss:$24 sps:$4 sm:$0xff]  }
 0x8c0   :  { %9662 = vrcp.f32 %v6189_v23  ;;  %v9455_v23 = vld [vmem:[%s13287_s4 + $0x2e0] ss:$24 sps:$4 sm:$0xff]  }
 0x8c1   :  { %v12866_v10 = vsel %vm2370_vm13, %v12851_v46, %v12670_v14  ;;  %v9415_v14 = vld [vmem:[%s13287_s4 + $0x44] ss:$24 sps:$4 sm:$0xff]  }
 0x8c2   :  { %v12881_v16 = vpack.c.bf16 %v12866_v10, %v12866_v10 }
 0x8ca   :  { %v9663_v19 = vpop.eup %9662 }
 0x8d1   :  { %v6142_v22 = vpop.f32.mrb[56].mxu1 }
 0x8d2   :  { %v6182_v18 = vadd.f32 %v6157_v60, %v6142_v22  ;;  %v6144_v37 = vpop.f32.mrb[57].mxu1  ;;  %v9458_v60 = vld [vmem:[%s13292_s6] ss:$8 sps:$4 sm:$0xff]   ;;  %v9460_v22 = vld [vmem:[%s13292_s6 + $0x4] ss:$8 sps:$4 sm:$0xff]  }
 0x8d3   :  { %v6195_v30 = vadd.f32 %v12856_v41, %v6144_v37  ;;  %v6146_v2 = vpop.f32.mrb[58].mxu1  ;;  %7192 = vmatprep.subr.bf16.mxu1 %v9460_v22  ;;  %v9461_v37 = vld [vmem:[%s13292_s6 + $0x10] ss:$8 sps:$4 sm:$0xff]  }
 0x8d4   :  { %v8476_v21 = vmul.f32 -1.442695, %v6182_v18  ;;  %v6147_v26 = vpop.f32.mrb[59].mxu1  ;;  %v9463_v18 = vld [vmem:[%s13292_s6 + $0x14] ss:$8 sps:$4 sm:$0xff]   ;;  %v6915_v22 = vld [vmem:[#allocation2 + $0xc] sm:$0xff] }
 0x8d5   :  { %v6196_v32 = vmul.f32 %v9663_v19, %v6195_v30  ;;  %v9466_v30 = vld [vmem:[%s13292_s6 + $0x24] ss:$8 sps:$4 sm:$0xff]   ;;  %v9464_v2 = vld [vmem:[%s13292_s6 + $0x20] ss:$8 sps:$4 sm:$0xff]   ;;  %v9469_v19 = vld [vmem:[%s13292_s6 + $0x34] ss:$8 sps:$4 sm:$0xff]  }
 0x8d6   :  { %9664 = vpow2.f32 %v8476_v21  ;;  %v9467_v21 = vld [vmem:[%s13292_s6 + $0x30] ss:$8 sps:$4 sm:$0xff]   ;;  %v9472_v26 = vld [vmem:[%s13292_s6 + $0x44] ss:$8 sps:$4 sm:$0xff]  }
 0x8d7   :  { %v6197_v33 = vadd.f32 %v6196_v32, %v6158_v9  ;;  %v9470_v32 = vld [vmem:[%s13292_s6 + $0x40] ss:$8 sps:$4 sm:$0xff]   ;;  %v9475_v9 = vld [vmem:[%s13292_s6 + $0x54] ss:$8 sps:$4 sm:$0xff]  }
 0x8e0   :  { %v9665_v15 = vpop.eup %9664 }
 0x8e1   :  { %v6190_v25 = vadd.f32 1.0, %v9665_v15  ;;  %v9473_v15 = vld [vmem:[%s13292_s6 + $0x50] ss:$8 sps:$4 sm:$0xff]  }
 0x8e3   :  { %9666 = vrcp.f32 %v6190_v25  ;;  %v9478_v25 = vld [vmem:[%s13292_s6 + $0x64] ss:$8 sps:$4 sm:$0xff]  }
 0x8e4   :  { %9668 = vtanh.f32 %v6197_v33  ;;  %v9476_v33 = vld [vmem:[%s13292_s6 + $0x60] ss:$8 sps:$4 sm:$0xff]  }
 0x8ed   :  { %v9667_v36 = vpop.eup %9666 }
 0x8ee   :  { %v6199_v44 = vsub.f32 1.0, %v9667_v36  ;;  %v9669_v43 = vpop.eup %9668  ;;  %v6201_v1 = vmul.f32 %v9667_v36, %v12676_v58  ;;  %v9481_v36 = vld [vmem:[%s13292_s6 + $0x74] ss:$8 sps:$4 sm:$0xff]  }
 0x8f0   :  { %v6200_v7 = vmul.f32 %v9669_v43, %v6199_v44  ;;  %v9479_v44 = vld [vmem:[%s13292_s6 + $0x70] ss:$8 sps:$4 sm:$0xff]   ;;  %v9484_v43 = vld [vmem:[%s13292_s6 + $0x84] ss:$8 sps:$4 sm:$0xff]  }
 0x8f2   :  { %v12860_v6 = vadd.f32 %v6201_v1, %v6200_v7  ;;  %v9482_v7 = vld [vmem:[%s13292_s6 + $0x80] ss:$8 sps:$4 sm:$0xff]   ;;  %v9487_v1 = vld [vmem:[%s13292_s6 + $0x94] ss:$8 sps:$4 sm:$0xff]  }
 0x8f4   :  { %v12872_v35 = vsel %vm2362_vm12, %v12860_v6, %v12676_v58  ;;  %v9413_v58 = vld [vmem:[%s13287_s4 + $0x40] ss:$24 sps:$4 sm:$0xff]  }
 0x8f5   :  { %v6210_v24 = vpack.c.bf16 %v12872_v35, %v12872_v35 }
 0x8f7   :  { %6819 = vmatprep.mubr.bf16.mxu0 %v6210_v24  ;;  %6860 = vmatprep.mubr.bf16.mxu1 %v6210_v24 }
 0x8f8   :  { %6820 = vmatmul.mubr.bf16.vlgmr.msra.gmra.mrb[72].mxu0 %v12881_v16  ;;  %6861 = vmatmul.mubr.bf16.vlgmr.msra.gmra.mrb[60].mxu1 %v12881_v16 }
 0x8f9   :  { %6870 = vmatpush1.bf16.msra.mxu0 %v9410_v31  ;;  %6901 = vmatprep.mubr.bf16.mxu0 %v6210_v24  ;;  %v9485_v24 = vld [vmem:[%s13292_s6 + $0x90] ss:$8 sps:$4 sm:$0xff]   ;;  %v9490_v31 = vld [vmem:[%s13292_s6 + $0xa4] ss:$8 sps:$4 sm:$0xff]  }
 0x8fa   :  { %6871 = vmatprep.subr.bf16.mxu0 %v9415_v14  ;;  %7193 = vmatpush1.bf16.msra.mxu1 %v9458_v60  ;;  %v9493_v14 = vld [vmem:[%s13292_s6 + $0xb4] ss:$8 sps:$4 sm:$0xff]  }
 0x8fb   :  { %7194 = vmatprep.subr.bf16.mxu1 %v9463_v18 }
 0x8fd   :  { %6872 = vmatpush1.bf16.msra.mxu0 %v9413_v58  ;;  %v9491_v58 = vld [vmem:[%s13292_s6 + $0xb0] ss:$8 sps:$4 sm:$0xff]  }
 0x8fe   :  { %6873 = vmatprep.subr.bf16.mxu0 %v9418_v40  ;;  %7195 = vmatpush1.bf16.msra.mxu1 %v9461_v37  ;;  %v9496_v40 = vld [vmem:[%s13292_s6 + $0xc4] ss:$8 sps:$4 sm:$0xff]  }
 0x8ff   :  { %7196 = vmatprep.subr.bf16.mxu1 %v9466_v30 }
 0x901   :  { %6874 = vmatpush1.bf16.msra.mxu0 %v9416_v53  ;;  %v9494_v53 = vld [vmem:[%s13292_s6 + $0xc0] ss:$8 sps:$4 sm:$0xff]  }
 0x902   :  { %6875 = vmatprep.subr.bf16.mxu0 %v9421_v8  ;;  %7197 = vmatpush1.bf16.msra.mxu1 %v9464_v2  ;;  %v9499_v8 = vld [vmem:[%s13292_s6 + $0xd4] ss:$8 sps:$4 sm:$0xff]   ;;  %v6917_v2 = vunpack.c.l.bf16 %v6915_v22 }
 0x903   :  { %7198 = vmatprep.subr.bf16.mxu1 %v9469_v19 }
 0x905   :  { %6876 = vmatpush1.bf16.msra.mxu0 %v9419_v51  ;;  %v9497_v51 = vld [vmem:[%s13292_s6 + $0xd0] ss:$8 sps:$4 sm:$0xff]  }
 0x906   :  { %6877 = vmatprep.subr.bf16.mxu0 %v9424_v4  ;;  %7199 = vmatpush1.bf16.msra.mxu1 %v9467_v21  ;;  %v9502_v4 = vld [vmem:[%s13292_s6 + $0xe4] ss:$8 sps:$4 sm:$0xff]  }
 0x907   :  { %7200 = vmatprep.subr.bf16.mxu1 %v9472_v26 }
 0x909   :  { %6878 = vmatpush1.bf16.msra.mxu0 %v9422_v34  ;;  %v9500_v34 = vld [vmem:[%s13292_s6 + $0xe0] ss:$8 sps:$4 sm:$0xff]  }
 0x90a   :  { %6879 = vmatprep.subr.bf16.mxu0 %v9427_v62  ;;  %7201 = vmatpush1.bf16.msra.mxu1 %v9470_v32  ;;  %v9505_v62 = vld [vmem:[%s13292_s6 + $0xf4] ss:$8 sps:$4 sm:$0xff]  }
 0x90b   :  { %7202 = vmatprep.subr.bf16.mxu1 %v9475_v9 }
 0x90d   :  { %6880 = vmatpush1.bf16.msra.mxu0 %v9425_v63  ;;  %v9503_v63 = vld [vmem:[%s13292_s6 + $0xf0] ss:$8 sps:$4 sm:$0xff]  }
 0x90e   :  { %6881 = vmatprep.subr.bf16.mxu0 %v9430_v47  ;;  %7203 = vmatpush1.bf16.msra.mxu1 %v9473_v15  ;;  %v6910_v47 = vld [vmem:[#allocation2 + $0xa8] sm:$0xff] }
 0x90f   :  { %7204 = vmatprep.subr.bf16.mxu1 %v9478_v25 }
 0x911   :  { %6882 = vmatpush1.bf16.msra.mxu0 %v9428_v56  ;;  %v6912_v56 = vunpack.c.l.bf16 %v6910_v47 }
 0x912   :  { %6883 = vmatprep.subr.bf16.mxu0 %v9433_v11  ;;  %7205 = vmatpush1.bf16.msra.mxu1 %v9476_v33 }
 0x913   :  { %7206 = vmatprep.subr.bf16.mxu1 %v9481_v36 }
 0x915   :  { %6884 = vmatpush1.bf16.msra.mxu0 %v9431_v42 }
 0x916   :  { %6885 = vmatprep.subr.bf16.mxu0 %v9436_v20  ;;  %7207 = vmatpush1.bf16.msra.mxu1 %v9479_v44 }
 0x917   :  { %7208 = vmatprep.subr.bf16.mxu1 %v9484_v43  ;;  %v6918_v43 = vunpack.c.h.bf16 %v6915_v22 }
 0x919   :  { %6886 = vmatpush1.bf16.msra.mxu0 %v9434_v57 }
 0x91a   :  { %6887 = vmatprep.subr.bf16.mxu0 %v9439_v50  ;;  %7209 = vmatpush1.bf16.msra.mxu1 %v9482_v7 }
 0x91b   :  { %7210 = vmatprep.subr.bf16.mxu1 %v9487_v1 }
 0x91d   :  { %6888 = vmatpush1.bf16.msra.mxu0 %v9437_v48  ;;  %v6913_v48 = vunpack.c.h.bf16 %v6910_v47 }
 0x91e   :  { %6889 = vmatprep.subr.bf16.mxu0 %v9442_v17  ;;  %7211 = vmatpush1.bf16.msra.mxu1 %v9485_v24 }
 0x91f   :  { %7212 = vmatprep.subr.bf16.mxu1 %v9490_v31 }
 0x921   :  { %6890 = vmatpush1.bf16.msra.mxu0 %v9440_v27 }
 0x922   :  { %6891 = vmatprep.subr.bf16.mxu0 %v9445_v39 }
 0x925   :  { %6892 = vmatpush1.bf16.msra.mxu0 %v9443_v54 }
 0x926   :  { %6893 = vmatprep.subr.bf16.mxu0 %v9448_v45 }
 0x929   :  { %6894 = vmatpush1.bf16.msra.mxu0 %v9446_v0 }
 0x92a   :  { %6895 = vmatprep.subr.bf16.mxu0 %v9451_v59 }
 0x92d   :  { %6896 = vmatpush1.bf16.msra.mxu0 %v9449_v61 }
 0x92e   :  { %6897 = vmatprep.subr.bf16.mxu0 %v9454_v12 }
 0x931   :  { %6898 = vmatpush1.bf16.msra.mxu0 %v9452_v38 }
 0x932   :  { %6899 = vmatprep.subr.bf16.mxu0 %v9457_v29 }
 0x935   :  { %6900 = vmatpush1.bf16.msra.mxu0 %v9455_v23  ;;  %v6911_v23 = vld [vmem:[#allocation2 + $0xb0] sm:$0xf] }
 0x936   :  { %v6914_v37 = vunpack.c.l.bf16 %v6911_v23 }
 0x938   :  { %6902 = vmatmul.mubr.bf16.vlgmr.msra.gmra.mrb[76].mxu0 %v12881_v16  ;;  %v9488_v16 = vld [vmem:[%s13292_s6 + $0xa0] ss:$8 sps:$4 sm:$0xff]  }
 0x939   :  { %7213 = vmatpush1.bf16.msra.mxu1 %v9488_v16 }
 0x93a   :  { %7214 = vmatprep.subr.bf16.mxu1 %v9493_v14 }
 0x93d   :  { %7215 = vmatpush1.bf16.msra.mxu1 %v9491_v58 }
 0x93e   :  { %7216 = vmatprep.subr.bf16.mxu1 %v9496_v40 }
 0x941   :  { %7217 = vmatpush1.bf16.msra.mxu1 %v9494_v53 }
 0x942   :  { %7218 = vmatprep.subr.bf16.mxu1 %v9499_v8  ;;  %v6916_v8 = vld [vmem:[#allocation2 + $0x14] sm:$0xf] }
 0x945   :  { %7219 = vmatpush1.bf16.msra.mxu1 %v9497_v51  ;;  %v6919_v51 = vunpack.c.l.bf16 %v6916_v8 }
 0x946   :  { %7220 = vmatprep.subr.bf16.mxu1 %v9502_v4 }
 0x949   :  { %7221 = vmatpush1.bf16.msra.mxu1 %v9500_v34 }
 0x94a   :  { %7222 = vmatprep.subr.bf16.mxu1 %v9505_v62 }
 0x94d   :  { %7223 = vmatpush1.bf16.msra.mxu1 %v9503_v63 }
 0x9cb   :  { %v6821_v11 = vpop.f32.mrb[72].mxu0  ;;  %v6862_v42 = vpop.f32.mrb[60].mxu1 }
 0x9cc   :  { %v6920_v20 = vadd.f32 %v6912_v56, %v6821_v11  ;;  %v6823_v57 = vpop.f32.mrb[73].mxu0  ;;  %v6864_v50 = vpop.f32.mrb[61].mxu1  ;;  %v6934_v60 = vadd.f32 %v12847_v49, %v6862_v42 }
 0x9cd   :  { %v6825_v17 = vpop.f32.mrb[74].mxu0  ;;  %v6866_v27 = vpop.f32.mrb[62].mxu1  ;;  %v6921_v0 = vadd.f32 %v6913_v48, %v6823_v57  ;;  %v6942_v21 = vadd.f32 %v6917_v2, %v6864_v50 }
 0x9ce   :  { %v8573_v39 = vmul.f32 -1.442695, %v6920_v20  ;;  %v6826_v54 = vpop.f32.mrb[75].mxu0  ;;  %v6867_v45 = vpop.f32.mrb[63].mxu1 }
 0x9cf   :  { %v8574_v59 = vmul.f32 -1.442695, %v6921_v0  ;;  %v8575_v26 = vmul.f32 -1.442695, %v6942_v21  ;;  %v13579_v54 = vld [vmem:[#allocation4_spill] sm:$0xff]  ;;  %v13580_v0 = vld [vmem:[#allocation5_spill] sm:$0xff] }
 0x9d0   :  { %9670 = vpow2.f32 %v8573_v39  ;;  %v7020_v39 = vld [vmem:[%s13293_s7] sm:$0x3] }
 0x9d1   :  { %9672 = vpow2.f32 %v8574_v59  ;;  %v7025_v45 = vrot.slane %v7020_v39, %v13579_v54  ;;  %v7029_v59 = vrot.slane %v7020_v39, %v13580_v0 }
 0x9da   :  { %v9671_v61 = vpop.eup %9670 }
 0x9db   :  { %v6928_v12 = vadd.f32 1.0, %v9671_v61  ;;  %v9673_v38 = vpop.eup %9672 }
 0x9dc   :  { %v6929_v29 = vadd.f32 1.0, %v9673_v38 }
 0x9dd   :  { %9674 = vrcp.f32 %v6928_v12 }
 0x9de   :  { %9676 = vrcp.f32 %v6929_v29 }
 0x9e7   :  { %v9675_v18 = vpop.eup %9674 }
 0x9e8   :  { %v6935_v30 = vmul.f32 %v9675_v18, %v6934_v60  ;;  %v9677_v32 = vpop.eup %9676  ;;  %v13098_v60 = vsel %vm2362_vm12, %v12860_v6, 0.0  ;;  %v13116_v6 = vsel %vm3137_vm14, %v12664_v3, 0.0 }
 0x9e9   :  { %v6938_v9 = vsub.f32 1.0, %v9677_v32  ;;  %v6940_v33 = vmul.f32 %v9677_v32, %v12866_v10 }
 0x9ea   :  { %v6936_v19 = vadd.f32 %v6935_v30, %v6914_v37  ;;  %v13582_v37 = vld [vmem:[#allocation34_spill] sm:$0xff] }
 0x9ec   :  { %9678 = vtanh.f32 %v6936_v19 }
 0x9ed   :  { %9680 = vpow2.f32 %v8575_v26  ;;  %v13583_v26 = vld [vmem:[#allocation9_spill] sm:$0xff] }
 0x9ee   :  { %v13111_v32 = vsel %vm3137_vm14, %v13583_v26, 0.0 }
 0x9f6   :  { %v9679_v15 = vpop.eup %9678 }
 0x9f7   :  { %v6939_v25 = vmul.f32 %v9679_v15, %v6938_v9  ;;  %v9681_v49 = vpop.eup %9680  ;;  %v13584_v15 = vld [vmem:[#allocation12_spill] sm:$0xff] }
 0x9f8   :  { %v6950_v44 = vadd.f32 1.0, %v9681_v49  ;;  %v13586_v49 = vld [vmem:[#allocation44_spill] sm:$0xff] }
 0x9f9   :  { %v13074_v36 = vadd.f32 %v6940_v33, %v6939_v25  ;;  %v13123_v33 = vsel %vm3920_vm1, %v13584_v15, 0.0 }
 0x9fa   :  { %9682 = vrcp.f32 %v6950_v44  ;;  %v13128_v44 = vsel %vm3920_vm1, %v13586_v49, 0.0 }
 0x9fb   :  { %v6968_v57 = vsel %vm1597_vm8, %v13074_v36, %v12866_v10  ;;  %v13581_v10 = vld [vmem:[#allocation35_spill] sm:$0xff] }
 0x9fc   :  { %v6986_v27 = vpack.c.bf16 %v6968_v57, %v6968_v57  ;;  %v13093_v29 = vsel %vm2362_vm12, %v13581_v10, 0.0  ;;  %v13592_v57 = vld [vmem:[#allocation38_spill] sm:$0xff] }
 0xa04   :  { %v9683_v14 = vpop.eup %9682 }
 0xa0b   :  { %v6903_v7 = vpop.f32.mrb[76].mxu0 }
 0xa0c   :  { %v6943_v1 = vadd.f32 %v6918_v43, %v6903_v7  ;;  %v6905_v24 = vpop.f32.mrb[77].mxu0  ;;  %v13587_v43 = vld [vmem:[#allocation41_spill] sm:$0xff] }
 0xa0d   :  { %v6956_v31 = vadd.f32 %v12856_v41, %v6905_v24  ;;  %v6907_v16 = vpop.f32.mrb[78].mxu0  ;;  %v13589_v24 = vld [vmem:[#allocation13_spill] sm:$0xff] }
 0xa0e   :  { %v8576_v58 = vmul.f32 -1.442695, %v6943_v1  ;;  %v6908_v40 = vpop.f32.mrb[79].mxu0  ;;  %v13135_v1 = vsel %vm3912_vm0, %v13587_v43, 0.0  ;;  %v7265_v16 = vld [vmem:[%s13294_s8] sm:$0x3] }
 0xa0f   :  { %v6957_v53 = vmul.f32 %v9683_v14, %v6956_v31  ;;  %v13140_v31 = vsel %vm3912_vm0, %v13589_v24, 0.0  ;;  %v13150_v40 = vsel %vm2370_vm13, %v12851_v46, 0.0  ;;  %v13591_v46 = vld [vmem:[#allocation11_spill] sm:$0xff]  ;;  %v7274_v13 = vrot.slane %v7265_v16, %v13580_v0 }
 0xa10   :  { %9684 = vpow2.f32 %v8576_v58 }
 0xa11   :  { %v6958_v62 = vadd.f32 %v6957_v53, %v6919_v51  ;;  %v13590_v53 = vld [vmem:[#allocation39_spill] sm:$0xff] }
 0xa12   :  { %v13155_v8 = vsel %vm2370_vm13, %v13590_v53, 0.0 }
 0xa1a   :  { %v9685_v4 = vpop.eup %9684 }
 0xa1b   :  { %v6951_v34 = vadd.f32 1.0, %v9685_v4  ;;  %v7270_v4 = vrot.slane %v7265_v16, %v13579_v54 }
 0xa1d   :  { %9686 = vrcp.f32 %v6951_v34 }
 0xa1e   :  { %9688 = vtanh.f32 %v6958_v62  ;;  %v13163_v62 = vsel %vm3145_vm15, %v12660_v5, 0.0 }
 0xa27   :  { %v9687_v63 = vpop.eup %9686 }
 0xa28   :  { %v6960_v47 = vsub.f32 1.0, %v9687_v63  ;;  %v9689_v56 = vpop.eup %9688  ;;  %v6962_v42 = vmul.f32 %v9687_v63, %v12872_v35  ;;  %v13168_v63 = vsel %vm3145_vm15, %v13591_v46, 0.0  ;;  %v9507_v46 = vld [vmem:[%s13295_s9] sm:$0xff]  }
 0xa2a   :  { %v6961_v11 = vmul.f32 %v9689_v56, %v6960_v47  ;;  %v13175_v56 = vsel %vm1597_vm8, %v13074_v36, 0.0 }
 0xa2c   :  { %v6963_v41 = vadd.f32 %v6962_v42, %v6961_v11 }
 0xa2e   :  { %v6969_v48 = vsel %vm1590_vm9, %v6963_v41, %v12872_v35  ;;  %v13102_v22 = vsel %vm1590_vm9, %v6963_v41, 0.0 }
 0xa2f   :  { %v6987_v17 = vpack.c.bf16 %v6969_v48, %v6969_v48 }
 0xa31   :  { %7224 = vmatprep.mubr.bf16.mxu1 %v6987_v17 }
 0xa32   :  { %7225 = vmatmul.mubr.bf16.vlgmr.msra.gmra.mrb[64].mxu1 %v6986_v27 }
 0xb05   :  { %v7226_v61 = vpop.f32.mrb[64].mxu1 }
 0xb06   :  { %v7227_v12 = vadd.f32 %v7226_v61, %v7025_v45  ;;  %v7228_v38 = vpop.f32.mrb[65].mxu1 }
 0xb07   :  { %v7229_v35 = vadd.f32 %v7228_v38, %v7029_v59  ;;  %v7230_v23 = vpop.f32.mrb[66].mxu1 }
 0xb08   :  { %v7231_v18 = vpop.f32.mrb[67].mxu1  ;;  %v7233_v30 = vadd.f32 %v7227_v12, %v13582_v37  ;;  %v7235_v2 = vadd.f32 %v7227_v12, %v13093_v29  ;;  %v7237_v28 = vadd.f32 %v7227_v12, %v13111_v32  ;;  %v7241_v3 = vadd.f32 %v7227_v12, %v13123_v33 }
 0xb09   :  { %v7234_v19 = vadd.f32 %v7229_v35, %v13102_v22  ;;  %v7236_v21 = vadd.f32 %v7229_v35, %v13098_v60  ;;  %v7238_v9 = vadd.f32 %v7229_v35, %v13116_v6  ;;  %v7242_v52 = vadd.f32 %v7229_v35, %v13128_v44 }
 0xb0a   :  { %9690 = vtanh.f32 %v7233_v30  ;;  %v7239_v14 = vadd.f32 %v7227_v12, %v13135_v1  ;;  %v7240_v58 = vadd.f32 %v7229_v35, %v13140_v31  ;;  %v7245_v51 = vadd.f32 %v7227_v12, %v13150_v40 }
 0xb0b   :  { %9692 = vtanh.f32 %v7234_v19  ;;  %v7246_v34 = vadd.f32 %v7229_v35, %v13155_v8  ;;  %v7243_v47 = vadd.f32 %v7227_v12, %v13163_v62  ;;  %v7244_v11 = vadd.f32 %v7229_v35, %v13168_v63 }
 0xb0c   :  { %9694 = vtanh.f32 %v7235_v2  ;;  %v7247_v42 = vadd.f32 %v7227_v12, %v13175_v56  ;;  %v7248_v50 = vadd.f32 %v7229_v35, %v13592_v57 }
 0xb0d   :  { %9696 = vtanh.f32 %v7236_v21 }
 0xb0e   :  { %9698 = vtanh.f32 %v7237_v28 }
 0xb0f   :  { %9700 = vtanh.f32 %v7238_v9 }
 0xb10   :  { %9702 = vtanh.f32 %v7241_v3 }
 0xb11   :  { %9704 = vtanh.f32 %v7242_v52 }
 0xb12   :  { %9706 = vtanh.f32 %v7239_v14 }
 0xb13   :  { %9708 = vtanh.f32 %v7240_v58 }
 0xb14   :  { %v9691_v5 = vpop.eup %9690  ;;  %9710 = vtanh.f32 %v7245_v51 }
 0xb15   :  { %v9693_v55 = vpop.eup %9692  ;;  %v7277_v41 = vmul.f32 %v9691_v5, %v7270_v4  ;;  %9712 = vtanh.f32 %v7246_v34  ;;  %v9506_v34 = vld [vmem:[%s13295_s9 + $0x40] sm:$0xff]   ;;  %v9512_v5 = vld [vmem:[%s13295_s9 + $0x58] sm:$0xff]  }
 0xb16   :  { %v9695_v48 = vpop.eup %9694  ;;  %v7278_v17 = vmul.f32 %v9693_v55, %v7274_v13  ;;  %9714 = vtanh.f32 %v7243_v47  ;;  %8658 = vmatprep.subr.bf16.mxu0 %v9506_v34  ;;  %v9508_v47 = vld [vmem:[%s13295_s9 + $0x48] sm:$0xff]   ;;  %v9514_v55 = vld [vmem:[%s13295_s9 + $0x60] sm:$0xff]  }
 0xb17   :  { %v9697_v27 = vpop.eup %9696  ;;  %v7279_v39 = vmul.f32 %v9695_v48, %v7270_v4  ;;  %9716 = vtanh.f32 %v7244_v11  ;;  %8659 = vmatpush3.bf16.msra.mxu0 %v9507_v46  ;;  %v9511_v11 = vld [vmem:[%s13295_s9 + $0x10] sm:$0xff]   ;;  %v9517_v48 = vld [vmem:[%s13295_s9 + $0x28] sm:$0xff]  }
 0xb18   :  { %v9699_v36 = vpop.eup %9698  ;;  %v7293_v20 = vadd.f32 %v7278_v17, %v7277_v41  ;;  %v7280_v54 = vmul.f32 %v9697_v27, %v7274_v13  ;;  %9718 = vtanh.f32 %v7247_v42  ;;  %8660 = vmatprep.subr.bf16.mxu0 %v9508_v47  ;;  %v9513_v42 = vld [vmem:[%s13295_s9 + $0x18] sm:$0xff]   ;;  %v9515_v41 = vld [vmem:[%s13295_s9 + $0x20] sm:$0xff]   ;;  %v9518_v17 = vld [vmem:[%s13295_s9 + $0x70] sm:$0xff]  }
 0xb19   :  { %v9701_v45 = vpop.eup %9700  ;;  %v7281_v0 = vmul.f32 %v9699_v36, %v7270_v4  ;;  %9720 = vtanh.f32 %v7248_v50  ;;  %v9516_v50 = vld [vmem:[%s13295_s9 + $0x68] sm:$0xff]   ;;  %v9519_v27 = vld [vmem:[%s13295_s9 + $0x30] sm:$0xff]   ;;  %v9521_v36 = vld [vmem:[%s13295_s9 + $0x38] sm:$0xff]  }
 0xb1a   :  { %v9703_v59 = vpop.eup %9702  ;;  %7294 = vadd.xlane.f32.xlu0 %v7293_v20  ;;  %v7296_v61 = vadd.f32 %v7280_v54, %v7279_v39  ;;  %v7282_v12 = vmul.f32 %v9701_v45, %v7274_v13  ;;  %v9520_v39 = vld [vmem:[%s13295_s9 + $0x78] sm:$0xff]   ;;  %v9746_v20 = vmov 0.0  }
 0xb1b   :  { %v9705_v38 = vpop.eup %9704  ;;  %v7285_v10 = vmul.f32 %v9703_v59, %v7270_v4 }
 0xb1c   :  { %v9707_v35 = vpop.eup %9706  ;;  %7297 = vadd.xlane.f32.xlu1 %v7296_v61  ;;  %v7299_v23 = vadd.f32 %v7282_v12, %v7281_v0  ;;  %v7286_v18 = vmul.f32 %v9705_v38, %v7274_v13 }
 0xb1d   :  { %v9709_v30 = vpop.eup %9708  ;;  %v7283_v2 = vmul.f32 %v9707_v35, %v7270_v4 }
 0xb1e   :  { %v9711_v19 = vpop.eup %9710  ;;  %7300 = vadd.xlane.f32.xlu0 %v7299_v23  ;;  %v7305_v21 = vadd.f32 %v7286_v18, %v7285_v10  ;;  %v7284_v26 = vmul.f32 %v9709_v30, %v7274_v13 }
 0xb1f   :  { %v9713_v28 = vpop.eup %9712  ;;  %v7289_v9 = vmul.f32 %v9711_v19, %v7270_v4 }
 0xb20   :  { %v9715_v15 = vpop.eup %9714  ;;  %7306 = vadd.xlane.f32.xlu1 %v7305_v21  ;;  %v7302_v25 = vadd.f32 %v7284_v26, %v7283_v2  ;;  %v7290_v49 = vmul.f32 %v9713_v28, %v7274_v13 }
 0xb21   :  { %v9717_v3 = vpop.eup %9716  ;;  %v7287_v52 = vmul.f32 %v9715_v15, %v7270_v4 }
 0xb22   :  { %v9719_v43 = vpop.eup %9718  ;;  %7303 = vadd.xlane.f32.xlu0 %v7302_v25  ;;  %v7311_v7 = vadd.f32 %v7290_v49, %v7289_v9  ;;  %v7288_v24 = vmul.f32 %v9717_v3, %v7274_v13 }
 0xb23   :  { %v9721_v16 = vpop.eup %9720  ;;  %v7291_v14 = vmul.f32 %v9719_v43, %v7270_v4  ;;  %v9509_v4 = vld [vmem:[%s13295_s9 + $0x8] sm:$0xff]  }
 0xb24   :  { %7312 = vadd.xlane.f32.xlu1 %v7311_v7  ;;  %v7308_v58 = vadd.f32 %v7288_v24, %v7287_v52  ;;  %v7292_v53 = vmul.f32 %v9721_v16, %v7274_v13  ;;  %v9510_v13 = vld [vmem:[%s13295_s9 + $0x50] sm:$0xff]   ;;  %8661 = vmatpush3.bf16.msra.mxu0 %v9509_v4 }
 0xb25   :  { %8662 = vmatprep.subr.bf16.mxu0 %v9510_v13 }
 0xb26   :  { %7309 = vadd.xlane.f32.xlu0 %v7308_v58  ;;  %v7314_v51 = vadd.f32 %v7292_v53, %v7291_v14 }
 0xb28   :  { %8663 = vmatpush3.bf16.msra.mxu0 %v9511_v11 }
 0xb29   :  { %8664 = vmatprep.subr.bf16.mxu0 %v9512_v5 }
 0xb2a   :  { %7315 = vadd.xlane.f32.xlu0 %v7314_v51 }
 0xb2c   :  { %8665 = vmatpush3.bf16.msra.mxu0 %v9513_v42 }
 0xb2d   :  { %8666 = vmatprep.subr.bf16.mxu0 %v9514_v55 }
 0xb30   :  { %8667 = vmatpush3.bf16.msra.mxu0 %v9515_v41 }
 0xb31   :  { %8668 = vmatprep.subr.bf16.mxu0 %v9516_v50 }
 0xb34   :  { %8669 = vmatpush3.bf16.msra.mxu0 %v9517_v48 }
 0xb35   :  { %8670 = vmatprep.subr.bf16.mxu0 %v9518_v17 }
 0xb38   :  { %8671 = vmatpush3.bf16.msra.mxu0 %v9519_v27 }
 0xb39   :  { %8672 = vmatprep.subr.bf16.mxu0 %v9520_v39 }
 0xb3c   :  { %8673 = vmatpush3.bf16.msra.mxu0 %v9521_v36 }
 0xb3d   :  { %8689 = vmatprep.subr.bf16.mxu0 %v9746_v20 }
 0xba7   :  { %v7295_v54 = vpop.xlane.xlu0 %7294 }
 0xba9   :  { %v7298_v45 = vpop.xlane.xlu1 %7297 }
 0xbab   :  { %v7301_v0 = vpop.xlane.xlu0 %7300 }
 0xbad   :  { %v7307_v59 = vpop.xlane.xlu1 %7306 }
 0xbae   :  { %v7317_v23 = vmax.f32 %v7295_v54, %v7307_v59 }
 0xbaf   :  { %v7304_v61 = vpop.xlane.xlu0 %7303 }
 0xbb1   :  { %v7313_v38 = vpop.xlane.xlu1 %7312 }
 0xbb2   :  { %v7319_v18 = vmax.f32 %v7301_v0, %v7313_v38 }
 0xbb3   :  { %v7310_v12 = vpop.xlane.xlu0 %7309 }
 0xbb4   :  { %v7318_v10 = vmax.f32 %v7298_v45, %v7310_v12 }
 0xbb6   :  { %v7321_v2 = vmax.f32 %v7317_v23, %v7318_v10 }
 0xbb7   :  { %v7316_v35 = vpop.xlane.xlu0 %7315 }
 0xbb8   :  { %v7320_v30 = vmax.f32 %v7304_v61, %v7316_v35 }
 0xbba   :  { %v7322_v19 = vmax.f32 %v7319_v18, %v7320_v30 }
 0xbbc   :  { %v7323_v21 = vmax.f32 %v7321_v2, %v7322_v19 }
 0xbbe   :  { %v7324_v26 = vsub.f32 %v7295_v54, %v7323_v21  ;;  %v7325_v28 = vsub.f32 %v7298_v45, %v7323_v21  ;;  %v7326_v9 = vsub.f32 %v7301_v0, %v7323_v21  ;;  %v7327_v15 = vsub.f32 %v7304_v61, %v7323_v21 }
 0xbbf   :  { %v7328_v3 = vsub.f32 %v7307_v59, %v7323_v21  ;;  %v7329_v43 = vsub.f32 %v7310_v12, %v7323_v21  ;;  %v7330_v24 = vsub.f32 %v7313_v38, %v7323_v21  ;;  %v7331_v14 = vsub.f32 %v7316_v35, %v7323_v21 }
 0xbc0   :  { %v7332_v25 = vmul.f32 1.442695, %v7324_v26  ;;  %v7334_v49 = vmul.f32 1.442695, %v7325_v28  ;;  %v7336_v52 = vmul.f32 1.442695, %v7326_v9 }
 0xbc1   :  { %v7338_v7 = vmul.f32 1.442695, %v7327_v15  ;;  %v7340_v16 = vmul.f32 1.442695, %v7328_v3  ;;  %v7342_v58 = vmul.f32 1.442695, %v7329_v43 }
 0xbc2   :  { %9722 = vpow2.f32 %v7332_v25  ;;  %v7344_v53 = vmul.f32 1.442695, %v7330_v24  ;;  %v7346_v51 = vmul.f32 1.442695, %v7331_v14 }
 0xbc3   :  { %9724 = vpow2.f32 %v7334_v49 }
 0xbc4   :  { %9726 = vpow2.f32 %v7336_v52 }
 0xbc5   :  { %9728 = vpow2.f32 %v7338_v7 }
 0xbc6   :  { %9730 = vpow2.f32 %v7340_v16 }
 0xbc7   :  { %9732 = vpow2.f32 %v7342_v58 }
 0xbc8   :  { %9734 = vpow2.f32 %v7344_v53 }
 0xbc9   :  { %9736 = vpow2.f32 %v7346_v51 }
 0xbcc   :  { %v9723_v34 = vpop.eup %9722 }
 0xbcd   :  { %v9725_v46 = vpop.eup %9724 }
 0xbce   :  { %v7348_v47 = vadd.f32 %v9725_v46, %v9723_v34  ;;  %v9727_v4 = vpop.eup %9726 }
 0xbcf   :  { %v9729_v11 = vpop.eup %9728 }
 0xbd0   :  { %v7349_v13 = vadd.f32 %v9727_v4, %v7348_v47  ;;  %v9731_v42 = vpop.eup %9730  ;;  %v9528_v47 = vld [vmem:[%s13295_s9 + $0xb0] sm:$0xff]  }
 0xbd1   :  { %v9733_v41 = vpop.eup %9732 }
 0xbd2   :  { %v7350_v5 = vadd.f32 %v9729_v11, %v7349_v13  ;;  %v9735_v48 = vpop.eup %9734  ;;  %v7397_v13 = vld [vmem:[%s13296_s11] sm:$0xff] }
 0xbd3   :  { %v9737_v27 = vpop.eup %9736 }
 0xbd4   :  { %v7351_v55 = vadd.f32 %v9731_v42, %v7350_v5 }
 0xbd6   :  { %v7352_v50 = vadd.f32 %v9733_v41, %v7351_v55 }
 0xbd8   :  { %v7353_v17 = vadd.f32 %v9735_v48, %v7352_v50 }
 0xbda   :  { %v7354_v39 = vadd.f32 %v9737_v27, %v7353_v17 }
 0xbdc   :  { %9738 = vrcp.f32 %v7354_v39 }
 0xbe6   :  { %v9739_v36 = vpop.eup %9738 }
 0xbe7   :  { %v7356_v54 = vmul.f32 %v9739_v36, %v7354_v39 }
 0xbe9   :  { %v7357_v45 = vsub.f32 2.0, %v7356_v54 }
 0xbeb   :  { %v7358_v0 = vmul.f32 %v9739_v36, %v7357_v45 }
 0xbed   :  { %v7359_v59 = vmul.f32 %v9723_v34, %v7358_v0  ;;  %v7360_v61 = vmul.f32 %v9725_v46, %v7358_v0  ;;  %v7361_v12 = vmul.f32 %v9727_v4, %v7358_v0  ;;  %v7362_v38 = vmul.f32 %v9729_v11, %v7358_v0  ;;  %v9527_v46 = vld [vmem:[%s13295_s9 + $0xa8] sm:$0xff]   ;;  %v9529_v4 = vld [vmem:[%s13295_s9 + $0xb8] sm:$0xff]  }
 0xbee   :  { %v7363_v23 = vmul.f32 %v9731_v42, %v7358_v0  ;;  %v7364_v21 = vmul.f32 %v9733_v41, %v7358_v0  ;;  %v7365_v25 = vmul.f32 %v9735_v48, %v7358_v0  ;;  %v7400_v11 = vpack.c.bf16 %v7397_v13, %v7397_v13  ;;  %v8609_v48 = vld [vmem:[%s13297_s10] ss:$0 sm:$0xff] }
 0xbef   :  { %v7368_v10 = vmul.f32 %v7359_v59, %v13102_v22  ;;  %v7370_v35 = vmul.f32 %v7360_v61, %v13098_v60  ;;  %v7372_v18 = vmul.f32 %v7361_v12, %v13116_v6  ;;  %v7367_v2 = vmul.f32 %v7359_v59, %v13582_v37 }
 0xbf0   :  { %v7369_v19 = vmul.f32 %v7360_v61, %v13093_v29  ;;  %v7374_v26 = vmul.f32 %v7362_v38, %v13140_v31  ;;  %v7371_v9 = vmul.f32 %v7361_v12, %v13111_v32  ;;  %v7376_v22 = vmul.f32 %v7363_v23, %v13128_v44 }
 0xbf1   :  { %v7390_v30 = vadd.f32 %v7370_v35, %v7368_v10  ;;  %v7373_v60 = vmul.f32 %v7362_v38, %v13135_v1  ;;  %v7366_v6 = vmul.f32 %v9737_v27, %v7358_v0  ;;  %v7378_v52 = vmul.f32 %v7364_v21, %v13168_v63 }
 0xbf2   :  { %v7383_v15 = vadd.f32 %v7369_v19, %v7367_v2  ;;  %v7375_v29 = vmul.f32 %v7363_v23, %v13123_v33  ;;  %v7380_v31 = vmul.f32 %v7365_v25, %v13155_v8  ;;  %v7377_v32 = vmul.f32 %v7364_v21, %v13163_v62  ;;  %v9522_v33 = vld [vmem:[%s13295_s9 + $0x80] sm:$0xff]   ;;  %v9523_v62 = vld [vmem:[%s13295_s9 + $0x88] sm:$0xff]  }
 0xbf3   :  { %v7391_v28 = vadd.f32 %v7390_v30, %v7372_v18  ;;  %v7382_v16 = vmul.f32 %v7366_v6, %v13592_v57  ;;  %v7379_v14 = vmul.f32 %v7365_v25, %v13150_v40  ;;  %v7381_v53 = vmul.f32 %v7366_v6, %v13175_v56  ;;  %v9524_v40 = vld [vmem:[%s13295_s9 + $0x90] sm:$0xff]   ;;  %v9525_v56 = vld [vmem:[%s13295_s9 + $0x98] sm:$0xff]   ;;  %v9526_v57 = vld [vmem:[%s13295_s9 + $0xa0] sm:$0xff]  }
 0xbf4   :  { %v7384_v3 = vadd.f32 %v7383_v15, %v7371_v9 }
 0xbf5   :  { %v7392_v49 = vadd.f32 %v7391_v28, %v7374_v26 }
 0xbf6   :  { %v7385_v43 = vadd.f32 %v7384_v3, %v7373_v60 }
 0xbf7   :  { %v7393_v37 = vadd.f32 %v7392_v49, %v7376_v22 }
 0xbf8   :  { %v7386_v24 = vadd.f32 %v7385_v43, %v7375_v29 }
 0xbf9   :  { %v7394_v7 = vadd.f32 %v7393_v37, %v7378_v52 }
 0xbfa   :  { %v7387_v1 = vadd.f32 %v7386_v24, %v7377_v32 }
 0xbfb   :  { %v7395_v44 = vadd.f32 %v7394_v7, %v7380_v31 }
 0xbfc   :  { %v7388_v63 = vadd.f32 %v7387_v1, %v7379_v14 }
 0xbfd   :  { %v7396_v58 = vadd.f32 %v7395_v44, %v7382_v16 }
 0xbfe   :  { %v7389_v34 = vadd.f32 %v7388_v63, %v7381_v53 }
 0xbff   :  { %v7399_v51 = vpack.c.bf16 %v7396_v58, %v7396_v58 }
 0xc00   :  { %v7398_v8 = vpack.c.bf16 %v7389_v34, %v7389_v34 }
 0xc01   :  { %7632 = vmatprep.mubr.bf16.mxu0 %v7399_v51 }
 0xc02   :  { %7633 = vmatmul.mubr.bf16.vlgmr.msra.gmra.mrb[80].mxu0 %v7398_v8 }
 0xc03   :  { %8690 = vmatpush3.bf16.msra.mxu0 %v9522_v33  ;;  %8705 = vmatprep.mubr.msk.bf16.mxu0 %vm9747_vm2, %v9746_v20 }
 0xc04   :  { %8691 = vmatprep.subr.bf16.mxu0 %v9746_v20 }
 0xc07   :  { %8692 = vmatpush3.bf16.msra.mxu0 %v9523_v62 }
 0xc08   :  { %8693 = vmatprep.subr.bf16.mxu0 %v9746_v20 }
 0xc0b   :  { %8694 = vmatpush3.bf16.msra.mxu0 %v9524_v40 }
 0xc0c   :  { %8695 = vmatprep.subr.bf16.mxu0 %v9746_v20 }
 0xc0f   :  { %8696 = vmatpush3.bf16.msra.mxu0 %v9525_v56 }
 0xc10   :  { %8697 = vmatprep.subr.bf16.mxu0 %v9746_v20 }
 0xc13   :  { %8698 = vmatpush3.bf16.msra.mxu0 %v9526_v57 }
 0xc14   :  { %8699 = vmatprep.subr.bf16.mxu0 %v9746_v20 }
 0xc17   :  { %8700 = vmatpush3.bf16.msra.mxu0 %v9527_v46 }
 0xc18   :  { %8701 = vmatprep.subr.bf16.mxu0 %v9746_v20 }
 0xc1b   :  { %8702 = vmatpush3.bf16.msra.mxu0 %v9528_v47 }
 0xc1c   :  { %8703 = vmatprep.subr.bf16.mxu0 %v9746_v20 }
 0xc1f   :  { %8704 = vmatpush3.bf16.msra.mxu0 %v9529_v4 }
 0xc22   :  { %8706 = vmatmul.mubr.bf16.vlgmr.msra.gmra.mrb[84].mxu0 %v7400_v11 }
 0xcd5   :  { %v8674_v5 = vpop.f32.mrb[80].mxu0 }
 0xcd6   :  { %v8675_v42 = vpop.f32.mrb[81].mxu0 }
 0xcd7   :  { %v8676_v55 = vadd.f32 %v8675_v42, %v8674_v5  ;;  %v8677_v41 = vpop.f32.mrb[82].mxu0 }
 0xcd8   :  { %v8678_v50 = vpop.f32.mrb[83].mxu0 }
 0xcd9   :  { %v7635_v17 = vadd.f32 %v8676_v55, %v8609_v48 }
 0xcf5   :  { %v7674_v27 = vpop.f32.mrb[84].mxu0 }
 0xcf6   :  { %v7675_v39 = vadd.f32 %v7674_v27, %v7635_v17  ;;  %v8707_v36 = vpop.f32.mrb[85].mxu0 }
 0xcf7   :  { %v7677_v54 = vpop.f32.mrb[86].mxu0 }
 0xcf8   :  { %7680 = vst [vmem:[%s13298_s12] sm:$0xff] %v7675_v39  ;;  %v8708_v20 = vpop.f32.mrb[87].mxu0 }

</bundles_post_ra>
